<compile_context>
chip_gen: v5e
topology: v5e:2x2
jax: 0.10.0
libtpu: 0.0.40
codegen_flags: <defaults>
</compile_context>

<pallas_src>
import jax
import jax.numpy as jnp
from jax.experimental import pallas as pl
from jax.experimental.pallas import tpu as pltpu

LN_EPS = 1e-5  # nn.LayerNorm default


def _round_up(x, m):
    return ((x + m - 1) // m) * m


def byol_mlp_kernel(x_ref, w1_ref, b1_ref, g_ref, beta_ref, w2_ref, b2_ref, o_ref):
    # Linear 1 on the MXU: bf16 operands, f32 accumulation.
    h = jnp.dot(x_ref[...], w1_ref[...], preferred_element_type=jnp.float32)
    h = h + b1_ref[...]                       # f32 bias

    # LayerNorm over the hidden axis (biased variance, like nn.LayerNorm).
    # Use E[h^2] - E[h]^2 so only `h` stays live as a (tb, H) value.
    inv_h = 1.0 / h.shape[-1]
    mean = jnp.sum(h, axis=-1, keepdims=True) * inv_h
    mean_sq = jnp.sum(h * h, axis=-1, keepdims=True) * inv_h
    var = mean_sq - mean * mean
    h = (h - mean) * jax.lax.rsqrt(var + LN_EPS)
    h = h * g_ref[...] + beta_ref[...]

    # ReLU, then cast down for the second MXU matmul.
    h = jnp.maximum(h, 0.0).astype(w2_ref.dtype)

    # Linear 2 on the MXU: bf16 operands, f32 accumulation.
    out = jnp.dot(h, w2_ref[...], preferred_element_type=jnp.float32) + b2_ref[...]
    o_ref[...] = out.astype(o_ref.dtype)


def _vmem_limit_bytes(tb, Dp, H, Pp, mxu_bytes, out_bytes):
    x_tiles = 2 * tb * Dp * mxu_bytes                 # double-buffered x tile
    out_tiles = 2 * tb * Pp * out_bytes               # double-buffered out tile
    weights = 2 * (Dp * H + H * Pp) * mxu_bytes       # weights (conservative x2)
    params = 2 * (3 * H + Pp) * 4                     # b1, gamma, beta, b2
    interm = 2 * tb * H * 4                           # f32 hidden intermediate
    need = x_tiles + out_tiles + weights + params + interm
    return int(min(max(int(need * 1.5) + (1 << 20), 32 << 20), 100 << 20))


def byol_mlp(x, w1, b1, gamma, beta, w2, b2, *, tb=None, mxu_dtype=jnp.bfloat16):
    """Forward pass of BYOLMLP. Weights are (in, out); biases / LN params (1, F)."""
    B, D = x.shape
    H = w1.shape[1]
    P = w2.shape[1]
    out_dtype = x.dtype

    # LayerNorm runs over H inside the kernel; it must be lane-dense already
    # (true for the real model, hidden_size=4096).
    assert H % 128 == 0, "hidden_size must be a multiple of 128"

    # Batch tile: multiple of 8 (sublane), default 256 (MXU-friendly on v6e/v7x).
    if tb is None:
        tb = 256 if B >= 256 else _round_up(B, 8)
    tb = _round_up(min(tb, _round_up(B, 8)), 8)

    Bp = _round_up(B, tb)
    Dp = _round_up(D, 128)
    Pp = _round_up(P, 128)

    # Normalize 1-D params to (1, F).
    b1 = b1.reshape(1, H).astype(jnp.float32)
    gamma = gamma.reshape(1, H).astype(jnp.float32)
    beta = beta.reshape(1, H).astype(jnp.float32)
    b2 = b2.reshape(1, P).astype(jnp.float32)

    # Zero-pad to lane/tile-dense shapes (zeros are inert for the matmuls; padded
    # output rows/cols are sliced off below).
    xp = jnp.pad(x, ((0, Bp - B), (0, Dp - D))).astype(mxu_dtype)
    w1p = jnp.pad(w1, ((0, Dp - D), (0, 0))).astype(mxu_dtype)
    w2p = jnp.pad(w2, ((0, 0), (0, Pp - P))).astype(mxu_dtype)
    b2p = jnp.pad(b2, ((0, 0), (0, Pp - P)))

    grid = (Bp // tb,)
    mxu_bytes = jnp.dtype(mxu_dtype).itemsize
    out_bytes = jnp.dtype(out_dtype).itemsize

    cost = pl.CostEstimate(
        flops=2 * Bp * (Dp * H + H * Pp) + 8 * Bp * H,
        transcendentals=Bp,  # one rsqrt per row
        bytes_accessed=(Bp * Dp + Dp * H + H * Pp) * mxu_bytes
        + (3 * H + Pp) * 4
        + Bp * Pp * out_bytes,
    )

    out = pl.pallas_call(
        byol_mlp_kernel,
        out_shape=jax.ShapeDtypeStruct((Bp, Pp), out_dtype),
        grid_spec=pltpu.PrefetchScalarGridSpec(
            num_scalar_prefetch=0,
            grid=grid,
            in_specs=[
                pl.BlockSpec((tb, Dp), lambda i: (i, 0)),   # x tile (pipelined)
                pl.BlockSpec((Dp, H), lambda i: (0, 0)),    # W1 (grid-invariant)
                pl.BlockSpec((1, H), lambda i: (0, 0)),     # b1
                pl.BlockSpec((1, H), lambda i: (0, 0)),     # LN gamma
                pl.BlockSpec((1, H), lambda i: (0, 0)),     # LN beta
                pl.BlockSpec((H, Pp), lambda i: (0, 0)),    # W2 (grid-invariant)
                pl.BlockSpec((1, Pp), lambda i: (0, 0)),    # b2
            ],
            out_specs=pl.BlockSpec((tb, Pp), lambda i: (i, 0)),
        ),
        compiler_params=pltpu.CompilerParams(
            dimension_semantics=("parallel",),
            vmem_limit_bytes=_vmem_limit_bytes(tb, Dp, H, Pp, mxu_bytes, out_bytes),
        ),
        cost_estimate=cost,
    )(xp, w1p, b1, gamma, beta, w2p, b2p)

    return out[:B, :P]
    # TODO(synk): at very large dim/hidden on v7x (64 MiB VMEM), add a K-reduction
    # grid axis over D with an f32 accumulator scratch instead of fully-resident W1.


def init_params(key, dim, hidden, proj):
    """Matches the module's _init_weights: kaiming_normal_(fan_out, relu) ->
    std = sqrt(2 / out_features), biases zero; LayerNorm gamma=1, beta=0."""
    k1, k2 = jax.random.split(key)
    std1 = (2.0 / hidden) ** 0.5
    std2 = (2.0 / proj) ** 0.5
    w1 = jax.random.normal(k1, (dim, hidden), jnp.float32) * std1
    w2 = jax.random.normal(k2, (hidden, proj), jnp.float32) * std2
    b1 = jnp.zeros((1, hidden), jnp.float32)
    b2 = jnp.zeros((1, proj), jnp.float32)
    gamma = jnp.ones((1, hidden), jnp.float32)
    beta = jnp.zeros((1, hidden), jnp.float32)
    return w1, b1, gamma, beta, w2, b2


def byol_mlp_ref_f32(x, w1, b1, gamma, beta, w2, b2):
    """Full-f32 reference (exact PyTorch semantics)."""
    h = x @ w1 + b1
    mean = jnp.mean(h, axis=-1, keepdims=True)
    var = jnp.mean((h - mean) ** 2, axis=-1, keepdims=True)
    h = (h - mean) / jnp.sqrt(var + LN_EPS) * gamma + beta
    h = jnp.maximum(h, 0.0)
    return h @ w2 + b2


def byol_mlp_ref_bf16(x, w1, b1, gamma, beta, w2, b2):
    """Reference emulating the kernel's precision (bf16 MXU operands, f32 acc)."""
    h = jnp.dot(x.astype(jnp.bfloat16), w1.astype(jnp.bfloat16),
                preferred_element_type=jnp.float32) + b1
    inv_h = 1.0 / h.shape[-1]
    mean = jnp.sum(h, axis=-1, keepdims=True) * inv_h
    var = jnp.sum(h * h, axis=-1, keepdims=True) * inv_h - mean * mean
    h = (h - mean) * jax.lax.rsqrt(var + LN_EPS) * gamma + beta
    h = jnp.maximum(h, 0.0).astype(jnp.bfloat16)
    return jnp.dot(h, w2.astype(jnp.bfloat16),
                   preferred_element_type=jnp.float32) + b2


if __name__ == "__main__":
    key = jax.random.PRNGKey(0)

    # --- Test 1: lane/tile-dense shapes, multi-step grid (default tb=256). ---
    B, DIM, HIDDEN, PROJ = 512, 256, 512, 128
    kx, kp, k2 = jax.random.split(key, 3)
    x = jax.random.normal(kx, (B, DIM), jnp.float32)
    params = init_params(kp, DIM, HIDDEN, PROJ)

    out = jax.block_until_ready(byol_mlp(x, *params))
    assert out.shape == (B, PROJ)

    ref32 = byol_mlp_ref_f32(x, *params)
    ref16 = byol_mlp_ref_bf16(x, *params)
    # Tight match vs a reference at the kernel's own (bf16-MXU, f32-acc) precision.
    assert jnp.allclose(out, ref16, atol=2e-2, rtol=2e-2), "mismatch vs bf16-precision reference"
    # Loose match vs the exact f32 PyTorch semantics (bf16 matmul rounding only).
    assert float(jnp.max(jnp.abs(out - ref32))) < 0.25, "mismatch vs f32 reference"

    # --- Test 2: ragged shapes exercising the wrapper padding path. ---
    B2, DIM2, HIDDEN2, PROJ2 = 100, 96, 256, 72
    kx2, kp2 = jax.random.split(k2)
    x2 = jax.random.normal(kx2, (B2, DIM2), jnp.float32)
    params2 = init_params(kp2, DIM2, HIDDEN2, PROJ2)

    out2 = jax.block_until_ready(byol_mlp(x2, *params2))
    assert out2.shape == (B2, PROJ2)
    ref32_2 = byol_mlp_ref_f32(x2, *params2)
    assert float(jnp.max(jnp.abs(out2 - ref32_2))) < 0.25, "padded-path mismatch vs f32 reference"

    print("KERNEL_OK")
</pallas_src>

<mosaic_0001>
module attributes {stable_mosaic.version = 11 : i64} {
  func.func @byol_mlp_kernel(%arg0: i32, %arg1: memref<256x256xbf16, #tpu.memory_space<vmem>>, %arg2: memref<256x512xbf16, #tpu.memory_space<vmem>>, %arg3: memref<1x512xf32, #tpu.memory_space<vmem>>, %arg4: memref<1x512xf32, #tpu.memory_space<vmem>>, %arg5: memref<1x512xf32, #tpu.memory_space<vmem>>, %arg6: memref<512x128xbf16, #tpu.memory_space<vmem>>, %arg7: memref<1x128xf32, #tpu.memory_space<vmem>>, %arg8: memref<256x128xf32, #tpu.memory_space<vmem>>) attributes {dimension_semantics = [#tpu.dimension_semantics<parallel>], iteration_bounds = array<i64: 2>, scalar_prefetch = 0 : i64, scratch_operands = 0 : i64, tpu.core_type = #tpu.core_type<tc>, window_params = [{transform_indices = @transform_0, window_bounds = array<i64: 256, 256>}, {pipeline_mode = #tpu.pipeline_mode<synchronous>, transform_indices = @transform_1, window_bounds = array<i64: 256, 512>}, {pipeline_mode = #tpu.pipeline_mode<synchronous>, transform_indices = @transform_2, window_bounds = array<i64: 1, 512>}, {pipeline_mode = #tpu.pipeline_mode<synchronous>, transform_indices = @transform_3, window_bounds = array<i64: 1, 512>}, {pipeline_mode = #tpu.pipeline_mode<synchronous>, transform_indices = @transform_4, window_bounds = array<i64: 1, 512>}, {pipeline_mode = #tpu.pipeline_mode<synchronous>, transform_indices = @transform_5, window_bounds = array<i64: 512, 128>}, {pipeline_mode = #tpu.pipeline_mode<synchronous>, transform_indices = @transform_6, window_bounds = array<i64: 1, 128>}, {transform_indices = @transform_7, window_bounds = array<i64: 256, 128>}]} {
    %c0 = arith.constant 0 : index
    %c0_0 = arith.constant 0 : index
    %0 = vector.load %arg1[%c0, %c0_0] : memref<256x256xbf16, #tpu.memory_space<vmem>>, vector<256x256xbf16>
    %c0_1 = arith.constant 0 : index
    %c0_2 = arith.constant 0 : index
    %1 = vector.load %arg2[%c0_1, %c0_2] : memref<256x512xbf16, #tpu.memory_space<vmem>>, vector<256x512xbf16>
    %cst = arith.constant dense<0.000000e+00> : vector<256x512xf32>
    %2 = tpu.matmul %0, %1, %cst {dimension_numbers = #tpu.dot_dimension_numbers<[1], [0], [0], [1], [0, 0, 1, 1], [], []>} : vector<256x256xbf16>, vector<256x512xbf16>, vector<256x512xf32> -> vector<256x512xf32>
    %c0_3 = arith.constant 0 : index
    %c0_4 = arith.constant 0 : index
    %3 = vector.load %arg3[%c0_3, %c0_4] : memref<1x512xf32, #tpu.memory_space<vmem>>, vector<1x512xf32>
    %4 = vector.broadcast %3 : vector<1x512xf32> to vector<256x512xf32>
    %5 = arith.addf %2, %4 : vector<256x512xf32>
    %cst_5 = arith.constant dense<0.000000e+00> : vector<256xf32>
    %6 = vector.multi_reduction <add>, %5, %cst_5 [1] : vector<256x512xf32> to vector<256xf32>
    %7 = vector.shape_cast %6 : vector<256xf32> to vector<256x1xf32>
    %cst_6 = arith.constant 0.001953125 : f32
    %8 = vector.broadcast %cst_6 : f32 to vector<256x1xf32>
    %9 = arith.mulf %7, %8 : vector<256x1xf32>
    %10 = arith.mulf %5, %5 : vector<256x512xf32>
    %cst_7 = arith.constant dense<0.000000e+00> : vector<256xf32>
    %11 = vector.multi_reduction <add>, %10, %cst_7 [1] : vector<256x512xf32> to vector<256xf32>
    %12 = vector.shape_cast %11 : vector<256xf32> to vector<256x1xf32>
    %cst_8 = arith.constant 0.001953125 : f32
    %13 = vector.broadcast %cst_8 : f32 to vector<256x1xf32>
    %14 = arith.mulf %12, %13 : vector<256x1xf32>
    %15 = arith.mulf %9, %9 : vector<256x1xf32>
    %16 = arith.subf %14, %15 : vector<256x1xf32>
    %17 = vector.broadcast %9 : vector<256x1xf32> to vector<256x512xf32>
    %18 = arith.subf %5, %17 : vector<256x512xf32>
    %cst_9 = arith.constant 9.99999974E-6 : f32
    %19 = vector.broadcast %cst_9 : f32 to vector<256x1xf32>
    %20 = arith.addf %16, %19 : vector<256x1xf32>
    %21 = math.rsqrt %20 : vector<256x1xf32>
    %22 = vector.broadcast %21 : vector<256x1xf32> to vector<256x512xf32>
    %23 = arith.mulf %18, %22 : vector<256x512xf32>
    %c0_10 = arith.constant 0 : index
    %c0_11 = arith.constant 0 : index
    %24 = vector.load %arg4[%c0_10, %c0_11] : memref<1x512xf32, #tpu.memory_space<vmem>>, vector<1x512xf32>
    %25 = vector.broadcast %24 : vector<1x512xf32> to vector<256x512xf32>
    %26 = arith.mulf %23, %25 : vector<256x512xf32>
    %c0_12 = arith.constant 0 : index
    %c0_13 = arith.constant 0 : index
    %27 = vector.load %arg5[%c0_12, %c0_13] : memref<1x512xf32, #tpu.memory_space<vmem>>, vector<1x512xf32>
    %28 = vector.broadcast %27 : vector<1x512xf32> to vector<256x512xf32>
    %29 = arith.addf %26, %28 : vector<256x512xf32>
    %cst_14 = arith.constant 0.000000e+00 : f32
    %30 = vector.broadcast %cst_14 : f32 to vector<256x512xf32>
    %31 = arith.maximumf %29, %30 : vector<256x512xf32>
    %32 = arith.truncf %31 : vector<256x512xf32> to vector<256x512xbf16>
    %c0_15 = arith.constant 0 : index
    %c0_16 = arith.constant 0 : index
    %33 = vector.load %arg6[%c0_15, %c0_16] : memref<512x128xbf16, #tpu.memory_space<vmem>>, vector<512x128xbf16>
    %cst_17 = arith.constant dense<0.000000e+00> : vector<256x128xf32>
    %34 = tpu.matmul %32, %33, %cst_17 {dimension_numbers = #tpu.dot_dimension_numbers<[1], [0], [0], [1], [0, 0, 1, 1], [], []>} : vector<256x512xbf16>, vector<512x128xbf16>, vector<256x128xf32> -> vector<256x128xf32>
    %c0_18 = arith.constant 0 : index
    %c0_19 = arith.constant 0 : index
    %35 = vector.load %arg7[%c0_18, %c0_19] : memref<1x128xf32, #tpu.memory_space<vmem>>, vector<1x128xf32>
    %36 = vector.broadcast %35 : vector<1x128xf32> to vector<256x128xf32>
    %37 = arith.addf %34, %36 : vector<256x128xf32>
    %c0_20 = arith.constant 0 : index
    %c0_21 = arith.constant 0 : index
    %38 = vector.load %arg8[%c0_20, %c0_21] : memref<256x128xf32, #tpu.memory_space<vmem>>, vector<256x128xf32>
    tpu.vector_store %arg8[%c0_20, %c0_21], %37 {strides = array<i32>} : memref<256x128xf32, #tpu.memory_space<vmem>>, vector<256x128xf32>,
    return
  }
  func.func @transform_0(%arg0: i32) -> (i32, i32) {
    %c0_i32 = arith.constant 0 : i32
    %c0_i32_0 = arith.constant 0 : i32
    return %arg0, %c0_i32 : i32, i32
  }
  func.func @transform_1(%arg0: i32) -> (i32, i32) {
    %c0_i32 = arith.constant 0 : i32
    %c0_i32_0 = arith.constant 0 : i32
    %c0_i32_1 = arith.constant 0 : i32
    return %c0_i32, %c0_i32_0 : i32, i32
  }
  func.func @transform_2(%arg0: i32) -> (i32, i32) {
    %c0_i32 = arith.constant 0 : i32
    %c0_i32_0 = arith.constant 0 : i32
    %c0_i32_1 = arith.constant 0 : i32
    return %c0_i32, %c0_i32_0 : i32, i32
  }
  func.func @transform_3(%arg0: i32) -> (i32, i32) {
    %c0_i32 = arith.constant 0 : i32
    %c0_i32_0 = arith.constant 0 : i32
    %c0_i32_1 = arith.constant 0 : i32
    return %c0_i32, %c0_i32_0 : i32, i32
  }
  func.func @transform_4(%arg0: i32) -> (i32, i32) {
    %c0_i32 = arith.constant 0 : i32
    %c0_i32_0 = arith.constant 0 : i32
    %c0_i32_1 = arith.constant 0 : i32
    return %c0_i32, %c0_i32_0 : i32, i32
  }
  func.func @transform_5(%arg0: i32) -> (i32, i32) {
    %c0_i32 = arith.constant 0 : i32
    %c0_i32_0 = arith.constant 0 : i32
    %c0_i32_1 = arith.constant 0 : i32
    return %c0_i32, %c0_i32_0 : i32, i32
  }
  func.func @transform_6(%arg0: i32) -> (i32, i32) {
    %c0_i32 = arith.constant 0 : i32
    %c0_i32_0 = arith.constant 0 : i32
    %c0_i32_1 = arith.constant 0 : i32
    return %c0_i32, %c0_i32_0 : i32, i32
  }
  func.func @transform_7(%arg0: i32) -> (i32, i32) {
    %c0_i32 = arith.constant 0 : i32
    %c0_i32_0 = arith.constant 0 : i32
    return %arg0, %c0_i32 : i32, i32
  }
}

</mosaic_0001>

<bundles_post_ra>
// kernel: tpu_custom_call.1
= control target key start
LH: loop header
LB: loop body
LE: loop exit
PB: predicated region body
PF: predicated region fallthrough
CT: control target
= control target key end

     0   :  { %s8068_s0 = inlined_call_operand.hbm [shape: bf16[512,256], index: 0, kind: input, shape index: {}]   ;;  %s8069_s1 = inlined_call_operand.hbm [shape: bf16[256,512], index: 1, kind: input, shape index: {}]   ;;  %s8070_s2 = inlined_call_operand.hbm [shape: f32[1,512], index: 2, kind: input, shape index: {}]   ;;  %s8071_s3 = inlined_call_operand.hbm [shape: f32[1,512], index: 3, kind: input, shape index: {}]   ;;  %s8072_s4 = inlined_call_operand.hbm [shape: f32[1,512], index: 4, kind: input, shape index: {}]   ;;  %s8073_s5 = inlined_call_operand.hbm [shape: bf16[512,128], index: 5, kind: input, shape index: {}]   ;;  %s8074_s6 = inlined_call_operand.vmem [shape: f32[1,128], index: 6, kind: input, shape index: {}]   ;;  %s8075_s7 = inlined_call_operand.hbm [shape: f32[512,128], index: 7, kind: output, shape index: {}]  }
   0x1   :  { %8219 = sst [smem:[#allocation126_spill]] %s8069_s1 }
   0x2   :  { %8220 = sst [smem:[#allocation127_spill]] %s8070_s2 }
   0x3   :  { %12 = vsyncpa [#allocation3], 0 }
   0x4   :  { %14 = vsyncpa [#allocation3 + $0x1], 0 }
   0x5   :  { %15 = vsyncpa [#allocation6], 0 }
   0x6   :  { %16 = vsyncpa [#allocation9], 0 }
   0x7   :  { %17 = vsyncpa [#allocation12], 0 }
   0x8   :  { %18 = vsyncpa [#allocation4], 0 }
   0x9   :  { %20 = vsyncpa [#allocation4 + $0x1], 0  ;;  %s5266_s24 = smov 0   ;;  %s5268_s25 = smov 0  }
   0xa   :  { %s5270_s26 = smov 0   ;;  %s5272_s27 = smov 0  }
   0xb LB: > { %s8221_s1 = sld [smem:[#allocation126_spill]]  ;;  %s5290_s8 = sadd.s32 4294967295, %s5211_s27   ;;  %s5211_s27 = sphi %s5272_s27, %s8523_s27   ;;  %s5207_s26 = sphi %s5270_s26, %s8522_s26   ;;  %s5203_s25 = sphi %s5268_s25, %s8521_s25   ;;  %s5199_s24 = sphi %s5266_s24, %s8520_s24  }
   0xc   : > { %p4115_p0 = scmp.ge.s32.totalorder %s5211_s27, 1  ;;  %p47_p1 = scmp.eq.s32.totalorder %s5290_s8, 0 }
   0xd   : > { %p209_p2 = scmp.lt.s32.totalorder %s5211_s27, 3  ;;  %s5213_s10 = smov [#allocation5]  }
   0xe   : > { %s222_s11 = sshll.u32 %s5213_s10, 4  ;;  %s247_s14 = sshll.u32 %s8071_s3, 4  ;;  %s223_s11 = int_to_ptr.vmem [resolvable:$true] %s222_s11  ;;  %s248_s14 = int_to_ptr.hbm [resolvable:$true] %s247_s14 }
   0xf   : > { %p5295_p3 = pnand %p4115_p0, %p209_p2  ;;  %s8224_s2 = sld [smem:[#allocation127_spill]] }
  0x10   : > { %s5214_s19 = smov [#allocation8]   ;;  %s5215_s21 = smov 256  }
  0x11   : > { %s220_s30 = sshll.u32 %s8221_s1, 4  ;;  %p4806_p4 = pneg %p5295_p3  ;;  %s221_s30 = int_to_ptr.hbm [resolvable:$true] %s220_s30 }
  0x12   : > { %s249_s20 = sshll.u32 %s5214_s19, 4  ;;  %s5216_s22 = smov 16   ;;  %s250_s20 = int_to_ptr.vmem [resolvable:$true] %s249_s20 }
  0x13   : > { %p5307_p6 = pnand %p4806_p4, %p47_p1  ;;  %s259_s29 = sshll.u32 %s8072_s4, 4  ;;  %s260_s29 = int_to_ptr.hbm [resolvable:$true] %s259_s29 }
  0x14   : > { %s5217_s10 = smov [#allocation7]   ;;  %s270_s16 = sshll.u32 %s8073_s5, 4  ;;  %s271_s16 = int_to_ptr.hbm [resolvable:$true] %s270_s16 }
  0x15   : > { %s235_s18 = sshll.u32 %s8224_s2, 4  ;;  %s237_s12 = sshll.u32 %s5217_s10, 4  ;;  %s236_s18 = int_to_ptr.hbm [resolvable:$true] %s235_s18  ;;  %s238_s12 = int_to_ptr.vmem [resolvable:$true] %s237_s12 }
  0x16   : > { %4809 = dma.hbm_to_vmem [thread:$0]  (!%p5307_p6), %s221_s30, 8192, %s223_s11, [#allocation6], %s5215_s21, %s5215_s21, %s5216_s22  }
  0x17   : > { %4815 = dma.hbm_to_vmem [thread:$0]  (!%p5307_p6), %s248_s14, 64, %s250_s20, [#allocation9]  }
  0x18   : > { %4812 = dma.hbm_to_vmem [thread:$0]  (!%p5307_p6), %s236_s18, 64, %s238_s12, [#allocation6]  }
  0x19   : > { %s5218_s30 = smov [#allocation10]   ;;  %s5219_s17 = smov [#allocation11]  }
  0x1a   : > { %s261_s11 = sshll.u32 %s5218_s30, 4  ;;  %s272_s18 = sshll.u32 %s5219_s17, 4  ;;  %s262_s11 = int_to_ptr.vmem [resolvable:$true] %s261_s11  ;;  %s273_s18 = int_to_ptr.vmem [resolvable:$true] %s272_s18 }
  0x1b   : > { %4818 = dma.hbm_to_vmem [thread:$0]  (!%p5307_p6), %s260_s29, 64, %s262_s11, [#allocation9]  }
  0x1c   : > { %s5220_s19 = smov 64   ;;  %s5221_s20 = smov 4  }
  0x1d   : > { %4821 = dma.hbm_to_vmem [thread:$0]  (!%p5307_p6), %s271_s16, 4096, %s273_s18, [#allocation12], %s5220_s19, %s5220_s19, %s5221_s20  }
  0x1e   : > { %s4114_s21 = sadd.s32 4294967294, %s5211_s27   ;;  %s5332_s22 = sadd.s32 1, %s5211_s27  }
  0x1f   : > { %s33_s23 = sadd.s32 1, %s5207_s26  ;;  %s30_s28 = ssub.s32 %s5211_s27, %s5332_s22 }
  0x20   : > { %p40_p7 = scmp.ne.s32.totalorder %s5207_s26, %s5203_s25  ;;  %p31_p8 = scmp.eq.s32.totalorder %s30_s28, 0 }
  0x21   : > { %p41_p9 = scmp.eq.s32.totalorder %s5211_s27, 0  ;;  %p46_p10 = scmp.ne.s32.totalorder %s5203_s25, %s5199_s24 }
  0x22   : > { %p196_p11 = scmp.eq.s32.totalorder %s5290_s8, 1  ;;  %p202_p2 = scmp.eq.s32.totalorder %s4114_s21, 1 }
  0x23   : > { %s5344_s29 = scalar_select %p31_p8, %s5207_s26, %s33_s23  }
  0x24   : > { %p5346_p12 = por %p41_p9, %p40_p7  ;;  %p5352_p13 = por %p47_p1, %p46_p10 }
  0x25   : > { %p5356_p0 = por %p196_p11, %p40_p7  ;;  %p4835_p4 = scmp.lt.s32.totalorder %s5211_s27, 2 }
  0x26   : > { %s289_s30 = sand.u32 1, %s5207_s26   ;;  %p5362_p6 = por %p202_p2, %p46_p10 }
  0x27   : > { %s4122_s13 = sshll.u32 %s289_s30, 8  ;;  %s4652_s14 = sshll.u32 %s5211_s27, 8 }
  0x28   : > { %s299_s18 = scalar_lea.hbm %s8068_s0, %s4652_s14  ;;  %s293_s20 = scalar_lea.vmem [#allocation2], %s4122_s13 }
  0x29   : > { %s300_s19 = sshll.u32 %s299_s18, 4  ;;  %s302_s23 = sshll.u32 %s293_s20, 4  ;;  %s301_s19 = int_to_ptr.hbm [resolvable:$true] %s300_s19  ;;  %s303_s23 = int_to_ptr.vmem [resolvable:$true] %s302_s23 }
  0x2a   : > { %p5372_p7 = pnand %p4835_p4, %p5346_p12  ;;  %s290_s28 = scalar_lea.sflag [#allocation3], %s289_s30 }
  0x2b   : > { %s5103_s1 = sshra.s32 %s301_s19, 4  ;;  %s5110_s16 = scalar_lea.hbm %s8068_s0, 512  ;;  %s5104_s1 = int_to_ptr.hbm [resolvable:$true] %s5103_s1 }
  0x2c   : > { %s5105_s2 = scalar_lea.hbm %s5104_s1, 256  ;;  %p5107_p9 = pneg %p5372_p7 }
  0x2d   : > { %p5106_p8 = scmp.ne.s32.totalorder %s5104_s1, %s5105_s2  ;;  %p5111_p12 = scmp.lt.s32.totalorder %s5104_s1, %s8068_s0 }
  0x2e   : > { %p5112_p2 = scmp.lt.s32.totalorder %s5110_s16, %s5105_s2 }
  0x2f   : > { %p5108_p10 = pnand %p5107_p9, %p5106_p8 }
  0x30   : > { %p5113_p4 = por %p5112_p2, %p5111_p12 }
  0x31   : > { %p5109_p11 = pneg %p5108_p10 }
  0x33   : > { %p5114_p5 = pnand %p5113_p4, %p5109_p11 }
  0x35   : > { %5117 = shalt.err (!%p5114_p5)
}
  0x36   : > { %s5222_s30 = smov 128   ;;  %s5223_s18 = smov 8  }
  0x37   : > { %4825 = dma.hbm_to_vmem [thread:$0]  (!%p5372_p7), %s301_s19, 4096, %s303_s23, %s290_s28, %s5222_s30, %s5222_s30, %s5223_s18  }
  0x38   : > { %314 = sbr.rel (%p5295_p3) target bundleno = 1128 (0x468), region = 48 }
  0x3d   : > { %s5389_s20 = sand.u32 1, %s5203_s25  }
  0x3e   : > { %s4127_s1 = sshll.u32 %s5389_s20, 8  ;;  %s317_s2 = scalar_lea.sflag [#allocation3], %s5389_s20 }
  0x3f   : > { %s5395_s14 = scalar_lea.vmem [#allocation2], %s4127_s1 }
  0x40   : > { %5178 = dma.done.wait (%p5352_p13), %s317_s2, 4096  }
  0x41   : > { %5180 = vsyncadd (%p5352_p13), %s317_s2, 4294963200 }
  0x42   : > { %5182 = dma.done.wait (%p47_p1), [#allocation6], 8256  }
  0x43   : > { %5184 = vsyncadd (%p47_p1), [#allocation6], 4294959040 }
  0x44   : > { %5186 = dma.done.wait (%p47_p1), [#allocation9], 128  }
  0x45   : > { %5188 = vsyncadd (%p47_p1), [#allocation9], 4294967168 }
  0x46   : > { %5190 = dma.done.wait (%p47_p1), [#allocation12], 4096  }
  0x47   : > { %5192 = vsyncadd (%p47_p1), [#allocation12], 4294963200  ;;  %v4376_v0 = vld [vmem:[#allocation5 + $0xe0] sm:$0xf]  ;;  %v4715_v1 = vld [vmem:[#allocation5 + $0xec] sm:$0xf0] }
  0x48   : > { %v4504_v2 = vld [vmem:[#allocation5 + $0x1e0] sm:$0xf]  ;;  %v4377_v3 = vor.u32 %v4715_v1, %v4376_v0  ;;  %v4747_v4 = vld [vmem:[#allocation5 + $0x1ec] sm:$0xf0]  ;;  %v4713_v5 = vld [vmem:[#allocation5 + $0xe4] sm:$0xf] }
  0x49   : > { %v4378_v6 = vld [vmem:[#allocation5 + $0xf0] sm:$0xf0]  ;;  %v4505_v7 = vor.u32 %v4747_v4, %v4504_v2  ;;  %v4745_v9 = vld [vmem:[#allocation5 + $0x1e4] sm:$0xf]  ;;  %v4360_v11 = vld [vmem:[#allocation5 + $0xc0] sm:$0xf] }
  0x4a   : > { %v4381_v8 = vor.u32 %v4713_v5, %v4378_v6  ;;  %v4506_v10 = vld [vmem:[#allocation5 + $0x1f0] sm:$0xf0]  ;;  %965 = vmatpush.bf16.msra.mxu0 %v4377_v3  ;;  %v4711_v13 = vld [vmem:[#allocation5 + $0xcc] sm:$0xf0]  ;;  %v4488_v14 = vld [vmem:[#allocation5 + $0x1c0] sm:$0xf] }
  0x4b   : > { %v4509_v12 = vor.u32 %v4745_v9, %v4506_v10  ;;  %v4743_v15 = vld [vmem:[#allocation5 + $0x1cc] sm:$0xf0]  ;;  %1054 = vmatpush.bf16.msra.mxu1 %v4505_v7  ;;  %v4361_v16 = vor.u32 %v4711_v13, %v4360_v11  ;;  %v4709_v18 = vld [vmem:[#allocation5 + $0xc4] sm:$0xf]  ;;  %v4362_v19 = vld [vmem:[#allocation5 + $0xd0] sm:$0xf0] }
  0x4c   : > { %1143 = vmatpush.bf16.msra.mxu2 %v4381_v8  ;;  %v4489_v17 = vor.u32 %v4743_v15, %v4488_v14  ;;  %v4741_v20 = vld [vmem:[#allocation5 + $0x1c4] sm:$0xf]  ;;  %v4365_v21 = vor.u32 %v4709_v18, %v4362_v19  ;;  %v4490_v22 = vld [vmem:[#allocation5 + $0x1d0] sm:$0xf0]  ;;  %v4344_v23 = vld [vmem:[#allocation5 + $0xa0] sm:$0xf] }
  0x4d   : > { %1232 = vmatpush.bf16.msra.mxu3 %v4509_v12  ;;  %v4707_v24 = vld [vmem:[#allocation5 + $0xac] sm:$0xf0]  ;;  %v4493_v25 = vor.u32 %v4741_v20, %v4490_v22  ;;  %v4472_v26 = vld [vmem:[#allocation5 + $0x1a0] sm:$0xf]  ;;  %v4705_v28 = vld [vmem:[#allocation5 + $0xa4] sm:$0xf] }
  0x4e   : > { %v4739_v27 = vld [vmem:[#allocation5 + $0x1ac] sm:$0xf0]  ;;  %966 = vmatpush.bf16.msra.mxu0 %v4361_v16  ;;  %v4345_v29 = vor.u32 %v4707_v24, %v4344_v23  ;;  %v4346_v30 = vld [vmem:[#allocation5 + $0xb0] sm:$0xf0]  ;;  %v4737_v31 = vld [vmem:[#allocation5 + $0x1a4] sm:$0xf] }
  0x4f   : > { %v4474_v32 = vld [vmem:[#allocation5 + $0x1b0] sm:$0xf0]  ;;  %1055 = vmatpush.bf16.msra.mxu1 %v4489_v17  ;;  %v4473_v33 = vor.u32 %v4739_v27, %v4472_v26  ;;  %v4349_v34 = vor.u32 %v4705_v28, %v4346_v30  ;;  %v4328_v35 = vld [vmem:[#allocation5 + $0x80] sm:$0xf]  ;;  %v4703_v36 = vld [vmem:[#allocation5 + $0x8c] sm:$0xf0] }
  0x50   : > { %1144 = vmatpush.bf16.msra.mxu2 %v4365_v21  ;;  %v4456_v37 = vld [vmem:[#allocation5 + $0x180] sm:$0xf]  ;;  %v4477_v38 = vor.u32 %v4737_v31, %v4474_v32  ;;  %v4735_v39 = vld [vmem:[#allocation5 + $0x18c] sm:$0xf0]  ;;  %v4701_v40 = vld [vmem:[#allocation5 + $0x84] sm:$0xf]  ;;  %v4329_v44 = vor.u32 %v4703_v36, %v4328_v35 }
  0x51   : > { %1233 = vmatpush.bf16.msra.mxu3 %v4493_v25  ;;  %v4330_v41 = vld [vmem:[#allocation5 + $0x90] sm:$0xf0]  ;;  %v4733_v42 = vld [vmem:[#allocation5 + $0x184] sm:$0xf]  ;;  %v4457_v45 = vor.u32 %v4735_v39, %v4456_v37  ;;  %v4312_v47 = vld [vmem:[#allocation5 + $0x60] sm:$0xf] }
  0x52   : > { %v4458_v43 = vld [vmem:[#allocation5 + $0x190] sm:$0xf0]  ;;  %967 = vmatpush.bf16.msra.mxu0 %v4345_v29  ;;  %v4333_v46 = vor.u32 %v4701_v40, %v4330_v41  ;;  %v4699_v48 = vld [vmem:[#allocation5 + $0x6c] sm:$0xf0]  ;;  %v4440_v49 = vld [vmem:[#allocation5 + $0x160] sm:$0xf] }
  0x53   : > { %1056 = vmatpush.bf16.msra.mxu1 %v4473_v33  ;;  %v4461_v50 = vor.u32 %v4733_v42, %v4458_v43  ;;  %v4731_v51 = vld [vmem:[#allocation5 + $0x16c] sm:$0xf0]  ;;  %v4697_v52 = vld [vmem:[#allocation5 + $0x64] sm:$0xf]  ;;  %v4314_v53 = vld [vmem:[#allocation5 + $0x70] sm:$0xf0]  ;;  %v4313_v56 = vor.u32 %v4699_v48, %v4312_v47 }
  0x54   : > { %1145 = vmatpush.bf16.msra.mxu2 %v4349_v34  ;;  %v4729_v54 = vld [vmem:[#allocation5 + $0x164] sm:$0xf]  ;;  %v4442_v55 = vld [vmem:[#allocation5 + $0x170] sm:$0xf0]  ;;  %v4441_v57 = vor.u32 %v4731_v51, %v4440_v49  ;;  %v4317_v58 = vor.u32 %v4697_v52, %v4314_v53  ;;  %v4296_v59 = vld [vmem:[#allocation5 + $0x40] sm:$0xf] }
  0x55   : > { %1234 = vmatpush.bf16.msra.mxu3 %v4477_v38  ;;  %v4695_v60 = vld [vmem:[#allocation5 + $0x4c] sm:$0xf0]  ;;  %v4424_v61 = vld [vmem:[#allocation5 + $0x140] sm:$0xf]  ;;  %v4445_v62 = vor.u32 %v4729_v54, %v4442_v55  ;;  %v4693_v0 = vld [vmem:[#allocation5 + $0x44] sm:$0xf] }
  0x56   : > { %968 = vmatpush.bf16.msra.mxu0 %v4329_v44  ;;  %v4727_v63 = vld [vmem:[#allocation5 + $0x14c] sm:$0xf0]  ;;  %v4298_v1 = vld [vmem:[#allocation5 + $0x50] sm:$0xf0]  ;;  %v4725_v2 = vld [vmem:[#allocation5 + $0x144] sm:$0xf]  ;;  %v4297_v4 = vor.u32 %v4695_v60, %v4296_v59 }
  0x57   : > { %1057 = vmatpush.bf16.msra.mxu1 %v4457_v45  ;;  %v4426_v3 = vld [vmem:[#allocation5 + $0x150] sm:$0xf0]  ;;  %v4425_v5 = vor.u32 %v4727_v63, %v4424_v61  ;;  %v4301_v6 = vor.u32 %v4693_v0, %v4298_v1  ;;  %v4280_v7 = vld [vmem:[#allocation5 + $0x20] sm:$0xf]  ;;  %v4691_v8 = vld [vmem:[#allocation5 + $0x2c] sm:$0xf0] }
  0x58   : > { %1146 = vmatpush.bf16.msra.mxu2 %v4333_v46  ;;  %v4408_v9 = vld [vmem:[#allocation5 + $0x120] sm:$0xf]  ;;  %v4429_v10 = vor.u32 %v4725_v2, %v4426_v3  ;;  %v4723_v11 = vld [vmem:[#allocation5 + $0x12c] sm:$0xf0]  ;;  %v4689_v12 = vld [vmem:[#allocation5 + $0x24] sm:$0xf]  ;;  %v4281_v16 = vor.u32 %v4691_v8, %v4280_v7 }
  0x59   : > { %1235 = vmatpush.bf16.msra.mxu3 %v4461_v50  ;;  %v4282_v13 = vld [vmem:[#allocation5 + $0x30] sm:$0xf0]  ;;  %v4721_v14 = vld [vmem:[#allocation5 + $0x124] sm:$0xf]  ;;  %v4264_v17 = vld [vmem:[#allocation5] sm:$0xf]  ;;  %v4409_v20 = vor.u32 %v4723_v11, %v4408_v9 }
  0x5a   : > { %969 = vmatpush.bf16.msra.mxu0 %v4313_v56  ;;  %v4410_v15 = vld [vmem:[#allocation5 + $0x130] sm:$0xf0]  ;;  %v4687_v18 = vld [vmem:[#allocation5 + $0xc] sm:$0xf0]  ;;  %v4392_v19 = vld [vmem:[#allocation5 + $0x100] sm:$0xf]  ;;  %v4285_v21 = vor.u32 %v4689_v12, %v4282_v13 }
  0x5b   : > { %1058 = vmatpush.bf16.msra.mxu1 %v4441_v57  ;;  %v4719_v22 = vld [vmem:[#allocation5 + $0x10c] sm:$0xf0]  ;;  %v4685_v23 = vld [vmem:[#allocation5 + $0x4] sm:$0xf]  ;;  %v4266_v24 = vld [vmem:[#allocation5 + $0x10] sm:$0xf0]  ;;  %v4413_v25 = vor.u32 %v4721_v14, %v4410_v15  ;;  %v4265_v32 = vor.u32 %v4687_v18, %v4264_v17 }
  0x5c   : > { %1147 = vmatpush.bf16.msra.mxu2 %v4317_v58  ;;  %v4717_v26 = vld [vmem:[#allocation5 + $0x104] sm:$0xf]  ;;  %v4394_v27 = vld [vmem:[#allocation5 + $0x110] sm:$0xf0]  ;;  %v4136_v28 = vld [vmem:[%s5395_s14] sm:$0xf]  ;;  %v4393_v35 = vor.u32 %v4719_v22, %v4392_v19  ;;  %v4269_v36 = vor.u32 %v4685_v23, %v4266_v24 }
  0x5d   : > { %1236 = vmatpush.bf16.msra.mxu3 %v4445_v62  ;;  %v4654_v29 = vld [vmem:[%s5395_s14 + $0x4] sm:$0xf0]  ;;  %v4714_v30 = vld [vmem:[#allocation5 + $0xec] sm:$0xf]  ;;  %v4386_v31 = vld [vmem:[#allocation5 + $0xf8] sm:$0xf0]  ;;  %v4397_v39 = vor.u32 %v4717_v26, %v4394_v27 }
  0x5e   : > { %970 = vmatpush.bf16.msra.mxu0 %v4297_v4  ;;  %v4746_v33 = vld [vmem:[#allocation5 + $0x1ec] sm:$0xf]  ;;  %v4514_v34 = vld [vmem:[#allocation5 + $0x1f8] sm:$0xf0]  ;;  %v4653_v37 = vld [vmem:[%s5395_s14 + $0x4] sm:$0xf]  ;;  %v4389_v40 = vor.u32 %v4714_v30, %v4386_v31  ;;  %v5417_v43 = vor.u32 %v4654_v29, %v4136_v28 }
  0x5f   : > { %1059 = vmatpush.bf16.msra.mxu1 %v4425_v5  ;;  %v4138_v38 = vld [vmem:[%s5395_s14 + $0x8] sm:$0xf0]  ;;  %v4384_v41 = vld [vmem:[#allocation5 + $0xe8] sm:$0xf]  ;;  %v4716_v42 = vld [vmem:[#allocation5 + $0xf4] sm:$0xf0]  ;;  %v4517_v44 = vor.u32 %v4746_v33, %v4514_v34 }
  0x60   : > { %1148 = vmatpush.bf16.msra.mxu2 %v4301_v6  ;;  %v4512_v45 = vld [vmem:[#allocation5 + $0x1e8] sm:$0xf]  ;;  %v4748_v46 = vld [vmem:[#allocation5 + $0x1f4] sm:$0xf0]  ;;  %v5419_v47 = vor.u32 %v4653_v37, %v4138_v38  ;;  %v4385_v48 = vor.u32 %v4716_v42, %v4384_v41  ;;  %v4710_v50 = vld [vmem:[#allocation5 + $0xcc] sm:$0xf] }
  0x61   : > { %1237 = vmatpush.bf16.msra.mxu3 %v4429_v10  ;;  %v4513_v49 = vor.u32 %v4748_v46, %v4512_v45  ;;  %v4370_v51 = vld [vmem:[#allocation5 + $0xd8] sm:$0xf0]  ;;  %v4742_v52 = vld [vmem:[#allocation5 + $0x1cc] sm:$0xf]  ;;  %v4368_v55 = vld [vmem:[#allocation5 + $0xc8] sm:$0xf] }
  0x62   : > { %971 = vmatpush.bf16.msra.mxu0 %v4281_v16  ;;  %v4373_v53 = vor.u32 %v4710_v50, %v4370_v51  ;;  %v4498_v54 = vld [vmem:[#allocation5 + $0x1d8] sm:$0xf0]  ;;  %v4712_v56 = vld [vmem:[#allocation5 + $0xd4] sm:$0xf0]  ;;  %v4496_v59 = vld [vmem:[#allocation5 + $0x1c8] sm:$0xf] }
  0x63   : > { %1060 = vmatpush.bf16.msra.mxu1 %v4409_v20  ;;  %v4501_v57 = vor.u32 %v4742_v52, %v4498_v54  ;;  %v4369_v58 = vor.u32 %v4712_v56, %v4368_v55  ;;  %v4744_v60 = vld [vmem:[#allocation5 + $0x1d4] sm:$0xf0]  ;;  %v4144_v62 = vld [vmem:[%s5395_s14 + $0x10] sm:$0xf]  ;;  %v4655_v0 = vld [vmem:[%s5395_s14 + $0x14] sm:$0xf] }
  0x64   : > { %1149 = vmatpush.bf16.msra.mxu2 %v4285_v21  ;;  %v4497_v61 = vor.u32 %v4744_v60, %v4496_v59  ;;  %v4656_v63 = vld [vmem:[%s5395_s14 + $0x14] sm:$0xf0]  ;;  %v4146_v1 = vld [vmem:[%s5395_s14 + $0x18] sm:$0xf0]  ;;  %v4152_v4 = vld [vmem:[%s5395_s14 + $0x20] sm:$0xf] }
  0x65   : > { %1238 = vmatpush.bf16.msra.mxu3 %v4413_v25  ;;  %v5429_v2 = vor.u32 %v4656_v63, %v4144_v62  ;;  %v5431_v3 = vor.u32 %v4655_v0, %v4146_v1  ;;  %v4658_v5 = vld [vmem:[%s5395_s14 + $0x24] sm:$0xf0]  ;;  %v4657_v6 = vld [vmem:[%s5395_s14 + $0x24] sm:$0xf]  ;;  %v4154_v7 = vld [vmem:[%s5395_s14 + $0x28] sm:$0xf0] }
  0x66   : > { %972 = vmatpush.bf16.msra.mxu0 %v4265_v32  ;;  %v5441_v8 = vor.u32 %v4658_v5, %v4152_v4  ;;  %v5443_v9 = vor.u32 %v4657_v6, %v4154_v7  ;;  %v4706_v10 = vld [vmem:[#allocation5 + $0xac] sm:$0xf]  ;;  %v4354_v11 = vld [vmem:[#allocation5 + $0xb8] sm:$0xf0]  ;;  %v4352_v15 = vld [vmem:[#allocation5 + $0xa8] sm:$0xf] }
  0x67   : > { %1061 = vmatpush.bf16.msra.mxu1 %v4393_v35  ;;  %v4738_v12 = vld [vmem:[#allocation5 + $0x1ac] sm:$0xf]  ;;  %v4357_v13 = vor.u32 %v4706_v10, %v4354_v11  ;;  %v4482_v14 = vld [vmem:[#allocation5 + $0x1b8] sm:$0xf0]  ;;  %v4708_v16 = vld [vmem:[#allocation5 + $0xb4] sm:$0xf0] }
  0x68   : > { %1150 = vmatpush.bf16.msra.mxu2 %v4269_v36  ;;  %v4485_v17 = vor.u32 %v4738_v12, %v4482_v14  ;;  %v4353_v18 = vor.u32 %v4708_v16, %v4352_v15  ;;  %v4480_v19 = vld [vmem:[#allocation5 + $0x1a8] sm:$0xf]  ;;  %v4740_v20 = vld [vmem:[#allocation5 + $0x1b4] sm:$0xf0]  ;;  %v4160_v22 = vld [vmem:[%s5395_s14 + $0x30] sm:$0xf] }
  0x69   : > { %1239 = vmatpush.bf16.msra.mxu3 %v4397_v39  ;;  %973 = vmatmul.bf16.vlgmr.msra.gmra.mxu0 %v5417_v43  ;;  %v4481_v21 = vor.u32 %v4740_v20, %v4480_v19  ;;  %v4660_v23 = vld [vmem:[%s5395_s14 + $0x34] sm:$0xf0]  ;;  %v4659_v24 = vld [vmem:[%s5395_s14 + $0x34] sm:$0xf]  ;;  %v4162_v25 = vld [vmem:[%s5395_s14 + $0x38] sm:$0xf0] }
  0x6a   : > { %1062 = vmatmul.bf16.vlgmr.msra.gmra.mxu1 %v5419_v47  ;;  %1321 = vmatpush.bf16.msrb.mxu0 %v4385_v48  ;;  %v5453_v26 = vor.u32 %v4660_v23, %v4160_v22  ;;  %v5455_v27 = vor.u32 %v4659_v24, %v4162_v25  ;;  %v4168_v28 = vld [vmem:[%s5395_s14 + $0x40] sm:$0xf]  ;;  %v4662_v29 = vld [vmem:[%s5395_s14 + $0x44] sm:$0xf0]  ;;  %v4661_v30 = vld [vmem:[%s5395_s14 + $0x44] sm:$0xf] }
  0x6b   : > { %1151 = vmatmul.bf16.vlgmr.msra.gmra.mxu2 %v5417_v43  ;;  %1410 = vmatpush.bf16.msrb.mxu1 %v4513_v49  ;;  %v4170_v31 = vld [vmem:[%s5395_s14 + $0x48] sm:$0xf0]  ;;  %v5465_v32 = vor.u32 %v4662_v29, %v4168_v28  ;;  %v4338_v35 = vld [vmem:[#allocation5 + $0x98] sm:$0xf0]  ;;  %v4336_v39 = vld [vmem:[#allocation5 + $0x88] sm:$0xf] }
  0x6c   : > { %1499 = vmatpush.bf16.msrb.mxu2 %v4389_v40  ;;  %1240 = vmatmul.bf16.vlgmr.msra.gmra.mxu3 %v5419_v47  ;;  %v5467_v33 = vor.u32 %v4661_v30, %v4170_v31  ;;  %v4702_v34 = vld [vmem:[#allocation5 + $0x8c] sm:$0xf]  ;;  %v4466_v38 = vld [vmem:[#allocation5 + $0x198] sm:$0xf0]  ;;  %v4704_v40 = vld [vmem:[#allocation5 + $0x94] sm:$0xf0] }
  0x6d   : > { %1588 = vmatpush.bf16.msrb.mxu3 %v4517_v44  ;;  %v4734_v36 = vld [vmem:[#allocation5 + $0x18c] sm:$0xf]  ;;  %v4341_v37 = vor.u32 %v4702_v34, %v4338_v35  ;;  %v4337_v42 = vor.u32 %v4704_v40, %v4336_v39  ;;  %v4464_v44 = vld [vmem:[#allocation5 + $0x188] sm:$0xf]  ;;  %v4736_v45 = vld [vmem:[#allocation5 + $0x194] sm:$0xf0] }
  0x6e   : > { %1322 = vmatpush.bf16.msrb.mxu0 %v4369_v58  ;;  %v4469_v41 = vor.u32 %v4734_v36, %v4466_v38  ;;  %v4465_v46 = vor.u32 %v4736_v45, %v4464_v44  ;;  %v4176_v48 = vld [vmem:[%s5395_s14 + $0x50] sm:$0xf]  ;;  %v4664_v49 = vld [vmem:[%s5395_s14 + $0x54] sm:$0xf0]  ;;  %v4663_v50 = vld [vmem:[%s5395_s14 + $0x54] sm:$0xf] }
  0x6f   : > { %1411 = vmatpush.bf16.msrb.mxu1 %v4497_v61  ;;  %v4178_v51 = vld [vmem:[%s5395_s14 + $0x58] sm:$0xf0]  ;;  %v5477_v52 = vor.u32 %v4664_v49, %v4176_v48  ;;  %v4184_v54 = vld [vmem:[%s5395_s14 + $0x60] sm:$0xf]  ;;  %v4666_v55 = vld [vmem:[%s5395_s14 + $0x64] sm:$0xf0] }
  0x70   : > { %1500 = vmatpush.bf16.msrb.mxu2 %v4373_v53  ;;  %v5479_v53 = vor.u32 %v4663_v50, %v4178_v51  ;;  %v4665_v56 = vld [vmem:[%s5395_s14 + $0x64] sm:$0xf]  ;;  %v5489_v58 = vor.u32 %v4666_v55, %v4184_v54  ;;  %v4698_v60 = vld [vmem:[#allocation5 + $0x6c] sm:$0xf]  ;;  %v4322_v61 = vld [vmem:[#allocation5 + $0x78] sm:$0xf0] }
  0x71   : > { %1589 = vmatpush.bf16.msrb.mxu3 %v4501_v57  ;;  %v4186_v57 = vld [vmem:[%s5395_s14 + $0x68] sm:$0xf0]  ;;  %v4325_v63 = vor.u32 %v4698_v60, %v4322_v61  ;;  %v4450_v0 = vld [vmem:[#allocation5 + $0x178] sm:$0xf0]  ;;  %v4192_v4 = vld [vmem:[%s5395_s14 + $0x70] sm:$0xf] }
  0x72   : > { %1323 = vmatpush.bf16.msrb.mxu0 %v4353_v18  ;;  %v5491_v59 = vor.u32 %v4665_v56, %v4186_v57  ;;  %v4730_v62 = vld [vmem:[#allocation5 + $0x16c] sm:$0xf]  ;;  %v4668_v5 = vld [vmem:[%s5395_s14 + $0x74] sm:$0xf0]  ;;  %v4667_v6 = vld [vmem:[%s5395_s14 + $0x74] sm:$0xf] }
  0x73   : > { %1412 = vmatpush.bf16.msrb.mxu1 %v4481_v21  ;;  %v4453_v1 = vor.u32 %v4730_v62, %v4450_v0  ;;  %v4320_v7 = vld [vmem:[#allocation5 + $0x68] sm:$0xf]  ;;  %v4700_v10 = vld [vmem:[#allocation5 + $0x74] sm:$0xf0]  ;;  %v4194_v11 = vld [vmem:[%s5395_s14 + $0x78] sm:$0xf0]  ;;  %v5501_v16 = vor.u32 %v4668_v5, %v4192_v4 }
  0x74   : > { %1501 = vmatpush.bf16.msrb.mxu2 %v4357_v13  ;;  %v4321_v12 = vor.u32 %v4700_v10, %v4320_v7  ;;  %v4448_v13 = vld [vmem:[#allocation5 + $0x168] sm:$0xf]  ;;  %v4732_v14 = vld [vmem:[#allocation5 + $0x174] sm:$0xf0]  ;;  %v5509_v18 = vld [vmem:[#allocation7] sm:$0xf] }
  0x75   : > { %1590 = vmatpush.bf16.msrb.mxu3 %v4485_v17  ;;  %v4449_v15 = vor.u32 %v4732_v14, %v4448_v13  ;;  %v5503_v17 = vor.u32 %v4667_v6, %v4194_v11  ;;  %v4200_v19 = vld [vmem:[%s5395_s14 + $0x80] sm:$0xf]  ;;  %v4670_v20 = vld [vmem:[%s5395_s14 + $0x84] sm:$0xf0]  ;;  %v5514_v21 = vperm.slane %v5509_v18, 0  ;;  %v5529_v34 = vperm.slane %v5509_v18, 1 }
  0x76   : > { %1324 = vmatpush.bf16.msrb.mxu0 %v4337_v42  ;;  %v4669_v22 = vld [vmem:[%s5395_s14 + $0x84] sm:$0xf]  ;;  %v4202_v23 = vld [vmem:[%s5395_s14 + $0x88] sm:$0xf0]  ;;  %v5518_v24 = vor.u32 %v4670_v20, %v4200_v19  ;;  %v4306_v36 = vld [vmem:[#allocation5 + $0x58] sm:$0xf0] }
  0x77   : > { %1413 = vmatpush.bf16.msrb.mxu1 %v4465_v46  ;;  %v5520_v28 = vor.u32 %v4669_v22, %v4202_v23  ;;  %v4694_v35 = vld [vmem:[#allocation5 + $0x4c] sm:$0xf]  ;;  %v4434_v39 = vld [vmem:[#allocation5 + $0x158] sm:$0xf0]  ;;  %v4208_v51 = vld [vmem:[%s5395_s14 + $0x90] sm:$0xf] }
  0x78   : > { %1502 = vmatpush.bf16.msrb.mxu2 %v4341_v37  ;;  %v4726_v37 = vld [vmem:[#allocation5 + $0x14c] sm:$0xf]  ;;  %v4309_v38 = vor.u32 %v4694_v35, %v4306_v36  ;;  %v4672_v54 = vld [vmem:[%s5395_s14 + $0x94] sm:$0xf0]  ;;  %v4671_v55 = vld [vmem:[%s5395_s14 + $0x94] sm:$0xf] }
  0x79   : > { %978 = vmatmul.bf16.gmra.mxu0 %v5429_v2  ;;  %1591 = vmatpush.bf16.msrb.mxu3 %v4469_v41  ;;  %v4437_v41 = vor.u32 %v4726_v37, %v4434_v39  ;;  %v4304_v56 = vld [vmem:[#allocation5 + $0x48] sm:$0xf]  ;;  %v4696_v57 = vld [vmem:[#allocation5 + $0x54] sm:$0xf0]  ;;  %v4210_v60 = vld [vmem:[%s5395_s14 + $0x98] sm:$0xf0]  ;;  %v5542_v4 = vor.u32 %v4672_v54, %v4208_v51 }
  0x7a   : > { %1067 = vmatmul.bf16.gmra.mxu1 %v5431_v3  ;;  %1325 = vmatpush.bf16.msrb.mxu0 %v4321_v12  ;;  %v4305_v61 = vor.u32 %v4696_v57, %v4304_v56  ;;  %v4432_v62 = vld [vmem:[#allocation5 + $0x148] sm:$0xf]  ;;  %v5545_v10 = vor.u32 %v4671_v55, %v4210_v60  ;;  %v4216_v35 = vld [vmem:[%s5395_s14 + $0xa0] sm:$0xf]  ;;  %v4673_v37 = vld [vmem:[%s5395_s14 + $0xa4] sm:$0xf] }
  0x7b   : > { %1156 = vmatmul.bf16.gmra.mxu2 %v5429_v2  ;;  %1414 = vmatpush.bf16.msrb.mxu1 %v4449_v15  ;;  %v4674_v36 = vld [vmem:[%s5395_s14 + $0xa4] sm:$0xf0]  ;;  %v4690_v55 = vld [vmem:[#allocation5 + $0x2c] sm:$0xf]  ;;  %v4290_v56 = vld [vmem:[#allocation5 + $0x38] sm:$0xf0] }
  0x7c   : > { %1245 = vmatmul.bf16.gmra.mxu3 %v5431_v3  ;;  %1503 = vmatpush.bf16.msrb.mxu2 %v4325_v63  ;;  %v4728_v63 = vld [vmem:[#allocation5 + $0x154] sm:$0xf0]  ;;  %v4722_v57 = vld [vmem:[#allocation5 + $0x12c] sm:$0xf]  ;;  %v4293_v60 = vor.u32 %v4690_v55, %v4290_v56  ;;  %s7395_s19 = scalar_lea.vmem [#allocation13], %s4127_s1  ;;  %s4781_s28 = sshll.u32 %s5290_s8, 8 }
  0x7d   : > { %1592 = vmatpush.bf16.msrb.mxu3 %v4453_v1  ;;  %v4433_v0 = vor.u32 %v4728_v63, %v4432_v62  ;;  %s3989_s17 = scalar_lea.hbm %s8075_s7, %s4781_s28  ;;  %s3990_s10 = sshll.u32 %s7395_s19, 4  ;;  %s3991_s10 = int_to_ptr.vmem [resolvable:$true] %s3990_s10 }
  0x7e   : > { %1326 = vmatpush.bf16.msrb.mxu0 %v4305_v61  ;;  %v4418_v61 = vld [vmem:[#allocation5 + $0x138] sm:$0xf0]  ;;  %s3992_s30 = sshll.u32 %s3989_s17, 4  ;;  %s3978_s8 = scalar_lea.sflag [#allocation4], %s5389_s20  ;;  %s3993_s30 = int_to_ptr.hbm [resolvable:$true] %s3992_s30 }
  0x7f   : > { %1415 = vmatpush.bf16.msrb.mxu1 %v4433_v0  ;;  %v4421_v63 = vor.u32 %v4722_v57, %v4418_v61  ;;  %s5147_s18 = sshra.s32 %s3993_s30, 4  ;;  %s5153_s9 = scalar_lea.hbm %s8075_s7, 512  ;;  %s5148_s18 = int_to_ptr.hbm [resolvable:$true] %s5147_s18 }
  0x80   : > { %1504 = vmatpush.bf16.msrb.mxu2 %v4309_v38  ;;  %v4218_v38 = vld [vmem:[%s5395_s14 + $0xa8] sm:$0xf0]  ;;  %s5149_s1 = scalar_lea.hbm %s5148_s18, 256  ;;  %p5154_p13 = scmp.lt.s32.totalorder %s5148_s18, %s8075_s7 }
  0x81   : > { %1593 = vmatpush.bf16.msrb.mxu3 %v4437_v41  ;;  %p5150_p1 = scmp.ne.s32.totalorder %s5148_s18, %s5149_s1  ;;  %p5155_p7 = scmp.lt.s32.totalorder %s5153_s9, %s5149_s1 }
  0x83   : > { %p5151_p3 = pnand %p5150_p1, %p5356_p0  ;;  %p5156_p8 = por %p5155_p7, %p5154_p13 }
  0x84   : > { %1505 = vmatpush.bf16.msrb.mxu2 %v4293_v60 }
  0x85   : > { %1594 = vmatpush.bf16.msrb.mxu3 %v4421_v63  ;;  %p5152_p5 = pneg %p5151_p3 }
  0x87   : > { %p5157_p9 = pnand %p5156_p8, %p5152_p5 }
  0x89   : > { %983 = vmatmul.bf16.gmra.mxu0 %v5441_v8 }
  0x8a   : > { %1072 = vmatmul.bf16.gmra.mxu1 %v5443_v9 }
  0x8b   : > { %1161 = vmatmul.bf16.gmra.mxu2 %v5441_v8 }
  0x8c   : > { %1250 = vmatmul.bf16.gmra.mxu3 %v5443_v9 }
  0x99   : > { %988 = vmatmul.bf16.gmra.mxu0 %v5453_v26 }
  0x9a   : > { %1077 = vmatmul.bf16.gmra.mxu1 %v5455_v27 }
  0x9b   : > { %1166 = vmatmul.bf16.gmra.mxu2 %v5453_v26 }
  0x9c   : > { %1255 = vmatmul.bf16.gmra.mxu3 %v5455_v27 }
  0xa9   : > { %993 = vmatmul.bf16.gmra.mxu0 %v5465_v32 }
  0xaa   : > { %1082 = vmatmul.bf16.gmra.mxu1 %v5467_v33 }
  0xab   : > { %1171 = vmatmul.bf16.gmra.mxu2 %v5465_v32 }
  0xac   : > { %1260 = vmatmul.bf16.gmra.mxu3 %v5467_v33 }
  0xb9   : > { %998 = vmatmul.bf16.gmra.mxu0 %v5477_v52 }
  0xba   : > { %1087 = vmatmul.bf16.gmra.mxu1 %v5479_v53 }
  0xbb   : > { %1176 = vmatmul.bf16.gmra.mxu2 %v5477_v52 }
  0xbc   : > { %1265 = vmatmul.bf16.gmra.mxu3 %v5479_v53 }
  0xc9   : > { %1003 = vmatmul.bf16.gmra.mxu0 %v5489_v58 }
  0xca   : > { %1092 = vmatmul.bf16.gmra.mxu1 %v5491_v59 }
  0xcb   : > { %1181 = vmatmul.bf16.gmra.mxu2 %v5489_v58 }
  0xcc   : > { %1270 = vmatmul.bf16.gmra.mxu3 %v5491_v59 }
  0xd9   : > { %1008 = vmatmul.bf16.gmra.mxu0 %v5501_v16 }
  0xda   : > { %1097 = vmatmul.bf16.gmra.mxu1 %v5503_v17 }
  0xdb   : > { %1186 = vmatmul.bf16.gmra.mxu2 %v5501_v16 }
  0xdc   : > { %1275 = vmatmul.bf16.gmra.mxu3 %v5503_v17 }
  0xe6   : > { %v974_v25 = vpop.f32.mrf.mxu0 }
  0xe7   : > { %v975_v29 = vadd.f32 %v974_v25, %v5514_v21  ;;  %v1063_v30 = vpop.f32.mrf.mxu1 }
  0xe9   : > { %v5523_v31 = vadd.f32 %v1063_v30, %v975_v29  ;;  %1013 = vmatmul.bf16.gmra.mxu0 %v5518_v24 }
  0xea   : > { %1102 = vmatmul.bf16.gmra.mxu1 %v5520_v28 }
  0xeb   : > { %8230 = vst [vmem:[#allocation19_spill] sm:$0xff] %v5523_v31  ;;  %1191 = vmatmul.bf16.gmra.mxu2 %v5518_v24 }
  0xec   : > { %1280 = vmatmul.bf16.gmra.mxu3 %v5520_v28 }
  0xee   : > { %v1152_v40 = vpop.f32.mrf.mxu2  ;;  %v976_v45 = vpop.f32.mrf.mxu0 }
  0xef   : > { %v1153_v42 = vadd.f32 %v1152_v40, %v5529_v34  ;;  %v1241_v44 = vpop.f32.mrf.mxu3  ;;  %v977_v46 = vadd.f32 %v976_v45, %v5514_v21  ;;  %v1065_v48 = vpop.f32.mrf.mxu1  ;;  %v5566_v40 = vor.u32 %v4674_v36, %v4216_v35  ;;  %v5569_v45 = vor.u32 %v4673_v37, %v4218_v38  ;;  %v4416_v36 = vld [vmem:[#allocation5 + $0x128] sm:$0xf]  ;;  %v4724_v37 = vld [vmem:[#allocation5 + $0x134] sm:$0xf0] }
  0xf0   : > { %v4417_v38 = vor.u32 %v4724_v37, %v4416_v36 }
  0xf1   : > { %v5534_v49 = vadd.f32 %v1241_v44, %v1153_v42  ;;  %v5536_v50 = vadd.f32 %v1065_v48, %v977_v46 }
  0xf2   : > { %1416 = vmatpush.bf16.msrb.mxu1 %v4417_v38 }
  0xf3   : > { %8231 = vst [vmem:[#allocation20_spill] sm:$0xff] %v5534_v49 }
  0xf6   : > { %v1154_v1 = vpop.f32.mrf.mxu2  ;;  %v979_v7 = vpop.f32.mrf.mxu0 }
  0xf7   : > { %v1155_v5 = vadd.f32 %v1154_v1, %v5529_v34  ;;  %v1243_v6 = vpop.f32.mrf.mxu3  ;;  %v980_v11 = vadd.f32 %v979_v7, %v5514_v21  ;;  %v1068_v12 = vpop.f32.mrf.mxu1 }
  0xf9   : > { %v5548_v13 = vadd.f32 %v1243_v6, %v1155_v5  ;;  %v5550_v14 = vadd.f32 %v1068_v12, %v980_v11  ;;  %1018 = vmatmul.bf16.gmra.mxu0 %v5542_v4 }
  0xfa   : > { %1107 = vmatmul.bf16.gmra.mxu1 %v5545_v10 }
  0xfb   : > { %1196 = vmatmul.bf16.gmra.mxu2 %v5542_v4 }
  0xfc   : > { %1285 = vmatmul.bf16.gmra.mxu3 %v5545_v10 }
  0xfe   : > { %v1157_v15 = vpop.f32.mrf.mxu2  ;;  %v981_v22 = vpop.f32.mrf.mxu0 }
  0xff   : > { %v1158_v19 = vadd.f32 %v1157_v15, %v5529_v34  ;;  %v1246_v20 = vpop.f32.mrf.mxu3  ;;  %v982_v23 = vadd.f32 %v981_v22, %v5514_v21  ;;  %v1070_v25 = vpop.f32.mrf.mxu1  ;;  %v4224_v15 = vld [vmem:[%s5395_s14 + $0xb0] sm:$0xf]  ;;  %v4288_v22 = vld [vmem:[#allocation5 + $0x28] sm:$0xf] }
 0x101   : > { %v5558_v29 = vadd.f32 %v1246_v20, %v1158_v19  ;;  %v5560_v30 = vadd.f32 %v1070_v25, %v982_v23  ;;  %v4676_v19 = vld [vmem:[%s5395_s14 + $0xb4] sm:$0xf0]  ;;  %v4675_v20 = vld [vmem:[%s5395_s14 + $0xb4] sm:$0xf]  ;;  %v4226_v25 = vld [vmem:[%s5395_s14 + $0xb8] sm:$0xf0] }
 0x102   : > { %v4692_v23 = vld [vmem:[#allocation5 + $0x34] sm:$0xf0] }
 0x103   : > { %8232 = vst [vmem:[#allocation21_spill] sm:$0xff] %v5558_v29  ;;  %v4289_v35 = vor.u32 %v4692_v23, %v4288_v22  ;;  %v4234_v22 = vld [vmem:[%s5395_s14 + $0xc8] sm:$0xf0] }
 0x105   : > { %1327 = vmatpush.bf16.msrb.mxu0 %v4289_v35 }
 0x106   : > { %v1159_v39 = vpop.f32.mrf.mxu2  ;;  %v984_v44 = vpop.f32.mrf.mxu0 }
 0x107   : > { %v1160_v41 = vadd.f32 %v1159_v39, %v5529_v34  ;;  %v1248_v42 = vpop.f32.mrf.mxu3  ;;  %v985_v46 = vadd.f32 %v984_v44, %v5514_v21  ;;  %v1073_v48 = vpop.f32.mrf.mxu1 }
 0x109   : > { %v5572_v51 = vadd.f32 %v1248_v42, %v1160_v41  ;;  %v5574_v54 = vadd.f32 %v1073_v48, %v985_v46  ;;  %1023 = vmatmul.bf16.gmra.mxu0 %v5566_v40  ;;  %v5590_v41 = vor.u32 %v4676_v19, %v4224_v15  ;;  %v5593_v48 = vor.u32 %v4675_v20, %v4226_v25  ;;  %v4232_v15 = vld [vmem:[%s5395_s14 + $0xc0] sm:$0xf]  ;;  %v4678_v19 = vld [vmem:[%s5395_s14 + $0xc4] sm:$0xf0]  ;;  %v4677_v20 = vld [vmem:[%s5395_s14 + $0xc4] sm:$0xf] }
 0x10a   : > { %1112 = vmatmul.bf16.gmra.mxu1 %v5569_v45  ;;  %v5614_v25 = vor.u32 %v4678_v19, %v4232_v15  ;;  %v5617_v38 = vor.u32 %v4677_v20, %v4234_v22 }
 0x10b   : > { %8233 = vst [vmem:[#allocation22_spill] sm:$0xff] %v5574_v54  ;;  %1201 = vmatmul.bf16.gmra.mxu2 %v5566_v40 }
 0x10c   : > { %1290 = vmatmul.bf16.gmra.mxu3 %v5569_v45  ;;  %8240 = vst [vmem:[#allocation29_spill] sm:$0xff] %v5617_v38 }
 0x10e   : > { %v1162_v62 = vpop.f32.mrf.mxu2  ;;  %v986_v5 = vpop.f32.mrf.mxu0 }
 0x10f   : > { %v1163_v0 = vadd.f32 %v1162_v62, %v5529_v34  ;;  %v1251_v1 = vpop.f32.mrf.mxu3  ;;  %v987_v6 = vadd.f32 %v986_v5, %v5514_v21  ;;  %v1075_v7 = vpop.f32.mrf.mxu1 }
 0x111   : > { %v5582_v11 = vadd.f32 %v1251_v1, %v1163_v0  ;;  %v5584_v12 = vadd.f32 %v1075_v7, %v987_v6 }
 0x113   : > { %8234 = vst [vmem:[#allocation23_spill] sm:$0xff] %v5582_v11 }
 0x114   : > { %8235 = vst [vmem:[#allocation24_spill] sm:$0xff] %v5584_v12 }
 0x116   : > { %v1164_v39 = vpop.f32.mrf.mxu2  ;;  %v989_v46 = vpop.f32.mrf.mxu0 }
 0x117   : > { %v1165_v42 = vadd.f32 %v1164_v39, %v5529_v34  ;;  %v1253_v44 = vpop.f32.mrf.mxu3  ;;  %v990_v55 = vadd.f32 %v989_v46, %v5514_v21  ;;  %v1078_v56 = vpop.f32.mrf.mxu1 }
 0x119   : > { %v5596_v57 = vadd.f32 %v1253_v44, %v1165_v42  ;;  %v5598_v60 = vadd.f32 %v1078_v56, %v990_v55  ;;  %1028 = vmatmul.bf16.gmra.mxu0 %v5590_v41  ;;  %v4686_v55 = vld [vmem:[#allocation5 + $0xc] sm:$0xf]  ;;  %v4274_v56 = vld [vmem:[#allocation5 + $0x18] sm:$0xf0] }
 0x11a   : > { %1117 = vmatmul.bf16.gmra.mxu1 %v5593_v48 }
 0x11b   : > { %8236 = vst [vmem:[#allocation25_spill] sm:$0xff] %v5596_v57  ;;  %1206 = vmatmul.bf16.gmra.mxu2 %v5590_v41 }
 0x11c   : > { %8237 = vst [vmem:[#allocation26_spill] sm:$0xff] %v5598_v60  ;;  %1295 = vmatmul.bf16.gmra.mxu3 %v5593_v48 }
 0x11e   : > { %v1167_v61 = vpop.f32.mrf.mxu2  ;;  %v991_v0 = vpop.f32.mrf.mxu0 }
 0x11f   : > { %v1168_v62 = vadd.f32 %v1167_v61, %v5529_v34  ;;  %v1256_v63 = vpop.f32.mrf.mxu3  ;;  %v992_v1 = vadd.f32 %v991_v0, %v5514_v21  ;;  %v1080_v5 = vpop.f32.mrf.mxu1  ;;  %v4718_v61 = vld [vmem:[#allocation5 + $0x10c] sm:$0xf] }
 0x121   : > { %v5606_v6 = vadd.f32 %v1256_v63, %v1168_v62  ;;  %v5608_v7 = vadd.f32 %v1080_v5, %v992_v1  ;;  %v4277_v62 = vor.u32 %v4686_v55, %v4274_v56  ;;  %v4402_v63 = vld [vmem:[#allocation5 + $0x118] sm:$0xf0]  ;;  %v4688_v55 = vld [vmem:[#allocation5 + $0x14] sm:$0xf0] }
 0x122   : > { %v4405_v1 = vor.u32 %v4718_v61, %v4402_v63  ;;  %v4242_v56 = vld [vmem:[%s5395_s14 + $0xd8] sm:$0xf0]  ;;  %v4400_v63 = vld [vmem:[#allocation5 + $0x108] sm:$0xf] }
 0x123   : > { %8238 = vst [vmem:[#allocation27_spill] sm:$0xff] %v5606_v6  ;;  %1506 = vmatpush.bf16.msrb.mxu2 %v4277_v62 }
 0x124   : > { %8239 = vst [vmem:[#allocation28_spill] sm:$0xff] %v5608_v7  ;;  %1595 = vmatpush.bf16.msrb.mxu3 %v4405_v1 }
 0x126   : > { %v1169_v23 = vpop.f32.mrf.mxu2  ;;  %v994_v37 = vpop.f32.mrf.mxu0 }
 0x127   : > { %v1170_v35 = vadd.f32 %v1169_v23, %v5529_v34  ;;  %v1258_v36 = vpop.f32.mrf.mxu3  ;;  %v995_v39 = vadd.f32 %v994_v37, %v5514_v21  ;;  %v1083_v42 = vpop.f32.mrf.mxu1  ;;  %v4680_v37 = vld [vmem:[%s5395_s14 + $0xd4] sm:$0xf0] }
 0x129   : > { %v5620_v44 = vadd.f32 %v1258_v36, %v1170_v35  ;;  %v5622_v46 = vadd.f32 %v1083_v42, %v995_v39  ;;  %1033 = vmatmul.bf16.gmra.mxu0 %v5614_v25  ;;  %v4240_v36 = vld [vmem:[%s5395_s14 + $0xd0] sm:$0xf]  ;;  %v4679_v39 = vld [vmem:[%s5395_s14 + $0xd4] sm:$0xf]  ;;  %v4272_v42 = vld [vmem:[#allocation5 + $0x8] sm:$0xf] }
 0x12a   : > { %1122 = vmatmul.bf16.gmra.mxu1 %v5617_v38  ;;  %v4273_v61 = vor.u32 %v4688_v55, %v4272_v42  ;;  %v5638_v62 = vor.u32 %v4680_v37, %v4240_v36 }
 0x12b   : > { %8241 = vst [vmem:[#allocation30_spill] sm:$0xff] %v5620_v44  ;;  %1211 = vmatmul.bf16.gmra.mxu2 %v5614_v25 }
 0x12c   : > { %8242 = vst [vmem:[#allocation31_spill] sm:$0xff] %v5622_v46  ;;  %1300 = vmatmul.bf16.gmra.mxu3 %v5617_v38  ;;  %1328 = vmatpush.bf16.msrb.mxu0 %v4273_v61 }
 0x12d   : > { %8245 = vst [vmem:[#allocation34_spill] sm:$0xff] %v5638_v62 }
 0x12e   : > { %v1172_v0 = vpop.f32.mrf.mxu2  ;;  %v996_v19 = vpop.f32.mrf.mxu0 }
 0x12f   : > { %v1173_v5 = vadd.f32 %v1172_v0, %v5529_v34  ;;  %v1261_v15 = vpop.f32.mrf.mxu3  ;;  %v997_v20 = vadd.f32 %v996_v19, %v5514_v21  ;;  %v1085_v22 = vpop.f32.mrf.mxu1  ;;  %v4720_v0 = vld [vmem:[#allocation5 + $0x114] sm:$0xf0]  ;;  %v5641_v19 = vor.u32 %v4679_v39, %v4242_v56 }
 0x130   : > { %v4401_v46 = vor.u32 %v4720_v0, %v4400_v63  ;;  %v4248_v0 = vld [vmem:[%s5395_s14 + $0xe0] sm:$0xf] }
 0x131   : > { %v5630_v23 = vadd.f32 %v1261_v15, %v1173_v5  ;;  %v5632_v35 = vadd.f32 %v1085_v22, %v997_v20  ;;  %8246 = vst [vmem:[#allocation35_spill] sm:$0xff] %v5641_v19 }
 0x132   : > { %1417 = vmatpush.bf16.msrb.mxu1 %v4401_v46 }
 0x133   : > { %8243 = vst [vmem:[#allocation32_spill] sm:$0xff] %v5630_v23 }
 0x134   : > { %8244 = vst [vmem:[#allocation33_spill] sm:$0xff] %v5632_v35 }
 0x136   : > { %v1174_v38 = vpop.f32.mrf.mxu2  ;;  %v999_v15 = vpop.f32.mrf.mxu0 }
 0x137   : > { %v1175_v1 = vadd.f32 %v1174_v38, %v5529_v34  ;;  %v1263_v5 = vpop.f32.mrf.mxu3  ;;  %v1000_v20 = vadd.f32 %v999_v15, %v5514_v21  ;;  %v1088_v22 = vpop.f32.mrf.mxu1  ;;  %v4250_v15 = vld [vmem:[%s5395_s14 + $0xe8] sm:$0xf0] }
 0x139   : > { %v5644_v42 = vadd.f32 %v1263_v5, %v1175_v1  ;;  %v5646_v55 = vadd.f32 %v1088_v22, %v1000_v20  ;;  %1038 = vmatmul.bf16.gmra.mxu0 %v5638_v62  ;;  %v4682_v1 = vld [vmem:[%s5395_s14 + $0xe4] sm:$0xf0]  ;;  %v4681_v5 = vld [vmem:[%s5395_s14 + $0xe4] sm:$0xf] }
 0x13a   : > { %1127 = vmatmul.bf16.gmra.mxu1 %v5641_v19  ;;  %v5662_v22 = vor.u32 %v4682_v1, %v4248_v0 }
 0x13b   : > { %8247 = vst [vmem:[#allocation36_spill] sm:$0xff] %v5644_v42  ;;  %1216 = vmatmul.bf16.gmra.mxu2 %v5638_v62  ;;  %v5665_v62 = vor.u32 %v4681_v5, %v4250_v15 }
 0x13c   : > { %8248 = vst [vmem:[#allocation37_spill] sm:$0xff] %v5646_v55  ;;  %1305 = vmatmul.bf16.gmra.mxu3 %v5641_v19 }
 0x13d   : > { %8251 = vst [vmem:[#allocation40_spill] sm:$0xff] %v5662_v22 }
 0x13e   : > { %v1177_v38 = vpop.f32.mrf.mxu2  ;;  %v1001_v37 = vpop.f32.mrf.mxu0  ;;  %8252 = vst [vmem:[#allocation41_spill] sm:$0xff] %v5665_v62 }
 0x13f   : > { %v1178_v46 = vadd.f32 %v1177_v38, %v5529_v34  ;;  %v1266_v36 = vpop.f32.mrf.mxu3  ;;  %v1002_v39 = vadd.f32 %v1001_v37, %v5514_v21  ;;  %v1090_v56 = vpop.f32.mrf.mxu1 }
 0x141   : > { %v5654_v61 = vadd.f32 %v1266_v36, %v1178_v46  ;;  %v5656_v63 = vadd.f32 %v1090_v56, %v1002_v39 }
 0x143   : > { %8249 = vst [vmem:[#allocation38_spill] sm:$0xff] %v5654_v61 }
 0x144   : > { %8250 = vst [vmem:[#allocation39_spill] sm:$0xff] %v5656_v63 }
 0x146   : > { %v1179_v20 = vpop.f32.mrf.mxu2  ;;  %v1004_v38 = vpop.f32.mrf.mxu0 }
 0x147   : > { %v1180_v55 = vadd.f32 %v1179_v20, %v5529_v34  ;;  %v1268_v19 = vpop.f32.mrf.mxu3  ;;  %v1005_v37 = vadd.f32 %v1004_v38, %v5514_v21  ;;  %v1093_v46 = vpop.f32.mrf.mxu1  ;;  %v4256_v38 = vld [vmem:[%s5395_s14 + $0xf0] sm:$0xf] }
 0x149   : > { %v5668_v36 = vadd.f32 %v1268_v19, %v1180_v55  ;;  %v5670_v39 = vadd.f32 %v1093_v46, %v1005_v37  ;;  %1043 = vmatmul.bf16.gmra.mxu0 %v5662_v22  ;;  %v4684_v37 = vld [vmem:[%s5395_s14 + $0xf4] sm:$0xf0]  ;;  %v4683_v46 = vld [vmem:[%s5395_s14 + $0xf4] sm:$0xf] }
 0x14a   : > { %1132 = vmatmul.bf16.gmra.mxu1 %v5665_v62 }
 0x14b   : > { %8253 = vst [vmem:[#allocation42_spill] sm:$0xff] %v5668_v36  ;;  %1221 = vmatmul.bf16.gmra.mxu2 %v5662_v22  ;;  %v5686_v22 = vor.u32 %v4684_v37, %v4256_v38 }
 0x14c   : > { %8254 = vst [vmem:[#allocation43_spill] sm:$0xff] %v5670_v39  ;;  %1310 = vmatmul.bf16.gmra.mxu3 %v5665_v62  ;;  %v4258_v39 = vld [vmem:[%s5395_s14 + $0xf8] sm:$0xf0] }
 0x14d   : > { %8257 = vst [vmem:[#allocation46_spill] sm:$0xff] %v5686_v22  ;;  %v5689_v61 = vor.u32 %v4683_v46, %v4258_v39 }
 0x14e   : > { %v1182_v56 = vpop.f32.mrf.mxu2  ;;  %v1006_v5 = vpop.f32.mrf.mxu0 }
 0x14f   : > { %v1183_v0 = vadd.f32 %v1182_v56, %v5529_v34  ;;  %v1271_v1 = vpop.f32.mrf.mxu3  ;;  %v1007_v19 = vadd.f32 %v1006_v5, %v5514_v21  ;;  %v1095_v55 = vpop.f32.mrf.mxu1  ;;  %8258 = vst [vmem:[#allocation47_spill] sm:$0xff] %v5689_v61 }
 0x151   : > { %v5678_v15 = vadd.f32 %v1271_v1, %v1183_v0  ;;  %v5680_v20 = vadd.f32 %v1095_v55, %v1007_v19 }
 0x153   : > { %8255 = vst [vmem:[#allocation44_spill] sm:$0xff] %v5678_v15 }
 0x154   : > { %8256 = vst [vmem:[#allocation45_spill] sm:$0xff] %v5680_v20 }
 0x156   : > { %v1184_v63 = vpop.f32.mrf.mxu2  ;;  %v1009_v56 = vpop.f32.mrf.mxu0 }
 0x157   : > { %v1185_v62 = vadd.f32 %v1184_v63, %v5529_v34  ;;  %v1273_v36 = vpop.f32.mrf.mxu3  ;;  %v1010_v5 = vadd.f32 %v1009_v56, %v5514_v21  ;;  %v1098_v35 = vpop.f32.mrf.mxu1 }
 0x159   : > { %v5692_v0 = vadd.f32 %v1273_v36, %v1185_v62  ;;  %v5694_v1 = vadd.f32 %v1098_v35, %v1010_v5  ;;  %1048 = vmatmul.bf16.gmra.mxu0 %v5686_v22 }
 0x15a   : > { %1137 = vmatmul.bf16.gmra.mxu1 %v5689_v61 }
 0x15b   : > { %8259 = vst [vmem:[#allocation48_spill] sm:$0xff] %v5692_v0  ;;  %1226 = vmatmul.bf16.gmra.mxu2 %v5686_v22 }
 0x15c   : > { %8260 = vst [vmem:[#allocation49_spill] sm:$0xff] %v5694_v1  ;;  %1315 = vmatmul.bf16.gmra.mxu3 %v5689_v61 }
 0x15e   : > { %v1187_v63 = vpop.f32.mrf.mxu2  ;;  %v1011_v55 = vpop.f32.mrf.mxu0 }
 0x15f   : > { %v1188_v19 = vadd.f32 %v1187_v63, %v5529_v34  ;;  %v1276_v39 = vpop.f32.mrf.mxu3  ;;  %v1012_v38 = vadd.f32 %v1011_v55, %v5514_v21  ;;  %v1100_v37 = vpop.f32.mrf.mxu1 }
 0x161   : > { %v5702_v62 = vadd.f32 %v1276_v39, %v1188_v19  ;;  %v5704_v35 = vadd.f32 %v1100_v37, %v1012_v38 }
 0x163   : > { %8261 = vst [vmem:[#allocation50_spill] sm:$0xff] %v5702_v62 }
 0x164   : > { %8262 = vst [vmem:[#allocation51_spill] sm:$0xff] %v5704_v35 }
 0x166   : > { %v1189_v36 = vpop.f32.mrf.mxu2  ;;  %v1014_v5 = vpop.f32.mrf.mxu0 }
 0x167   : > { %v1190_v46 = vadd.f32 %v1189_v36, %v5529_v34  ;;  %v1278_v56 = vpop.f32.mrf.mxu3  ;;  %v1015_v1 = vadd.f32 %v1014_v5, %v5514_v21  ;;  %v1103_v61 = vpop.f32.mrf.mxu1 }
 0x169   : > { %v5708_v22 = vadd.f32 %v1278_v56, %v1190_v46  ;;  %v5710_v63 = vadd.f32 %v1103_v61, %v1015_v1  ;;  %1329 = vmatmul.bf16.vlgmr.msrb.gmra.mxu0 %v5417_v43  ;;  %v4772_v1 = vld [vmem:[#allocation11 + $0xb8] sm:$0xff] }
 0x16a   : > { %1418 = vmatmul.bf16.vlgmr.msrb.gmra.mxu1 %v5419_v47  ;;  %3767 = vmatpush.bf16.msra.mxu2 %v4772_v1 }
 0x16b   : > { %8263 = vst [vmem:[#allocation52_spill] sm:$0xff] %v5708_v22  ;;  %1507 = vmatmul.bf16.vlgmr.msrb.gmra.mxu2 %v5417_v43 }
 0x16c   : > { %8264 = vst [vmem:[#allocation53_spill] sm:$0xff] %v5710_v63  ;;  %1596 = vmatmul.bf16.vlgmr.msrb.gmra.mxu3 %v5419_v47 }
 0x16e   : > { %v1192_v19 = vpop.f32.mrf.mxu2  ;;  %v1016_v38 = vpop.f32.mrf.mxu0 }
 0x16f   : > { %v1193_v39 = vadd.f32 %v1192_v19, %v5529_v34  ;;  %v1281_v55 = vpop.f32.mrf.mxu3  ;;  %v1017_v37 = vadd.f32 %v1016_v38, %v5514_v21  ;;  %v1105_v36 = vpop.f32.mrf.mxu1  ;;  %v4764_v38 = vld [vmem:[#allocation11 + $0x78] sm:$0xff] }
 0x170   : > { %3678 = vmatpush.bf16.msra.mxu1 %v4764_v38 }
 0x171   : > { %v5718_v46 = vadd.f32 %v1281_v55, %v1193_v39  ;;  %v5720_v61 = vadd.f32 %v1105_v36, %v1017_v37  ;;  %v4756_v39 = vld [vmem:[#allocation11 + $0x38] sm:$0xff] }
 0x172   : > { %v4780_v55 = vld [vmem:[#allocation11 + $0xf8] sm:$0xff]  ;;  %3589 = vmatpush.bf16.msra.mxu0 %v4756_v39 }
 0x173   : > { %8265 = vst [vmem:[#allocation54_spill] sm:$0xff] %v5718_v46  ;;  %3856 = vmatpush.bf16.msra.mxu3 %v4780_v55 }
 0x174   : > { %8266 = vst [vmem:[#allocation55_spill] sm:$0xff] %v5720_v61 }
 0x176   : > { %v1194_v56 = vpop.f32.mrf.mxu2  ;;  %v1019_v63 = vpop.f32.mrf.mxu0 }
 0x177   : > { %v1195_v5 = vadd.f32 %v1194_v56, %v5529_v34  ;;  %v1283_v43 = vpop.f32.mrf.mxu3  ;;  %v1020_v47 = vadd.f32 %v1019_v63, %v5514_v21  ;;  %v1108_v35 = vpop.f32.mrf.mxu1 }
 0x179   : > { %v5724_v19 = vadd.f32 %v1283_v43, %v1195_v5  ;;  %v5726_v22 = vadd.f32 %v1108_v35, %v1020_v47  ;;  %1334 = vmatmul.bf16.gmra.mxu0 %v5429_v2 }
 0x17a   : > { %1423 = vmatmul.bf16.gmra.mxu1 %v5431_v3 }
 0x17b   : > { %8267 = vst [vmem:[#allocation56_spill] sm:$0xff] %v5724_v19  ;;  %1512 = vmatmul.bf16.gmra.mxu2 %v5429_v2 }
 0x17c   : > { %8268 = vst [vmem:[#allocation57_spill] sm:$0xff] %v5726_v22  ;;  %1601 = vmatmul.bf16.gmra.mxu3 %v5431_v3 }
 0x17e   : > { %v1197_v37 = vpop.f32.mrf.mxu2  ;;  %v1021_v35 = vpop.f32.mrf.mxu0 }
 0x17f   : > { %v1198_v63 = vadd.f32 %v1197_v37, %v5529_v34  ;;  %v1286_v36 = vpop.f32.mrf.mxu3  ;;  %v1022_v1 = vadd.f32 %v1021_v35, %v5514_v21  ;;  %v1110_v56 = vpop.f32.mrf.mxu1 }
 0x181   : > { %v5734_v5 = vadd.f32 %v1286_v36, %v1198_v63  ;;  %v5736_v43 = vadd.f32 %v1110_v56, %v1022_v1 }
 0x183   : > { %8269 = vst [vmem:[#allocation58_spill] sm:$0xff] %v5734_v5 }
 0x184   : > { %8270 = vst [vmem:[#allocation59_spill] sm:$0xff] %v5736_v43 }
 0x186   : > { %v1199_v2 = vpop.f32.mrf.mxu2  ;;  %v1024_v22 = vpop.f32.mrf.mxu0 }
 0x187   : > { %v1200_v47 = vadd.f32 %v1199_v2, %v5529_v34  ;;  %v1288_v3 = vpop.f32.mrf.mxu3  ;;  %v1025_v39 = vadd.f32 %v1024_v22, %v5514_v21  ;;  %v1113_v55 = vpop.f32.mrf.mxu1 }
 0x189   : > { %v5740_v38 = vadd.f32 %v1288_v3, %v1200_v47  ;;  %v5742_v37 = vadd.f32 %v1113_v55, %v1025_v39  ;;  %1339 = vmatmul.bf16.gmra.mxu0 %v5441_v8  ;;  %v4771_v3 = vld [vmem:[#allocation11 + $0xb0] sm:$0xff] }
 0x18a   : > { %1428 = vmatmul.bf16.gmra.mxu1 %v5443_v9  ;;  %3768 = vmatpush.bf16.msra.mxu2 %v4771_v3 }
 0x18b   : > { %8271 = vst [vmem:[#allocation60_spill] sm:$0xff] %v5740_v38  ;;  %1517 = vmatmul.bf16.gmra.mxu2 %v5441_v8 }
 0x18c   : > { %8272 = vst [vmem:[#allocation61_spill] sm:$0xff] %v5742_v37  ;;  %1606 = vmatmul.bf16.gmra.mxu3 %v5443_v9 }
 0x18e   : > { %v1202_v63 = vpop.f32.mrf.mxu2  ;;  %v1026_v1 = vpop.f32.mrf.mxu0 }
 0x18f   : > { %v1203_v36 = vadd.f32 %v1202_v63, %v5529_v34  ;;  %v1291_v35 = vpop.f32.mrf.mxu3  ;;  %v1027_v22 = vadd.f32 %v1026_v1, %v5514_v21  ;;  %v1115_v56 = vpop.f32.mrf.mxu1  ;;  %v4763_v1 = vld [vmem:[#allocation11 + $0x70] sm:$0xff] }
 0x190   : > { %3679 = vmatpush.bf16.msra.mxu1 %v4763_v1 }
 0x191   : > { %v5750_v2 = vadd.f32 %v1291_v35, %v1203_v36  ;;  %v5752_v47 = vadd.f32 %v1115_v56, %v1027_v22  ;;  %v4755_v36 = vld [vmem:[#allocation11 + $0x30] sm:$0xff] }
 0x192   : > { %v4779_v35 = vld [vmem:[#allocation11 + $0xf0] sm:$0xff]  ;;  %3590 = vmatpush.bf16.msra.mxu0 %v4755_v36 }
 0x193   : > { %8273 = vst [vmem:[#allocation62_spill] sm:$0xff] %v5750_v2  ;;  %3857 = vmatpush.bf16.msra.mxu3 %v4779_v35 }
 0x194   : > { %8274 = vst [vmem:[#allocation63_spill] sm:$0xff] %v5752_v47 }
 0x196   : > { %v1204_v39 = vpop.f32.mrf.mxu2  ;;  %v1029_v37 = vpop.f32.mrf.mxu0 }
 0x197   : > { %v1205_v55 = vadd.f32 %v1204_v39, %v5529_v34  ;;  %v1293_v8 = vpop.f32.mrf.mxu3  ;;  %v1030_v9 = vadd.f32 %v1029_v37, %v5514_v21  ;;  %v1118_v43 = vpop.f32.mrf.mxu1 }
 0x199   : > { %v5756_v63 = vadd.f32 %v1293_v8, %v1205_v55  ;;  %v5758_v38 = vadd.f32 %v1118_v43, %v1030_v9  ;;  %1344 = vmatmul.bf16.gmra.mxu0 %v5453_v26 }
 0x19a   : > { %1433 = vmatmul.bf16.gmra.mxu1 %v5455_v27 }
 0x19b   : > { %8275 = vst [vmem:[#allocation64_spill] sm:$0xff] %v5756_v63  ;;  %1522 = vmatmul.bf16.gmra.mxu2 %v5453_v26 }
 0x19c   : > { %8276 = vst [vmem:[#allocation65_spill] sm:$0xff] %v5758_v38  ;;  %1611 = vmatmul.bf16.gmra.mxu3 %v5455_v27 }
 0x19e   : > { %v1207_v22 = vpop.f32.mrf.mxu2  ;;  %v1031_v43 = vpop.f32.mrf.mxu0 }
 0x19f   : > { %v1208_v37 = vadd.f32 %v1207_v22, %v5529_v34  ;;  %v1296_v56 = vpop.f32.mrf.mxu3  ;;  %v1032_v3 = vadd.f32 %v1031_v43, %v5514_v21  ;;  %v1120_v39 = vpop.f32.mrf.mxu1 }
 0x1a1   : > { %v5766_v55 = vadd.f32 %v1296_v56, %v1208_v37  ;;  %v5768_v8 = vadd.f32 %v1120_v39, %v1032_v3 }
 0x1a3   : > { %8277 = vst [vmem:[#allocation66_spill] sm:$0xff] %v5766_v55 }
 0x1a4   : > { %8278 = vst [vmem:[#allocation67_spill] sm:$0xff] %v5768_v8 }
 0x1a6   : > { %v1209_v26 = vpop.f32.mrf.mxu2  ;;  %v1034_v38 = vpop.f32.mrf.mxu0 }
 0x1a7   : > { %v1210_v9 = vadd.f32 %v1209_v26, %v5529_v34  ;;  %v1298_v27 = vpop.f32.mrf.mxu3  ;;  %v1035_v36 = vadd.f32 %v1034_v38, %v5514_v21  ;;  %v1123_v35 = vpop.f32.mrf.mxu1 }
 0x1a9   : > { %v5772_v1 = vadd.f32 %v1298_v27, %v1210_v9  ;;  %v5774_v22 = vadd.f32 %v1123_v35, %v1035_v36  ;;  %1349 = vmatmul.bf16.gmra.mxu0 %v5465_v32  ;;  %v4770_v27 = vld [vmem:[#allocation11 + $0xa8] sm:$0xff] }
 0x1aa   : > { %1438 = vmatmul.bf16.gmra.mxu1 %v5467_v33  ;;  %3769 = vmatpush.bf16.msra.mxu2 %v4770_v27 }
 0x1ab   : > { %8279 = vst [vmem:[#allocation68_spill] sm:$0xff] %v5772_v1  ;;  %1527 = vmatmul.bf16.gmra.mxu2 %v5465_v32 }
 0x1ac   : > { %8280 = vst [vmem:[#allocation69_spill] sm:$0xff] %v5774_v22  ;;  %1616 = vmatmul.bf16.gmra.mxu3 %v5467_v33 }
 0x1ae   : > { %v1212_v37 = vpop.f32.mrf.mxu2  ;;  %v1036_v3 = vpop.f32.mrf.mxu0 }
 0x1af   : > { %v1213_v56 = vadd.f32 %v1212_v37, %v5529_v34  ;;  %v1301_v43 = vpop.f32.mrf.mxu3  ;;  %v1037_v38 = vadd.f32 %v1036_v3, %v5514_v21  ;;  %v1125_v39 = vpop.f32.mrf.mxu1  ;;  %v4762_v3 = vld [vmem:[#allocation11 + $0x68] sm:$0xff] }
 0x1b0   : > { %3680 = vmatpush.bf16.msra.mxu1 %v4762_v3 }
 0x1b1   : > { %v5782_v26 = vadd.f32 %v1301_v43, %v1213_v56  ;;  %v5784_v9 = vadd.f32 %v1125_v39, %v1037_v38  ;;  %v4754_v56 = vld [vmem:[#allocation11 + $0x28] sm:$0xff] }
 0x1b2   : > { %v4778_v43 = vld [vmem:[#allocation11 + $0xe8] sm:$0xff]  ;;  %3591 = vmatpush.bf16.msra.mxu0 %v4754_v56 }
 0x1b3   : > { %8281 = vst [vmem:[#allocation70_spill] sm:$0xff] %v5782_v26  ;;  %3858 = vmatpush.bf16.msra.mxu3 %v4778_v43 }
 0x1b4   : > { %8282 = vst [vmem:[#allocation71_spill] sm:$0xff] %v5784_v9 }
 0x1b6   : > { %v1214_v36 = vpop.f32.mrf.mxu2  ;;  %v1039_v22 = vpop.f32.mrf.mxu0 }
 0x1b7   : > { %v1215_v35 = vadd.f32 %v1214_v36, %v5529_v34  ;;  %v1303_v32 = vpop.f32.mrf.mxu3  ;;  %v1040_v33 = vadd.f32 %v1039_v22, %v5514_v21  ;;  %v1128_v8 = vpop.f32.mrf.mxu1 }
 0x1b9   : > { %v5788_v37 = vadd.f32 %v1303_v32, %v1215_v35  ;;  %v5790_v1 = vadd.f32 %v1128_v8, %v1040_v33  ;;  %1354 = vmatmul.bf16.gmra.mxu0 %v5477_v52 }
 0x1ba   : > { %1443 = vmatmul.bf16.gmra.mxu1 %v5479_v53 }
 0x1bb   : > { %8283 = vst [vmem:[#allocation72_spill] sm:$0xff] %v5788_v37  ;;  %1532 = vmatmul.bf16.gmra.mxu2 %v5477_v52 }
 0x1bc   : > { %8284 = vst [vmem:[#allocation73_spill] sm:$0xff] %v5790_v1  ;;  %1621 = vmatmul.bf16.gmra.mxu3 %v5479_v53 }
 0x1be   : > { %v1217_v38 = vpop.f32.mrf.mxu2  ;;  %v1041_v8 = vpop.f32.mrf.mxu0 }
 0x1bf   : > { %v1218_v22 = vadd.f32 %v1217_v38, %v5529_v34  ;;  %v1306_v39 = vpop.f32.mrf.mxu3  ;;  %v1042_v27 = vadd.f32 %v1041_v8, %v5514_v21  ;;  %v1130_v36 = vpop.f32.mrf.mxu1 }
 0x1c1   : > { %v5798_v35 = vadd.f32 %v1306_v39, %v1218_v22  ;;  %v5800_v32 = vadd.f32 %v1130_v36, %v1042_v27 }
 0x1c3   : > { %8285 = vst [vmem:[#allocation74_spill] sm:$0xff] %v5798_v35  ;;  %v4777_v35 = vld [vmem:[#allocation11 + $0xe0] sm:$0xff] }
 0x1c4   : > { %8286 = vst [vmem:[#allocation75_spill] sm:$0xff] %v5800_v32  ;;  %v4753_v32 = vld [vmem:[#allocation11 + $0x20] sm:$0xff]  ;;  %3859 = vmatpush.bf16.msra.mxu3 %v4777_v35 }
 0x1c5   : > { %3592 = vmatpush.bf16.msra.mxu0 %v4753_v32 }
 0x1c6   : > { %v1219_v52 = vpop.f32.mrf.mxu2  ;;  %v1044_v1 = vpop.f32.mrf.mxu0 }
 0x1c7   : > { %v1220_v33 = vadd.f32 %v1219_v52, %v5529_v34  ;;  %v1308_v53 = vpop.f32.mrf.mxu3  ;;  %v1045_v56 = vadd.f32 %v1044_v1, %v5514_v21  ;;  %v1133_v43 = vpop.f32.mrf.mxu1 }
 0x1c9   : > { %v5804_v3 = vadd.f32 %v1308_v53, %v1220_v33  ;;  %v5806_v38 = vadd.f32 %v1133_v43, %v1045_v56  ;;  %1359 = vmatmul.bf16.gmra.mxu0 %v5489_v58  ;;  %v4769_v53 = vld [vmem:[#allocation11 + $0xa0] sm:$0xff] }
 0x1ca   : > { %1448 = vmatmul.bf16.gmra.mxu1 %v5491_v59  ;;  %3770 = vmatpush.bf16.msra.mxu2 %v4769_v53 }
 0x1cb   : > { %8287 = vst [vmem:[#allocation76_spill] sm:$0xff] %v5804_v3  ;;  %1537 = vmatmul.bf16.gmra.mxu2 %v5489_v58 }
 0x1cc   : > { %8288 = vst [vmem:[#allocation77_spill] sm:$0xff] %v5806_v38  ;;  %1626 = vmatmul.bf16.gmra.mxu3 %v5491_v59 }
 0x1ce   : > { %v1222_v22 = vpop.f32.mrf.mxu2  ;;  %v1046_v27 = vpop.f32.mrf.mxu0 }
 0x1cf   : > { %v1223_v39 = vadd.f32 %v1222_v22, %v5529_v34  ;;  %v1311_v8 = vpop.f32.mrf.mxu3  ;;  %v1047_v1 = vadd.f32 %v1046_v27, %v5514_v21  ;;  %v1135_v36 = vpop.f32.mrf.mxu1 }
 0x1d1   : > { %v5814_v52 = vadd.f32 %v1311_v8, %v1223_v39  ;;  %v5816_v33 = vadd.f32 %v1135_v36, %v1047_v1  ;;  %v4761_v39 = vld [vmem:[#allocation11 + $0x60] sm:$0xff] }
 0x1d2   : > { %3681 = vmatpush.bf16.msra.mxu1 %v4761_v39 }
 0x1d3   : > { %8289 = vst [vmem:[#allocation78_spill] sm:$0xff] %v5814_v52 }
 0x1d4   : > { %8290 = vst [vmem:[#allocation79_spill] sm:$0xff] %v5816_v33 }
 0x1d6   : > { %v1224_v56 = vpop.f32.mrf.mxu2  ;;  %v1049_v38 = vpop.f32.mrf.mxu0 }
 0x1d7   : > { %v1225_v43 = vadd.f32 %v1224_v56, %v5529_v34  ;;  %v1313_v58 = vpop.f32.mrf.mxu3  ;;  %v1050_v59 = vadd.f32 %v1049_v38, %v5514_v21  ;;  %v1138_v3 = vpop.f32.mrf.mxu1 }
 0x1d9   : > { %v5820_v22 = vadd.f32 %v1313_v58, %v1225_v43  ;;  %v5822_v27 = vadd.f32 %v1138_v3, %v1050_v59  ;;  %1364 = vmatmul.bf16.gmra.mxu0 %v5501_v16 }
 0x1da   : > { %1453 = vmatmul.bf16.gmra.mxu1 %v5503_v17 }
 0x1db   : > { %8291 = vst [vmem:[#allocation80_spill] sm:$0xff] %v5820_v22  ;;  %1542 = vmatmul.bf16.gmra.mxu2 %v5501_v16  ;;  %v5835_v16 = vperm.slane %v5509_v18, 2 }
 0x1dc   : > { %8292 = vst [vmem:[#allocation81_spill] sm:$0xff] %v5822_v27  ;;  %1631 = vmatmul.bf16.gmra.mxu3 %v5503_v17 }
 0x1de   : > { %v1227_v8 = vpop.f32.mrf.mxu2  ;;  %v1051_v36 = vpop.f32.mrf.mxu0 }
 0x1df   : > { %v1228_v38 = vadd.f32 %v1227_v8, %v5529_v34  ;;  %v1316_v1 = vpop.f32.mrf.mxu3  ;;  %v1052_v3 = vadd.f32 %v1051_v36, %v5514_v21  ;;  %v1140_v53 = vpop.f32.mrf.mxu1  ;;  %v1869_v36 = vmul.f32 %v5523_v31, %v5523_v31 }
 0x1e1   : > { %v5830_v56 = vadd.f32 %v1316_v1, %v1228_v38  ;;  %v5832_v43 = vadd.f32 %v1140_v53, %v1052_v3  ;;  %v5847_v38 = vperm.slane %v5509_v18, 3 }
 0x1e3   : > { %8293 = vst [vmem:[#allocation82_spill] sm:$0xff] %v5830_v56 }
 0x1e4   : > { %8294 = vst [vmem:[#allocation83_spill] sm:$0xff] %v5832_v43 }
 0x1e6   : > { %v1229_v17 = vpop.f32.mrf.mxu2  ;;  %v1330_v58 = vpop.f32.mrf.mxu0 }
 0x1e7   : > { %v1230_v32 = vadd.f32 %v1229_v17, %v5529_v34  ;;  %v1318_v35 = vpop.f32.mrf.mxu3  ;;  %v1331_v59 = vadd.f32 %v1330_v58, %v5835_v16  ;;  %v1419_v39 = vpop.f32.mrf.mxu1  ;;  %v1870_v34 = vmul.f32 %v5534_v49, %v5534_v49 }
 0x1e9   : > { %v5839_v8 = vadd.f32 %v1318_v35, %v1230_v32  ;;  %1369 = vmatmul.bf16.gmra.mxu0 %v5518_v24  ;;  %v5842_v21 = vadd.f32 %v1419_v39, %v1331_v59  ;;  %v1677_v32 = vadd.f32 %v5534_v49, %v5523_v31  ;;  %v1997_v59 = vadd.f32 %v1870_v34, %v1869_v36 }
 0x1ea   : > { %1458 = vmatmul.bf16.gmra.mxu1 %v5520_v28  ;;  %v1874_v31 = vmul.f32 %v5548_v13, %v5548_v13 }
 0x1eb   : > { %8295 = vst [vmem:[#allocation84_spill] sm:$0xff] %v5839_v8  ;;  %1547 = vmatmul.bf16.gmra.mxu2 %v5518_v24  ;;  %v1871_v18 = vmul.f32 %v5842_v21, %v5842_v21  ;;  %v1678_v58 = vadd.f32 %v1677_v32, %v5842_v21  ;;  %v4768_v8 = vld [vmem:[#allocation11 + $0x98] sm:$0xff] }
 0x1ec   : > { %1636 = vmatmul.bf16.gmra.mxu3 %v5520_v28  ;;  %3771 = vmatpush.bf16.msra.mxu2 %v4768_v8 }
 0x1ed   : > { %v1998_v49 = vadd.f32 %v1997_v59, %v1871_v18  ;;  %v1682_v18 = vadd.f32 %v5548_v13, %v5536_v50  ;;  %v4752_v59 = vld [vmem:[#allocation11 + $0x18] sm:$0xff] }
 0x1ee   : > { %v1508_v1 = vpop.f32.mrf.mxu2  ;;  %v1332_v17 = vpop.f32.mrf.mxu0  ;;  %3593 = vmatpush.bf16.msra.mxu0 %v4752_v59 }
 0x1ef   : > { %v1509_v3 = vadd.f32 %v1508_v1, %v5847_v38  ;;  %v1597_v53 = vpop.f32.mrf.mxu3  ;;  %v1333_v24 = vadd.f32 %v1332_v17, %v5835_v16  ;;  %v1421_v28 = vpop.f32.mrf.mxu1 }
 0x1f1   : > { %v5860_v35 = vadd.f32 %v1597_v53, %v1509_v3  ;;  %v5863_v39 = vadd.f32 %v1421_v28, %v1333_v24  ;;  %v1873_v3 = vmul.f32 %v5536_v50, %v5536_v50 }
 0x1f3   : > { %8296 = vst [vmem:[#allocation85_spill] sm:$0xff] %v5860_v35  ;;  %v1679_v1 = vadd.f32 %v1678_v58, %v5860_v35  ;;  %v1872_v43 = vmul.f32 %v5860_v35, %v5860_v35  ;;  %v1875_v34 = vmul.f32 %v5863_v39, %v5863_v39  ;;  %v2002_v58 = vadd.f32 %v1874_v31, %v1873_v3  ;;  %v4760_v3 = vld [vmem:[#allocation11 + $0x58] sm:$0xff] }
 0x1f4   : > { %3682 = vmatpush.bf16.msra.mxu1 %v4760_v3 }
 0x1f5   : > { %1680 = vadd.xlane.f32.xlu0 %v1679_v1  ;;  %v1999_v17 = vadd.f32 %v1998_v49, %v1872_v43  ;;  %v1683_v43 = vadd.f32 %v1682_v18, %v5863_v39  ;;  %v4776_v1 = vld [vmem:[#allocation11 + $0xd8] sm:$0xff]  ;;  %v2003_v35 = vadd.f32 %v2002_v58, %v1875_v34 }
 0x1f6   : > { %v1510_v53 = vpop.f32.mrf.mxu2  ;;  %v1335_v24 = vpop.f32.mrf.mxu0  ;;  %3860 = vmatpush.bf16.msra.mxu3 %v4776_v1 }
 0x1f7   : > { %v1511_v36 = vadd.f32 %v1510_v53, %v5847_v38  ;;  %v1599_v32 = vpop.f32.mrf.mxu3  ;;  %2000 = vadd.xlane.f32.xlu1 %v1999_v17  ;;  %v1336_v28 = vadd.f32 %v1335_v24, %v5835_v16  ;;  %v1424_v8 = vpop.f32.mrf.mxu1 }
 0x1f9   : > { %v5878_v49 = vadd.f32 %v1599_v32, %v1511_v36  ;;  %1374 = vmatmul.bf16.gmra.mxu0 %v5542_v4  ;;  %v5882_v53 = vadd.f32 %v1424_v8, %v1336_v28  ;;  %v1878_v36 = vmul.f32 %v5558_v29, %v5558_v29  ;;  %v1687_v8 = vadd.f32 %v5558_v29, %v5550_v14 }
 0x1fa   : > { %1463 = vmatmul.bf16.gmra.mxu1 %v5545_v10 }
 0x1fb   : > { %1552 = vmatmul.bf16.gmra.mxu2 %v5542_v4  ;;  %v1684_v17 = vadd.f32 %v1683_v43, %v5878_v49  ;;  %v1876_v31 = vmul.f32 %v5878_v49, %v5878_v49  ;;  %v1877_v4 = vmul.f32 %v5550_v14, %v5550_v14  ;;  %v1879_v24 = vmul.f32 %v5882_v53, %v5882_v53 }
 0x1fc   : > { %1641 = vmatmul.bf16.gmra.mxu3 %v5545_v10  ;;  %v1688_v59 = vadd.f32 %v1687_v8, %v5882_v53 }
 0x1fd   : > { %1685 = vadd.xlane.f32.xlu0 %v1684_v17  ;;  %v2004_v34 = vadd.f32 %v2003_v35, %v1876_v31  ;;  %v2007_v1 = vadd.f32 %v1878_v36, %v1877_v4 }
 0x1fe   : > { %v1513_v32 = vpop.f32.mrf.mxu2  ;;  %v1337_v10 = vpop.f32.mrf.mxu0 }
 0x1ff   : > { %v1514_v18 = vadd.f32 %v1513_v32, %v5847_v38  ;;  %v1602_v28 = vpop.f32.mrf.mxu3  ;;  %2005 = vadd.xlane.f32.xlu1 %v2004_v34  ;;  %v1338_v58 = vadd.f32 %v1337_v10, %v5835_v16  ;;  %v1426_v35 = vpop.f32.mrf.mxu1  ;;  %v2008_v34 = vadd.f32 %v2007_v1, %v1879_v24  ;;  %v1882_v32 = vmul.f32 %v5572_v51, %v5572_v51 }
 0x200   : > { %v1692_v24 = vadd.f32 %v5572_v51, %v5560_v30 }
 0x201   : > { %v5900_v43 = vadd.f32 %v1602_v28, %v1514_v18  ;;  %v5903_v17 = vadd.f32 %v1426_v35, %v1338_v58  ;;  %v1881_v18 = vmul.f32 %v5560_v30, %v5560_v30 }
 0x203   : > { %v1689_v31 = vadd.f32 %v1688_v59, %v5900_v43  ;;  %v1880_v3 = vmul.f32 %v5900_v43, %v5900_v43  ;;  %v1883_v36 = vmul.f32 %v5903_v17, %v5903_v17  ;;  %v2012_v59 = vadd.f32 %v1882_v32, %v1881_v18 }
 0x204   : > { %v1886_v32 = vmul.f32 %v5582_v11, %v5582_v11 }
 0x205   : > { %1690 = vadd.xlane.f32.xlu2 %v1689_v31  ;;  %v2009_v29 = vadd.f32 %v2008_v34, %v1880_v3  ;;  %v1693_v31 = vadd.f32 %v1692_v24, %v5903_v17  ;;  %v2013_v3 = vadd.f32 %v2012_v59, %v1883_v36  ;;  %v1885_v36 = vmul.f32 %v5574_v54, %v5574_v54 }
 0x206   : > { %v1515_v28 = vpop.f32.mrf.mxu2  ;;  %v1340_v8 = vpop.f32.mrf.mxu0 }
 0x207   : > { %v1516_v4 = vadd.f32 %v1515_v28, %v5847_v38  ;;  %v1604_v10 = vpop.f32.mrf.mxu3  ;;  %2010 = vadd.xlane.f32.xlu0 %v2009_v29  ;;  %v1341_v58 = vadd.f32 %v1340_v8, %v5835_v16  ;;  %v1429_v35 = vpop.f32.mrf.mxu1 }
 0x209   : > { %v5918_v1 = vadd.f32 %v1604_v10, %v1516_v4  ;;  %1379 = vmatmul.bf16.gmra.mxu0 %v5566_v40  ;;  %v5922_v34 = vadd.f32 %v1429_v35, %v1341_v58  ;;  %v1697_v10 = vadd.f32 %v5582_v11, %v5574_v54 }
 0x20a   : > { %1468 = vmatmul.bf16.gmra.mxu1 %v5569_v45 }
 0x20b   : > { %8297 = vst [vmem:[#allocation86_spill] sm:$0xff] %v5922_v34  ;;  %1557 = vmatmul.bf16.gmra.mxu2 %v5566_v40  ;;  %v1694_v29 = vadd.f32 %v1693_v31, %v5918_v1  ;;  %v1884_v28 = vmul.f32 %v5918_v1, %v5918_v1  ;;  %v1887_v40 = vmul.f32 %v5922_v34, %v5922_v34 }
 0x20c   : > { %1646 = vmatmul.bf16.gmra.mxu3 %v5569_v45  ;;  %v1698_v31 = vadd.f32 %v1697_v10, %v5922_v34  ;;  %v8353_v34 = vld [vmem:[#allocation74_spill] sm:$0xff] }
 0x20d   : > { %1695 = vadd.xlane.f32.xlu2 %v1694_v29  ;;  %v2014_v18 = vadd.f32 %v2013_v3, %v1884_v28  ;;  %v2017_v3 = vadd.f32 %v1886_v32, %v1885_v36  ;;  %v4767_v28 = vld [vmem:[#allocation11 + $0x90] sm:$0xff] }
 0x20e   : > { %v1518_v4 = vpop.f32.mrf.mxu2  ;;  %v1342_v45 = vpop.f32.mrf.mxu0  ;;  %3772 = vmatpush.bf16.msra.mxu2 %v4767_v28  ;;  %v4751_v28 = vld [vmem:[#allocation11 + $0x10] sm:$0xff] }
 0x20f   : > { %v1519_v8 = vadd.f32 %v1518_v4, %v5847_v38  ;;  %v1607_v24 = vpop.f32.mrf.mxu3  ;;  %2015 = vadd.xlane.f32.xlu1 %v2014_v18  ;;  %v1343_v58 = vadd.f32 %v1342_v45, %v5835_v16  ;;  %v1431_v35 = vpop.f32.mrf.mxu1  ;;  %v2018_v4 = vadd.f32 %v2017_v3, %v1887_v40  ;;  %v1890_v18 = vmul.f32 %v5596_v57, %v5596_v57 }
 0x210   : > { %v1702_v40 = vadd.f32 %v5596_v57, %v5584_v12  ;;  %3594 = vmatpush.bf16.msra.mxu0 %v4751_v28 }
 0x211   : > { %v5940_v59 = vadd.f32 %v1607_v24, %v1519_v8  ;;  %v5943_v29 = vadd.f32 %v1431_v35, %v1343_v58  ;;  %v1889_v8 = vmul.f32 %v5584_v12, %v5584_v12 }
 0x213   : > { %8298 = vst [vmem:[#allocation87_spill] sm:$0xff] %v5940_v59  ;;  %v1699_v11 = vadd.f32 %v1698_v31, %v5940_v59  ;;  %v1888_v54 = vmul.f32 %v5940_v59, %v5940_v59  ;;  %v1891_v32 = vmul.f32 %v5943_v29, %v5943_v29  ;;  %v1703_v3 = vadd.f32 %v1702_v40, %v5943_v29 }
 0x214   : > { %8299 = vst [vmem:[#allocation88_spill] sm:$0xff] %v5943_v29 }
 0x215   : > { %1700 = vadd.xlane.f32.xlu2 %v1699_v11  ;;  %v2019_v45 = vadd.f32 %v2018_v4, %v1888_v54  ;;  %v2022_v11 = vadd.f32 %v1890_v18, %v1889_v8  ;;  %v4775_v4 = vld [vmem:[#allocation11 + $0xd0] sm:$0xff] }
 0x216   : > { %v1520_v10 = vpop.f32.mrf.mxu2  ;;  %v1345_v58 = vpop.f32.mrf.mxu0  ;;  %v4759_v8 = vld [vmem:[#allocation11 + $0x50] sm:$0xff]  ;;  %3861 = vmatpush.bf16.msra.mxu3 %v4775_v4 }
 0x217   : > { %v1521_v36 = vadd.f32 %v1520_v10, %v5847_v38  ;;  %v1609_v24 = vpop.f32.mrf.mxu3  ;;  %2020 = vadd.xlane.f32.xlu1 %v2019_v45  ;;  %v1346_v35 = vadd.f32 %v1345_v58, %v5835_v16  ;;  %v1434_v31 = vpop.f32.mrf.mxu1  ;;  %v2023_v59 = vadd.f32 %v2022_v11, %v1891_v32  ;;  %3683 = vmatpush.bf16.msra.mxu1 %v4759_v8 }
 0x218   : > { %v1707_v58 = vadd.f32 %v5606_v6, %v5598_v60 }
 0x219   : > { %v5958_v54 = vadd.f32 %v1609_v24, %v1521_v36  ;;  %1384 = vmatmul.bf16.gmra.mxu0 %v5590_v41  ;;  %v5962_v10 = vadd.f32 %v1434_v31, %v1346_v35  ;;  %v1894_v36 = vmul.f32 %v5606_v6, %v5606_v6 }
 0x21a   : > { %1473 = vmatmul.bf16.gmra.mxu1 %v5593_v48 }
 0x21b   : > { %8300 = vst [vmem:[#allocation89_spill] sm:$0xff] %v5958_v54  ;;  %1562 = vmatmul.bf16.gmra.mxu2 %v5590_v41  ;;  %v1704_v45 = vadd.f32 %v1703_v3, %v5958_v54  ;;  %v1892_v18 = vmul.f32 %v5958_v54, %v5958_v54  ;;  %v1893_v41 = vmul.f32 %v5598_v60, %v5598_v60 }
 0x21c   : > { %8301 = vst [vmem:[#allocation90_spill] sm:$0xff] %v5962_v10  ;;  %1651 = vmatmul.bf16.gmra.mxu3 %v5593_v48  ;;  %v1895_v40 = vmul.f32 %v5962_v10, %v5962_v10  ;;  %v1708_v28 = vadd.f32 %v1707_v58, %v5962_v10  ;;  %v6173_v10 = vadd.f32 %v5724_v19, %v5720_v61 }
 0x21d   : > { %1705 = vadd.xlane.f32.xlu0 %v1704_v45  ;;  %v2024_v32 = vadd.f32 %v2023_v59, %v1892_v18  ;;  %v2027_v4 = vadd.f32 %v1894_v36, %v1893_v41 }
 0x21e   : > { %v1523_v24 = vpop.f32.mrf.mxu2  ;;  %v1347_v31 = vpop.f32.mrf.mxu0 }
 0x21f   : > { %v1524_v48 = vadd.f32 %v1523_v24, %v5847_v38  ;;  %v1612_v35 = vpop.f32.mrf.mxu3  ;;  %2025 = vadd.xlane.f32.xlu2 %v2024_v32  ;;  %v1348_v11 = vadd.f32 %v1347_v31, %v5835_v16  ;;  %v1436_v59 = vpop.f32.mrf.mxu1  ;;  %v2028_v6 = vadd.f32 %v2027_v4, %v1895_v40  ;;  %v1898_v32 = vmul.f32 %v5620_v44, %v5620_v44 }
 0x220   : > { %v1712_v40 = vadd.f32 %v5620_v44, %v5608_v7 }
 0x221   : > { %v5980_v3 = vadd.f32 %v1612_v35, %v1524_v48  ;;  %v5983_v45 = vadd.f32 %v1436_v59, %v1348_v11  ;;  %v1897_v48 = vmul.f32 %v5608_v7, %v5608_v7 }
 0x223   : > { %8302 = vst [vmem:[#allocation91_spill] sm:$0xff] %v5980_v3  ;;  %v1709_v18 = vadd.f32 %v1708_v28, %v5980_v3  ;;  %v1896_v8 = vmul.f32 %v5980_v3, %v5980_v3  ;;  %v1899_v36 = vmul.f32 %v5983_v45, %v5983_v45  ;;  %v2032_v28 = vadd.f32 %v1898_v32, %v1897_v48  ;;  %v4766_v3 = vld [vmem:[#allocation11 + $0x88] sm:$0xff] }
 0x224   : > { %8303 = vst [vmem:[#allocation92_spill] sm:$0xff] %v5983_v45  ;;  %v1713_v4 = vadd.f32 %v1712_v40, %v5983_v45  ;;  %v1902_v32 = vmul.f32 %v5630_v23, %v5630_v23  ;;  %3773 = vmatpush.bf16.msra.mxu2 %v4766_v3 }
 0x225   : > { %1710 = vadd.xlane.f32.xlu0 %v1709_v18  ;;  %v2029_v24 = vadd.f32 %v2028_v6, %v1896_v8  ;;  %v2033_v18 = vadd.f32 %v2032_v28, %v1899_v36  ;;  %v8307_v36 = vld [vmem:[#allocation31_spill] sm:$0xff] }
 0x226   : > { %v1525_v35 = vpop.f32.mrf.mxu2  ;;  %v1350_v31 = vpop.f32.mrf.mxu0  ;;  %v1717_v40 = vadd.f32 %v5630_v23, %v8307_v36 }
 0x227   : > { %v1526_v41 = vadd.f32 %v1525_v35, %v5847_v38  ;;  %v1614_v58 = vpop.f32.mrf.mxu3  ;;  %2030 = vadd.xlane.f32.xlu2 %v2029_v24  ;;  %v1351_v11 = vadd.f32 %v1350_v31, %v5835_v16  ;;  %v1439_v59 = vpop.f32.mrf.mxu1  ;;  %v8306_v35 = vld [vmem:[#allocation29_spill] sm:$0xff] }
 0x229   : > { %v5998_v6 = vadd.f32 %v1614_v58, %v1526_v41  ;;  %1389 = vmatmul.bf16.gmra.mxu0 %v5614_v25  ;;  %v6002_v8 = vadd.f32 %v1439_v59, %v1351_v11  ;;  %v1901_v58 = vmul.f32 %v8307_v36, %v8307_v36 }
 0x22a   : > { %1478 = vmatmul.bf16.gmra.mxu1 %v8306_v35 }
 0x22b   : > { %8304 = vst [vmem:[#allocation93_spill] sm:$0xff] %v5998_v6  ;;  %1567 = vmatmul.bf16.gmra.mxu2 %v5614_v25  ;;  %v1714_v24 = vadd.f32 %v1713_v4, %v5998_v6  ;;  %v1900_v31 = vmul.f32 %v5998_v6, %v5998_v6  ;;  %v1903_v25 = vmul.f32 %v6002_v8, %v6002_v8 }
 0x22c   : > { %8305 = vst [vmem:[#allocation94_spill] sm:$0xff] %v6002_v8  ;;  %1656 = vmatmul.bf16.gmra.mxu3 %v8306_v35 }
 0x22d   : > { %1715 = vadd.xlane.f32.xlu1 %v1714_v24  ;;  %v2034_v48 = vadd.f32 %v2033_v18, %v1900_v31  ;;  %v1718_v18 = vadd.f32 %v1717_v40, %v6002_v8  ;;  %v2037_v31 = vadd.f32 %v1902_v32, %v1901_v58  ;;  %v8312_v8 = vld [vmem:[#allocation34_spill] sm:$0xff] }
 0x22e   : > { %v1528_v41 = vpop.f32.mrf.mxu2  ;;  %v1352_v28 = vpop.f32.mrf.mxu0 }
 0x22f   : > { %v1529_v11 = vadd.f32 %v1528_v41, %v5847_v38  ;;  %v1617_v59 = vpop.f32.mrf.mxu3  ;;  %2035 = vadd.xlane.f32.xlu0 %v2034_v48  ;;  %v1353_v4 = vadd.f32 %v1352_v28, %v5835_v16  ;;  %v1441_v35 = vpop.f32.mrf.mxu1  ;;  %v2038_v41 = vadd.f32 %v2037_v31, %v1903_v25  ;;  %v1906_v48 = vmul.f32 %v5644_v42, %v5644_v42 }
 0x231   : > { %v6020_v24 = vadd.f32 %v1617_v59, %v1529_v11  ;;  %v6023_v6 = vadd.f32 %v1441_v35, %v1353_v4  ;;  %v8310_v11 = vld [vmem:[#allocation33_spill] sm:$0xff] }
 0x232   : > { %v1905_v59 = vmul.f32 %v8310_v11, %v8310_v11  ;;  %v1722_v25 = vadd.f32 %v5644_v42, %v8310_v11 }
 0x233   : > { %8308 = vst [vmem:[#allocation29_spill] sm:$0xff] %v6020_v24  ;;  %v1719_v23 = vadd.f32 %v1718_v18, %v6020_v24  ;;  %v1904_v36 = vmul.f32 %v6020_v24, %v6020_v24  ;;  %v1907_v32 = vmul.f32 %v6023_v6, %v6023_v6  ;;  %v4774_v24 = vld [vmem:[#allocation11 + $0xc8] sm:$0xff] }
 0x234   : > { %8309 = vst [vmem:[#allocation95_spill] sm:$0xff] %v6023_v6  ;;  %v1723_v31 = vadd.f32 %v1722_v25, %v6023_v6  ;;  %3862 = vmatpush.bf16.msra.mxu3 %v4774_v24  ;;  %v8316_v25 = vld [vmem:[#allocation37_spill] sm:$0xff] }
 0x235   : > { %1720 = vadd.xlane.f32.xlu1 %v1719_v23  ;;  %v2039_v28 = vadd.f32 %v2038_v41, %v1904_v36  ;;  %v2042_v23 = vadd.f32 %v1906_v48, %v1905_v59  ;;  %v4750_v41 = vld [vmem:[#allocation11 + $0x8] sm:$0xff] }
 0x236   : > { %v1530_v40 = vpop.f32.mrf.mxu2  ;;  %v1355_v35 = vpop.f32.mrf.mxu0  ;;  %3595 = vmatpush.bf16.msra.mxu0 %v4750_v41  ;;  %v4758_v59 = vld [vmem:[#allocation11 + $0x48] sm:$0xff] }
 0x237   : > { %v1531_v58 = vadd.f32 %v1530_v40, %v5847_v38  ;;  %v1619_v4 = vpop.f32.mrf.mxu3  ;;  %2040 = vadd.xlane.f32.xlu0 %v2039_v28  ;;  %v1356_v18 = vadd.f32 %v1355_v35, %v5835_v16  ;;  %v1444_v3 = vpop.f32.mrf.mxu1  ;;  %v2043_v45 = vadd.f32 %v2042_v23, %v1907_v32  ;;  %v8314_v28 = vld [vmem:[#allocation35_spill] sm:$0xff]  ;;  %3684 = vmatpush.bf16.msra.mxu1 %v4758_v59 }
 0x239   : > { %v6038_v36 = vadd.f32 %v1619_v4, %v1531_v58  ;;  %1394 = vmatmul.bf16.gmra.mxu0 %v8312_v8  ;;  %v6042_v40 = vadd.f32 %v1444_v3, %v1356_v18  ;;  %v8315_v58 = vld [vmem:[#allocation38_spill] sm:$0xff] }
 0x23a   : > { %1483 = vmatmul.bf16.gmra.mxu1 %v8314_v28  ;;  %v1910_v4 = vmul.f32 %v8315_v58, %v8315_v58  ;;  %v1727_v18 = vadd.f32 %v8315_v58, %v8316_v25 }
 0x23b   : > { %8311 = vst [vmem:[#allocation96_spill] sm:$0xff] %v6038_v36  ;;  %1572 = vmatmul.bf16.gmra.mxu2 %v8312_v8  ;;  %v1724_v42 = vadd.f32 %v1723_v31, %v6038_v36  ;;  %v1908_v48 = vmul.f32 %v6038_v36, %v6038_v36  ;;  %v1909_v8 = vmul.f32 %v8316_v25, %v8316_v25 }
 0x23c   : > { %8313 = vst [vmem:[#allocation34_spill] sm:$0xff] %v6042_v40  ;;  %1661 = vmatmul.bf16.gmra.mxu3 %v8314_v28  ;;  %v1911_v3 = vmul.f32 %v6042_v40, %v6042_v40  ;;  %v1728_v28 = vadd.f32 %v1727_v18, %v6042_v40 }
 0x23d   : > { %1725 = vadd.xlane.f32.xlu2 %v1724_v42  ;;  %v2044_v32 = vadd.f32 %v2043_v45, %v1908_v48  ;;  %v2047_v48 = vadd.f32 %v1910_v4, %v1909_v8 }
 0x23e   : > { %v1533_v35 = vpop.f32.mrf.mxu2  ;;  %v1357_v41 = vpop.f32.mrf.mxu0 }
 0x23f   : > { %v1534_v23 = vadd.f32 %v1533_v35, %v5847_v38  ;;  %v1622_v31 = vpop.f32.mrf.mxu3  ;;  %2045 = vadd.xlane.f32.xlu1 %v2044_v32  ;;  %v1358_v42 = vadd.f32 %v1357_v41, %v5835_v16  ;;  %v1446_v45 = vpop.f32.mrf.mxu1  ;;  %v2048_v36 = vadd.f32 %v2047_v48, %v1911_v3  ;;  %v8319_v35 = vld [vmem:[#allocation42_spill] sm:$0xff]  ;;  %v8320_v41 = vld [vmem:[#allocation39_spill] sm:$0xff]  ;;  %v8322_v48 = vld [vmem:[#allocation40_spill] sm:$0xff] }
 0x240   : > { %v1914_v32 = vmul.f32 %v8319_v35, %v8319_v35  ;;  %v1732_v3 = vadd.f32 %v8319_v35, %v8320_v41 }
 0x241   : > { %v6060_v24 = vadd.f32 %v1622_v31, %v1534_v23  ;;  %v6063_v59 = vadd.f32 %v1446_v45, %v1358_v42  ;;  %v1913_v23 = vmul.f32 %v8320_v41, %v8320_v41 }
 0x243   : > { %8317 = vst [vmem:[#allocation35_spill] sm:$0xff] %v6060_v24  ;;  %v1729_v58 = vadd.f32 %v1728_v28, %v6060_v24  ;;  %v1912_v25 = vmul.f32 %v6060_v24, %v6060_v24  ;;  %v1915_v4 = vmul.f32 %v6063_v59, %v6063_v59 }
 0x244   : > { %8318 = vst [vmem:[#allocation97_spill] sm:$0xff] %v6063_v59 }
 0x245   : > { %1730 = vadd.xlane.f32.xlu2 %v1729_v58  ;;  %v2049_v6 = vadd.f32 %v2048_v36, %v1912_v25  ;;  %v2052_v58 = vadd.f32 %v1914_v32, %v1913_v23  ;;  %v1733_v25 = vadd.f32 %v1732_v3, %v6063_v59  ;;  %v1918_v32 = vmul.f32 %v5678_v15, %v5678_v15 }
 0x246   : > { %v1535_v31 = vpop.f32.mrf.mxu2  ;;  %v1360_v42 = vpop.f32.mrf.mxu0 }
 0x247   : > { %v1536_v8 = vadd.f32 %v1535_v31, %v5847_v38  ;;  %v1624_v18 = vpop.f32.mrf.mxu3  ;;  %2050 = vadd.xlane.f32.xlu1 %v2049_v6  ;;  %v1361_v45 = vadd.f32 %v1360_v42, %v5835_v16  ;;  %v1449_v28 = vpop.f32.mrf.mxu1  ;;  %v2053_v24 = vadd.f32 %v2052_v58, %v1915_v4  ;;  %v8324_v31 = vld [vmem:[#allocation41_spill] sm:$0xff]  ;;  %v8325_v4 = vld [vmem:[#allocation43_spill] sm:$0xff] }
 0x248   : > { %v1737_v3 = vadd.f32 %v5678_v15, %v8325_v4 }
 0x249   : > { %v6078_v36 = vadd.f32 %v1624_v18, %v1536_v8  ;;  %1399 = vmatmul.bf16.gmra.mxu0 %v8322_v48  ;;  %v6082_v40 = vadd.f32 %v1449_v28, %v1361_v45  ;;  %v1917_v18 = vmul.f32 %v8325_v4, %v8325_v4 }
 0x24a   : > { %1488 = vmatmul.bf16.gmra.mxu1 %v8324_v31 }
 0x24b   : > { %8321 = vst [vmem:[#allocation98_spill] sm:$0xff] %v6078_v36  ;;  %1577 = vmatmul.bf16.gmra.mxu2 %v8322_v48  ;;  %v1734_v6 = vadd.f32 %v1733_v25, %v6078_v36  ;;  %v1916_v42 = vmul.f32 %v6078_v36, %v6078_v36  ;;  %v1919_v45 = vmul.f32 %v6082_v40, %v6082_v40 }
 0x24c   : > { %8323 = vst [vmem:[#allocation40_spill] sm:$0xff] %v6082_v40  ;;  %1666 = vmatmul.bf16.gmra.mxu3 %v8324_v31 }
 0x24d   : > { %1735 = vadd.xlane.f32.xlu0 %v1734_v6  ;;  %v2054_v23 = vadd.f32 %v2053_v24, %v1916_v42  ;;  %v1738_v24 = vadd.f32 %v1737_v3, %v6082_v40  ;;  %v2057_v42 = vadd.f32 %v1918_v32, %v1917_v18  ;;  %v8335_v40 = vld [vmem:[#allocation53_spill] sm:$0xff] }
 0x24e   : > { %v1538_v8 = vpop.f32.mrf.mxu2  ;;  %v1362_v25 = vpop.f32.mrf.mxu0 }
 0x24f   : > { %v1539_v28 = vadd.f32 %v1538_v8, %v5847_v38  ;;  %v1627_v58 = vpop.f32.mrf.mxu3  ;;  %2055 = vadd.xlane.f32.xlu2 %v2054_v23  ;;  %v1363_v48 = vadd.f32 %v1362_v25, %v5835_v16  ;;  %v1451_v31 = vpop.f32.mrf.mxu1  ;;  %v2058_v59 = vadd.f32 %v2057_v42, %v1919_v45  ;;  %v1922_v23 = vmul.f32 %v5692_v0, %v5692_v0  ;;  %v8329_v42 = vld [vmem:[#allocation46_spill] sm:$0xff] }
 0x250   : > { %v1742_v45 = vadd.f32 %v5692_v0, %v5680_v20  ;;  %v1933_v0 = vmul.f32 %v8335_v40, %v8335_v40 }
 0x251   : > { %v6100_v6 = vadd.f32 %v1627_v58, %v1539_v28  ;;  %v6103_v36 = vadd.f32 %v1451_v31, %v1363_v48  ;;  %v1921_v28 = vmul.f32 %v5680_v20, %v5680_v20 }
 0x253   : > { %8326 = vst [vmem:[#allocation41_spill] sm:$0xff] %v6100_v6  ;;  %v1739_v15 = vadd.f32 %v1738_v24, %v6100_v6  ;;  %v1920_v4 = vmul.f32 %v6100_v6, %v6100_v6  ;;  %v1923_v32 = vmul.f32 %v6103_v36, %v6103_v36  ;;  %v1926_v24 = vmul.f32 %v5702_v62, %v5702_v62 }
 0x254   : > { %8327 = vst [vmem:[#allocation99_spill] sm:$0xff] %v6103_v36 }
 0x255   : > { %1740 = vadd.xlane.f32.xlu0 %v1739_v15  ;;  %v2059_v8 = vadd.f32 %v2058_v59, %v1920_v4  ;;  %v2062_v15 = vadd.f32 %v1922_v23, %v1921_v28  ;;  %v1743_v4 = vadd.f32 %v1742_v45, %v6103_v36  ;;  %v8332_v28 = vld [vmem:[#allocation49_spill] sm:$0xff] }
 0x256   : > { %v1540_v58 = vpop.f32.mrf.mxu2  ;;  %v1365_v25 = vpop.f32.mrf.mxu0 }
 0x257   : > { %v1541_v18 = vadd.f32 %v1540_v58, %v5847_v38  ;;  %v1629_v3 = vpop.f32.mrf.mxu3  ;;  %2060 = vadd.xlane.f32.xlu2 %v2059_v8  ;;  %v1366_v48 = vadd.f32 %v1365_v25, %v5835_v16  ;;  %v1454_v31 = vpop.f32.mrf.mxu1  ;;  %v2063_v58 = vadd.f32 %v2062_v15, %v1923_v32  ;;  %v8331_v8 = vld [vmem:[#allocation47_spill] sm:$0xff]  ;;  %v1934_v32 = vmul.f32 %v5718_v46, %v5718_v46 }
 0x258   : > { %v8334_v15 = vld [vmem:[#allocation51_spill] sm:$0xff] }
 0x259   : > { %v6118_v59 = vadd.f32 %v1629_v3, %v1541_v18  ;;  %1404 = vmatmul.bf16.gmra.mxu0 %v8329_v42  ;;  %v6124_v6 = vadd.f32 %v1454_v31, %v1366_v48  ;;  %v1925_v18 = vmul.f32 %v8332_v28, %v8332_v28  ;;  %v8333_v3 = vld [vmem:[#allocation52_spill] sm:$0xff]  ;;  %v1747_v31 = vadd.f32 %v5702_v62, %v8332_v28 }
 0x25a   : > { %1493 = vmatmul.bf16.gmra.mxu1 %v8331_v8  ;;  %v1930_v45 = vmul.f32 %v8333_v3, %v8333_v3  ;;  %v1752_v62 = vadd.f32 %v8333_v3, %v8334_v15  ;;  %v6153_v28 = vadd.f32 %v5718_v46, %v8335_v40  ;;  %v6165_v3 = vadd.f32 %v1934_v32, %v1933_v0  ;;  %v8338_v40 = vld [vmem:[#allocation60_spill] sm:$0xff] }
 0x25b   : > { %8328 = vst [vmem:[#allocation100_spill] sm:$0xff] %v6118_v59  ;;  %1582 = vmatmul.bf16.gmra.mxu2 %v8329_v42  ;;  %v1744_v25 = vadd.f32 %v1743_v4, %v6118_v59  ;;  %v1924_v23 = vmul.f32 %v6118_v59, %v6118_v59  ;;  %v1929_v4 = vmul.f32 %v8334_v15, %v8334_v15  ;;  %v8337_v15 = vld [vmem:[#allocation57_spill] sm:$0xff] }
 0x25c   : > { %8330 = vst [vmem:[#allocation46_spill] sm:$0xff] %v6124_v6  ;;  %1671 = vmatmul.bf16.gmra.mxu3 %v8331_v8  ;;  %v1938_v42 = vmul.f32 %v5724_v19, %v5724_v19  ;;  %v2067_v36 = vadd.f32 %v1926_v24, %v1925_v18  ;;  %v1927_v8 = vmul.f32 %v6124_v6, %v6124_v6  ;;  %v8340_v19 = vld [vmem:[#allocation61_spill] sm:$0xff] }
 0x25d   : > { %1745 = vadd.xlane.f32.xlu1 %v1744_v25  ;;  %v2064_v48 = vadd.f32 %v2063_v58, %v1924_v23  ;;  %v1937_v24 = vmul.f32 %v5720_v61, %v5720_v61  ;;  %v1942_v18 = vmul.f32 %v5734_v5, %v5734_v5  ;;  %v6159_v35 = vadd.f32 %v1930_v45, %v1929_v4 }
 0x25e   : > { %v1543_v59 = vpop.f32.mrf.mxu2  ;;  %v1367_v23 = vpop.f32.mrf.mxu0  ;;  %v1748_v41 = vadd.f32 %v1747_v31, %v6124_v6  ;;  %v1941_v46 = vmul.f32 %v8337_v15, %v8337_v15  ;;  %v1946_v11 = vmul.f32 %v8338_v40, %v8338_v40  ;;  %v1950_v4 = vmul.f32 %v5750_v2, %v5750_v2 }
 0x25f   : > { %v1544_v25 = vadd.f32 %v1543_v59, %v5847_v38  ;;  %v1632_v58 = vpop.f32.mrf.mxu3  ;;  %2065 = vadd.xlane.f32.xlu0 %v2064_v48  ;;  %v1456_v20 = vpop.f32.mrf.mxu1  ;;  %v1368_v48 = vadd.f32 %v1367_v23, %v5835_v16  ;;  %v6175_v45 = vadd.f32 %v1938_v42, %v1937_v24  ;;  %v2068_v32 = vadd.f32 %v2067_v36, %v1927_v8 }
 0x260   : > { %v6184_v31 = vadd.f32 %v5734_v5, %v8337_v15  ;;  %v1954_v42 = vmul.f32 %v5756_v63, %v5756_v63  ;;  %v6190_v24 = vadd.f32 %v1942_v18, %v1941_v46  ;;  %v1949_v61 = vmul.f32 %v8340_v19, %v8340_v19 }
 0x261   : > { %v6161_v59 = vadd.f32 %v1632_v58, %v1544_v25  ;;  %v8339_v58 = vld [vmem:[#allocation59_spill] sm:$0xff]  ;;  %v6202_v8 = vadd.f32 %v5750_v2, %v8340_v19  ;;  %v1953_v5 = vmul.f32 %v5752_v47, %v5752_v47  ;;  %v1958_v46 = vmul.f32 %v5766_v55, %v5766_v55 }
 0x262   : > { %v1945_v23 = vmul.f32 %v8339_v58, %v8339_v58  ;;  %v6198_v36 = vadd.f32 %v8338_v40, %v8339_v58  ;;  %v6213_v40 = vadd.f32 %v1950_v4, %v1949_v61  ;;  %v6217_v2 = vadd.f32 %v5756_v63, %v5752_v47 }
 0x263   : > { %8336 = vst [vmem:[#allocation47_spill] sm:$0xff] %v6161_v59  ;;  %v1749_v25 = vadd.f32 %v1748_v41, %v6161_v59  ;;  %v1928_v0 = vmul.f32 %v6161_v59, %v6161_v59  ;;  %v6194_v41 = vadd.f32 %v1456_v20, %v1368_v48  ;;  %v8342_v20 = vld [vmem:[#allocation65_spill] sm:$0xff]  ;;  %v6226_v44 = vadd.f32 %v1954_v42, %v1953_v5 }
 0x264   : > { %v6208_v15 = vadd.f32 %v1946_v11, %v1945_v23  ;;  %v1957_v48 = vmul.f32 %v8342_v20, %v8342_v20  ;;  %v6221_v19 = vadd.f32 %v5766_v55, %v8342_v20  ;;  %v8343_v11 = vld [vmem:[#allocation68_spill] sm:$0xff]  ;;  %v8346_v20 = vld [vmem:[#allocation69_spill] sm:$0xff] }
 0x265   : > { %8341 = vst [vmem:[#allocation101_spill] sm:$0xff] %v6194_v41  ;;  %1750 = vadd.xlane.f32.xlu1 %v1749_v25  ;;  %v2069_v59 = vadd.f32 %v2068_v32, %v1928_v0  ;;  %v1962_v23 = vmul.f32 %v8343_v11, %v8343_v11  ;;  %v1931_v55 = vmul.f32 %v6194_v41, %v6194_v41 }
 0x266   : > { %v1545_v18 = vpop.f32.mrf.mxu2  ;;  %v1370_v32 = vpop.f32.mrf.mxu0  ;;  %v1965_v47 = vmul.f32 %v8346_v20, %v8346_v20  ;;  %v1753_v5 = vadd.f32 %v1752_v62, %v6194_v41  ;;  %v6243_v42 = vadd.f32 %v1958_v46, %v1957_v48  ;;  %v4765_v46 = vld [vmem:[#allocation11 + $0x80] sm:$0xff] }
 0x267   : > { %v1546_v25 = vadd.f32 %v1545_v18, %v5847_v38  ;;  %v1634_v0 = vpop.f32.mrf.mxu3  ;;  %2070 = vadd.xlane.f32.xlu0 %v2069_v59  ;;  %v1371_v58 = vadd.f32 %v1370_v32, %v5835_v16  ;;  %v1459_v6 = vpop.f32.mrf.mxu1  ;;  %v8344_v59 = vld [vmem:[#allocation67_spill] sm:$0xff]  ;;  %v6240_v32 = vadd.f32 %v5782_v26, %v8346_v20  ;;  %3774 = vmatpush.bf16.msra.mxu2 %v4765_v46 }
 0x268   : > { %v1681_v18 = vpop.xlane.xlu0 %1680  ;;  %v1961_v61 = vmul.f32 %v8344_v59, %v8344_v59  ;;  %8348 = vst [vmem:[#allocation104_spill] sm:$0xff] %v6243_v42  ;;  %v6253_v60 = vadd.f32 %v8343_v11, %v8344_v59  ;;  %v4749_v48 = vld [vmem:[#allocation11] sm:$0xff] }
 0x269   : > { %v6230_v4 = vadd.f32 %v1634_v0, %v1546_v25  ;;  %v6232_v63 = vmul.f32 0.001953125, %v1681_v18  ;;  %8347 = vst [vmem:[#allocation103_spill] sm:$0xff] %v6240_v32  ;;  %v1966_v25 = vmul.f32 %v5782_v26, %v5782_v26  ;;  %v1969_v0 = vmul.f32 %v5784_v9, %v5784_v9  ;;  %v4773_v41 = vld [vmem:[#allocation11 + $0xc0] sm:$0xff]  ;;  %3596 = vmatpush.bf16.msra.mxu0 %v4749_v48 }
 0x26a   : > { %v2001_v7 = vpop.xlane.xlu1 %2000  ;;  %v6249_v18 = vadd.f32 %v1459_v6, %v1371_v58  ;;  %8350 = vst [vmem:[#allocation106_spill] sm:$0xff] %v6253_v60  ;;  %v6258_v29 = vadd.f32 %v1962_v23, %v1961_v61  ;;  %v1970_v26 = vmul.f32 %v5788_v37, %v5788_v37  ;;  %v8352_v6 = vld [vmem:[#allocation73_spill] sm:$0xff]  ;;  %v4757_v59 = vld [vmem:[#allocation11 + $0x40] sm:$0xff]  ;;  %v1974_v23 = vmul.f32 %v8353_v34, %v8353_v34 }
 0x26b   : > { %8345 = vst [vmem:[#allocation102_spill] sm:$0xff] %v6230_v4  ;;  %v2157_v54 = vmul.f32 0.001953125, %v2001_v7  ;;  %v2189_v20 = vmul.f32 %v6232_v63, %v6232_v63  ;;  %v1754_v62 = vadd.f32 %v1753_v5, %v6230_v4  ;;  %v1973_v58 = vmul.f32 %v8352_v6, %v8352_v6  ;;  %3863 = vmatpush.bf16.msra.mxu3 %v4773_v41  ;;  %v8358_v60 = vld [vmem:[#allocation77_spill] sm:$0xff] }
 0x26c   : > { %8349 = vst [vmem:[#allocation105_spill] sm:$0xff] %v6249_v18  ;;  %v1932_v11 = vmul.f32 %v6230_v4, %v6230_v4  ;;  %v2073_v7 = vadd.f32 %v6159_v35, %v1931_v55  ;;  %v6269_v5 = vadd.f32 %v8353_v34, %v8352_v6  ;;  %v1935_v12 = vmul.f32 %v6249_v18, %v6249_v18  ;;  %v8355_v35 = vld [vmem:[#allocation75_spill] sm:$0xff]  ;;  %v8357_v34 = vld [vmem:[#allocation76_spill] sm:$0xff] }
 0x26d   : > { %8351 = vst [vmem:[#allocation107_spill] sm:$0xff] %v6258_v29  ;;  %v2221_v61 = vsub.f32 %v2157_v54, %v2189_v20  ;;  %1755 = vadd.xlane.f32.xlu2 %v1754_v62  ;;  %v1977_v6 = vmul.f32 %v8355_v35, %v8355_v35  ;;  %3685 = vmatpush.bf16.msra.mxu1 %v4757_v59 }
 0x26e   : > { %8354 = vst [vmem:[#allocation108_spill] sm:$0xff] %v6269_v5  ;;  %v1548_v57 = vpop.f32.mrf.mxu2  ;;  %v2074_v29 = vadd.f32 %v2073_v7, %v1932_v11  ;;  %v1372_v55 = vpop.f32.mrf.mxu0  ;;  %v6281_v46 = vadd.f32 %v1966_v25, %v1965_v47  ;;  %v1981_v11 = vmul.f32 %v8358_v60, %v8358_v60  ;;  %v6296_v47 = vadd.f32 %v5788_v37, %v5784_v9  ;;  %v8366_v37 = vld [vmem:[#allocation83_spill] sm:$0xff] }
 0x26f   : > { %v1549_v32 = vadd.f32 %v1548_v57, %v5847_v38  ;;  %v1637_v4 = vpop.f32.mrf.mxu3  ;;  %v6278_v5 = vadd.f32 1e-05, %v2221_v61  ;;  %v1373_v54 = vadd.f32 %v1372_v55, %v5835_v16  ;;  %v1461_v20 = vpop.f32.mrf.mxu1  ;;  %v1978_v57 = vmul.f32 %v8357_v34, %v8357_v34 }
 0x270   : > { %v1686_v62 = vpop.xlane.xlu0 %1685  ;;  %8356 = vst [vmem:[#allocation109_spill] sm:$0xff] %v6281_v46  ;;  %2075 = vadd.xlane.f32.xlu1 %v2074_v29  ;;  %v1758_v61 = vadd.f32 %v6153_v28, %v6249_v18  ;;  %v6298_v59 = vadd.f32 %v1970_v26, %v1969_v0  ;;  %v6302_v25 = vadd.f32 %v5814_v52, %v8358_v60  ;;  %v6341_v18 = vld [vmem:[#allocation8] sm:$0xf] }
 0x271   : > { %v6287_v48 = vadd.f32 %v1637_v4, %v1549_v32  ;;  %v6289_v41 = vmul.f32 0.001953125, %v1686_v62  ;;  %4888 = vrsqrt.f32 %v6278_v5  ;;  %8360 = vst [vmem:[#allocation111_spill] sm:$0xff] %v6296_v47  ;;  %v1982_v29 = vmul.f32 %v5814_v52, %v5814_v52 }
 0x272   : > { %v2006_v7 = vpop.xlane.xlu1 %2005  ;;  %8361 = vst [vmem:[#allocation112_spill] sm:$0xff] %v6298_v59  ;;  %v6306_v4 = vadd.f32 %v1461_v20, %v1373_v54  ;;  %v2078_v32 = vadd.f32 %v6165_v3, %v1935_v12  ;;  %v6316_v0 = vmul.f32 %v5816_v33, %v5816_v33  ;;  %v6320_v52 = vmul.f32 %v5820_v22, %v5820_v22 }
 0x273   : > { %8359 = vst [vmem:[#allocation110_spill] sm:$0xff] %v6287_v48  ;;  %v2158_v55 = vmul.f32 0.001953125, %v2006_v7  ;;  %v2190_v28 = vmul.f32 %v6289_v41, %v6289_v41  ;;  %v1759_v62 = vadd.f32 %v1758_v61, %v6287_v48  ;;  %v1936_v26 = vmul.f32 %v6287_v48, %v6287_v48 }
 0x274   : > { %8362 = vst [vmem:[#allocation113_spill] sm:$0xff] %v6302_v25  ;;  %v6324_v12 = vmul.f32 %v5822_v27, %v5822_v27  ;;  %v6326_v3 = vadd.f32 %v1974_v23, %v1973_v58  ;;  %v6330_v54 = vadd.f32 %v5830_v56, %v5822_v27  ;;  %v6334_v20 = vmul.f32 %v5830_v56, %v5830_v56 }
 0x275   : > { %8363 = vst [vmem:[#allocation114_spill] sm:$0xff] %v6306_v4  ;;  %v2222_v7 = vsub.f32 %v2158_v55, %v2190_v28  ;;  %1760 = vadd.xlane.f32.xlu2 %v1759_v62  ;;  %v2079_v60 = vadd.f32 %v2078_v32, %v1936_v26  ;;  %v6338_v9 = vmul.f32 %v8366_v37, %v8366_v37  ;;  %v8370_v28 = vld [vmem:[#allocation84_spill] sm:$0xff]  ;;  %vm2419_vm1 = vweird.f32 %v6278_v5 }
 0x276   : > { %8364 = vst [vmem:[#allocation115_spill] sm:$0xff] %v6326_v3  ;;  %v1550_v61 = vpop.f32.mrf.mxu2  ;;  %v1375_v23 = vpop.f32.mrf.mxu0  ;;  %v6345_v27 = vadd.f32 %v8357_v34, %v8355_v35  ;;  %v6347_v56 = vadd.f32 %v1978_v57, %v1977_v6  ;;  %v6351_v32 = vmul.f32 %v8370_v28, %v8370_v28  ;;  %v1939_v25 = vmul.f32 %v6306_v4, %v6306_v4  ;;  %v6365_v35 = vld [vmem:[#allocation10] sm:$0xf] }
 0x277   : > { %8365 = vst [vmem:[#allocation116_spill] sm:$0xff] %v6330_v54  ;;  %v1551_v48 = vadd.f32 %v1550_v61, %v5847_v38  ;;  %v1639_v58 = vpop.f32.mrf.mxu3  ;;  %v4889_v55 = vpop.eup %4888  ;;  %v6353_v62 = vadd.f32 1e-05, %v2222_v7  ;;  %v1376_v26 = vadd.f32 %v1375_v23, %v5835_v16  ;;  %v1763_v57 = vadd.f32 %v6173_v10, %v6306_v4 }
 0x278   : > { %8367 = vst [vmem:[#allocation117_spill] sm:$0xff] %v6338_v9  ;;  %v1464_v61 = vpop.f32.mrf.mxu1  ;;  %v1691_v54 = vpop.xlane.xlu2 %1690  ;;  %v2414_v3 = vmul.f32 %v4889_v55, %v6278_v5  ;;  %2080 = vadd.xlane.f32.xlu1 %v2079_v60  ;;  %v6369_v23 = vperm.slane %v6341_v18, 0  ;;  %vm2420_vm0 = vweird.f32 %v4889_v55  ;;  %v8378_v9 = vld [vmem:[#allocation85_spill] sm:$0xff]  ;;  %v2259_v37 = vsub.f32 %v5863_v39, %v6289_v41 }
 0x279   : > { %8368 = vst [vmem:[#allocation118_spill] sm:$0xff] %v6345_v27  ;;  %v6359_v34 = vadd.f32 %v1639_v58, %v1551_v48  ;;  %v6361_v6 = vmul.f32 0.001953125, %v1691_v54  ;;  %4890 = vrsqrt.f32 %v6353_v62  ;;  %v6375_v48 = vadd.f32 %v5820_v22, %v5816_v33  ;;  %vm2421_vm2 = vmor %vm2419_vm1, %vm2420_vm0 }
 0x27a   : > { %8369 = vst [vmem:[#allocation119_spill] sm:$0xff] %v6347_v56  ;;  %v2011_v7 = vpop.xlane.xlu0 %2010  ;;  %v6371_v56 = vadd.f32 %v1982_v29, %v1981_v11  ;;  %v2415_v60 = vmul.f32 %v4889_v55, %v2414_v3  ;;  %v6380_v4 = vadd.f32 %v1464_v61, %v1376_v26  ;;  %v6386_v11 = vperm.slane %v6365_v35, 0  ;;  %v8376_v26 = vld [vmem:[#allocation19_spill] sm:$0xff] }
 0x27b   : > { %8371 = vst [vmem:[#allocation120_spill] sm:$0xff] %v6351_v32  ;;  %v2191_v54 = vmul.f32 %v6361_v6, %v6361_v6  ;;  %v2159_v58 = vmul.f32 0.001953125, %v2011_v7  ;;  %v1764_v10 = vadd.f32 %v1763_v57, %v6359_v34  ;;  %v1940_v27 = vmul.f32 %v6359_v34, %v6359_v34  ;;  %v8377_v57 = vld [vmem:[#allocation20_spill] sm:$0xff] }
 0x27c   : > { %8372 = vst [vmem:[#allocation121_spill] sm:$0xff] %v6359_v34  ;;  %v2083_v32 = vadd.f32 %v6175_v45, %v1939_v25  ;;  %v2416_v29 = vmul.f32 0.5, %v2415_v60  ;;  %v6389_v3 = vperm.slane %v6341_v18, 1  ;;  %v6392_v7 = vperm.slane %v6365_v35, 1 }
 0x27d   : > { %8373 = vst [vmem:[#allocation122_spill] sm:$0xff] %v6371_v56  ;;  %v2223_v22 = vsub.f32 %v2159_v58, %v2191_v54  ;;  %1765 = vadd.xlane.f32.xlu0 %v1764_v10  ;;  %v2253_v61 = vsub.f32 %v8376_v26, %v6232_v63  ;;  %v2254_v33 = vsub.f32 %v8377_v57, %v6232_v63  ;;  %v6399_v25 = vperm.slane %v6341_v18, 2 }
 0x27e   : > { %8374 = vst [vmem:[#allocation123_spill] sm:$0xff] %v6375_v48  ;;  %v1553_v34 = vpop.f32.mrf.mxu2  ;;  %v2084_v45 = vadd.f32 %v2083_v32, %v1940_v27  ;;  %v2417_v60 = vsub.f32 1.5, %v2416_v29  ;;  %v1377_v48 = vpop.f32.mrf.mxu0  ;;  %v1943_v27 = vmul.f32 %v6380_v4, %v6380_v4  ;;  %v2258_v57 = vsub.f32 %v5548_v13, %v6289_v41 }
 0x27f   : > { %8375 = vst [vmem:[#allocation124_spill] sm:$0xff] %v6380_v4  ;;  %v6401_v54 = vadd.f32 1e-05, %v2223_v22  ;;  %v1554_v58 = vadd.f32 %v1553_v34, %v5847_v38  ;;  %v1642_v10 = vpop.f32.mrf.mxu3  ;;  %v4891_v56 = vpop.eup %4890  ;;  %v2257_v34 = vsub.f32 %v5536_v50, %v6289_v41  ;;  %v1378_v26 = vadd.f32 %v1377_v48, %v5835_v16 }
 0x280   : > { %2085 = vadd.xlane.f32.xlu2 %v2084_v45  ;;  %v1466_v32 = vpop.f32.mrf.mxu1  ;;  %v1696_v22 = vpop.xlane.xlu2 %1695  ;;  %v2418_v29 = vmul.f32 %v4889_v55, %v2417_v60  ;;  %v2424_v59 = vmul.f32 %v4891_v56, %v6353_v62  ;;  %v1768_v50 = vadd.f32 %v6184_v31, %v6380_v4  ;;  %v2260_v42 = vsub.f32 %v5878_v49, %v6289_v41 }
 0x281   : > { %4892 = vrsqrt.f32 %v6401_v54  ;;  %v6418_v5 = vadd.f32 %v1642_v10, %v1554_v58  ;;  %v6421_v45 = vmul.f32 0.001953125, %v1696_v22  ;;  %v2088_v13 = vadd.f32 %v6190_v24, %v1943_v27 }
 0x282   : > { %v2016_v47 = vpop.xlane.xlu1 %2015  ;;  %v2422_v60 = vsel %vm2421_vm2, %v4889_v55, %v2418_v29  ;;  %v2425_v46 = vmul.f32 %v4891_v56, %v2424_v59  ;;  %v6431_v58 = vperm.slane %v6365_v35, 2  ;;  %vm2430_vm3 = vweird.f32 %v4891_v56 }
 0x283   : > { %8379 = vst [vmem:[#allocation19_spill] sm:$0xff] %v6418_v5  ;;  %v2160_v28 = vmul.f32 0.001953125, %v2016_v47  ;;  %v2192_v55 = vmul.f32 %v6421_v45, %v6421_v45  ;;  %v1769_v47 = vadd.f32 %v1768_v50, %v6418_v5  ;;  %v1944_v31 = vmul.f32 %v6418_v5, %v6418_v5 }
 0x284   : > { %v2426_v48 = vmul.f32 0.5, %v2425_v46  ;;  %v2733_v59 = vmul.f32 %v2422_v60, %v2253_v61  ;;  %v2734_v10 = vmul.f32 %v2422_v60, %v2254_v33  ;;  %v6438_v39 = vadd.f32 %v1466_v32, %v1378_v26 }
 0x285   : > { %v2224_v27 = vsub.f32 %v2160_v28, %v2192_v55  ;;  %1770 = vadd.xlane.f32.xlu0 %v1769_v47  ;;  %v2089_v29 = vadd.f32 %v2088_v13, %v1944_v31  ;;  %vm2429_vm4 = vweird.f32 %v6353_v62  ;;  %v6448_v32 = vperm.slane %v6341_v18, 3 }
 0x286   : > { %8380 = vst [vmem:[#allocation20_spill] sm:$0xff] %v6438_v39  ;;  %v1555_v49 = vpop.f32.mrf.mxu2  ;;  %v2427_v24 = vsub.f32 1.5, %v2426_v48  ;;  %v1380_v4 = vpop.f32.mrf.mxu0  ;;  %vm2431_vm5 = vmor %vm2429_vm4, %vm2430_vm3  ;;  %v1773_v47 = vadd.f32 %v6198_v36, %v6438_v39  ;;  %v2871_v18 = vmul.f32 %v6369_v23, %v2733_v59  ;;  %v2872_v31 = vmul.f32 %v6389_v3, %v2734_v10 }
 0x287   : > { %v6440_v41 = vpop.eup %4892  ;;  %v1556_v46 = vadd.f32 %v1555_v49, %v5847_v38  ;;  %v1644_v22 = vpop.f32.mrf.mxu3  ;;  %v1381_v33 = vadd.f32 %v1380_v4, %v5835_v16  ;;  %v6450_v48 = vadd.f32 1e-05, %v2224_v27  ;;  %v1947_v4 = vmul.f32 %v6438_v39, %v6438_v39 }
 0x288   : > { %v2434_v61 = vmul.f32 %v6440_v41, %v6401_v54  ;;  %v1701_v26 = vpop.xlane.xlu2 %1700  ;;  %v2428_v50 = vmul.f32 %v4891_v56, %v2427_v24  ;;  %2090 = vadd.xlane.f32.xlu2 %v2089_v29  ;;  %v1469_v55 = vpop.f32.mrf.mxu1  ;;  %v8382_v36 = vsub.f32 %v8378_v9, %v6232_v63  ;;  %v6474_v59 = vperm.slane %v6365_v35, 3 }
 0x289   : > { %v6452_v28 = vadd.f32 %v1644_v22, %v1556_v46  ;;  %v6454_v13 = vmul.f32 0.001953125, %v1701_v26  ;;  %4894 = vrsqrt.f32 %v6450_v48  ;;  %v8381_v46 = vsub.f32 %v5842_v21, %v6232_v63 }
 0x28a   : > { %v2021_v62 = vpop.xlane.xlu1 %2020  ;;  %v2432_v49 = vsel %vm2431_vm5, %v4891_v56, %v2428_v50  ;;  %v2435_v24 = vmul.f32 %v6440_v41, %v2434_v61  ;;  %v2736_v29 = vmul.f32 %v2422_v60, %v8382_v36  ;;  %v6476_v10 = vadd.f32 %v1469_v55, %v1381_v33 }
 0x28b   : > { %v2193_v27 = vmul.f32 %v6454_v13, %v6454_v13  ;;  %v2735_v22 = vmul.f32 %v2422_v60, %v8381_v46  ;;  %v2737_v26 = vmul.f32 %v2432_v49, %v2257_v34  ;;  %v2738_v56 = vmul.f32 %v2432_v49, %v2258_v57 }
 0x28c   : > { %v2161_v61 = vmul.f32 0.001953125, %v2021_v62  ;;  %v1774_v50 = vadd.f32 %v1773_v47, %v6452_v28  ;;  %v1948_v39 = vmul.f32 %v6452_v28, %v6452_v28  ;;  %v2093_v21 = vadd.f32 %v6208_v15, %v1947_v4 }
 0x28d   : > { %v2875_v46 = vmul.f32 %v6369_v23, %v2737_v26  ;;  %v3009_v63 = vadd.f32 %v6386_v11, %v2871_v18  ;;  %v6484_v9 = vmul.f32 0.5, %v2435_v24  ;;  %v3010_v33 = vadd.f32 %v6392_v7, %v2872_v31 }
 0x28e   : > { %v1558_v5 = vpop.f32.mrf.mxu2  ;;  %v2225_v35 = vsub.f32 %v2161_v61, %v2193_v27  ;;  %1775 = vadd.xlane.f32.xlu1 %v1774_v50  ;;  %v1382_v60 = vpop.f32.mrf.mxu0  ;;  %v2739_v55 = vmul.f32 %v2432_v49, %v2259_v37  ;;  %v2740_v62 = vmul.f32 %v2432_v49, %v2260_v42  ;;  %v2094_v47 = vadd.f32 %v2093_v21, %v1948_v39 }
 0x28f   : > { %v1559_v57 = vadd.f32 %v1558_v5, %v5847_v38  ;;  %v1647_v34 = vpop.f32.mrf.mxu3  ;;  %v3013_v15 = vadd.f32 %v6386_v11, %v2875_v46  ;;  %v6489_v4 = vpop.eup %4894  ;;  %v1951_v18 = vmul.f32 %v6476_v10, %v6476_v10  ;;  %v2876_v5 = vmul.f32 %v6389_v3, %v2738_v56 }
 0x290   : > { %v1706_v36 = vpop.xlane.xlu0 %1705  ;;  %v2444_v31 = vmul.f32 %v6489_v4, %v6450_v48  ;;  %2095 = vadd.xlane.f32.xlu0 %v2094_v47  ;;  %v1778_v42 = vadd.f32 %v6202_v8, %v6476_v10  ;;  %v3137_v39 = vmax.f32 %v3009_v63, 0.0  ;;  %v2437_v26 = vsub.f32 1.5, %v6484_v9  ;;  %v1471_v21 = vpop.f32.mrf.mxu1 }
 0x291   : > { %v6493_v24 = vadd.f32 %v1647_v34, %v1559_v57  ;;  %v6495_v27 = vmul.f32 0.001953125, %v1706_v36  ;;  %v3141_v49 = vmax.f32 %v3013_v15, 0.0  ;;  %v6503_v61 = vadd.f32 1e-05, %v2225_v35 }
 0x292   : > { %v2026_v37 = vpop.xlane.xlu2 %2025  ;;  %v1383_v50 = vadd.f32 %v1382_v60, %v5835_v16  ;;  %v2445_v56 = vmul.f32 %v6489_v4, %v2444_v31  ;;  %v3014_v8 = vadd.f32 %v6392_v7, %v2876_v5  ;;  %v2873_v63 = vmul.f32 %v6399_v25, %v2735_v22 }
 0x293   : > { %v2162_v46 = vmul.f32 0.001953125, %v2026_v37  ;;  %v2194_v57 = vmul.f32 %v6495_v27, %v6495_v27  ;;  %v1779_v34 = vadd.f32 %v1778_v42, %v6493_v24  ;;  %v3265_v47 = vpack.c.bf16 %v3141_v49, %v3137_v39 }
 0x294   : > { %v2877_v9 = vmul.f32 %v6399_v25, %v2739_v55  ;;  %v2874_v35 = vmul.f32 %v6448_v32, %v2736_v29  ;;  %v2446_v36 = vmul.f32 0.5, %v2445_v56  ;;  %v3138_v15 = vmax.f32 %v3010_v33, 0.0 }
 0x295   : > { %v2226_v60 = vsub.f32 %v2162_v46, %v2194_v57  ;;  %3597 = vmatmul.bf16.vlgmr.msra.gmra.mxu0 %v3265_v47  ;;  %v2878_v31 = vmul.f32 %v6448_v32, %v2740_v62  ;;  %vm2439_vm6 = vweird.f32 %v6401_v54  ;;  %v3142_v42 = vmax.f32 %v3014_v8, 0.0 }
 0x296   : > { %v1560_v37 = vpop.f32.mrf.mxu2  ;;  %1780 = vadd.xlane.f32.xlu1 %v1779_v34  ;;  %v3011_v39 = vadd.f32 %v6431_v58, %v2873_v63  ;;  %v3015_v5 = vadd.f32 %v6431_v58, %v2877_v9  ;;  %v3012_v22 = vadd.f32 %v6474_v59, %v2874_v35  ;;  %4896 = vrsqrt.f32 %v6503_v61  ;;  %v1385_v34 = vpop.f32.mrf.mxu0 }
 0x297   : > { %v1649_v55 = vpop.f32.mrf.mxu3  ;;  %v6520_v29 = vadd.f32 1e-05, %v2226_v60  ;;  %v3016_v33 = vadd.f32 %v6474_v59, %v2878_v31  ;;  %v1561_v62 = vadd.f32 %v1560_v37, %v5847_v38  ;;  %v6524_v49 = vadd.f32 %v1471_v21, %v1383_v50 }
 0x298   : > { %v3266_v46 = vpack.c.bf16 %v3142_v42, %v3138_v15  ;;  %v3139_v56 = vmax.f32 %v3011_v39, 0.0  ;;  %v3143_v57 = vmax.f32 %v3015_v5, 0.0  ;;  %vm2440_vm7 = vweird.f32 %v6440_v41  ;;  %v1711_v63 = vpop.xlane.xlu0 %1710  ;;  %v1474_v42 = vpop.f32.mrf.mxu1 }
 0x299   : > { %v2447_v47 = vsub.f32 1.5, %v2446_v36  ;;  %4898 = vrsqrt.f32 %v6520_v29  ;;  %v1952_v8 = vmul.f32 %v6493_v24, %v6493_v24  ;;  %v3140_v60 = vmax.f32 %v3012_v22, 0.0  ;;  %vm2441_vm9 = vmor %vm2439_vm6, %vm2440_vm7 }
 0x29a   : > { %v2031_v9 = vpop.xlane.xlu2 %2030  ;;  %3686 = vmatmul.bf16.vlgmr.msra.gmra.mxu1 %v3266_v46  ;;  %v3267_v35 = vpack.c.bf16 %v3143_v57, %v3139_v56  ;;  %v3144_v31 = vmax.f32 %v3016_v33, 0.0  ;;  %v6530_v50 = vadd.f32 %v1649_v55, %v1561_v62  ;;  %v2438_v21 = vmul.f32 %v6440_v41, %v2437_v26 }
 0x29b   : > { %vm2450_vm8 = vweird.f32 %v6489_v4  ;;  %v2098_v15 = vadd.f32 %v6213_v40, %v1951_v18  ;;  %v1386_v36 = vadd.f32 %v1385_v34, %v5835_v16  ;;  %v6536_v39 = vmul.f32 0.001953125, %v1711_v63 }
 0x29c   : > { %3775 = vmatmul.bf16.vlgmr.msra.gmra.mxu2 %v3267_v35  ;;  %v3268_v37 = vpack.c.bf16 %v3144_v31, %v3140_v60  ;;  %v2163_v5 = vmul.f32 0.001953125, %v2031_v9  ;;  %v1783_v22 = vadd.f32 %v6217_v2, %v6524_v49  ;;  %v6540_v33 = vpop.eup %4896  ;;  %v2448_v55 = vmul.f32 %v6489_v4, %v2447_v47 }
 0x29d   : > { %v2099_v26 = vadd.f32 %v2098_v15, %v1952_v8  ;;  %v6543_v62 = vadd.f32 %v1474_v42, %v1386_v36  ;;  %v1955_v40 = vmul.f32 %v6524_v49, %v6524_v49  ;;  %v2195_v18 = vmul.f32 %v6536_v39, %v6536_v39 }
 0x29e   : > { %v1563_v46 = vpop.f32.mrf.mxu2  ;;  %3864 = vmatmul.bf16.vlgmr.msra.gmra.mxu3 %v3268_v37  ;;  %v1784_v56 = vadd.f32 %v1783_v22, %v6530_v50  ;;  %v1956_v2 = vmul.f32 %v6530_v50, %v6530_v50  ;;  %vm2449_vm10 = vweird.f32 %v6450_v48  ;;  %v6563_v9 = vadd.f32 %v6320_v52, %v6316_v0 }
 0x29f   : > { %v1564_v57 = vadd.f32 %v1563_v46, %v5847_v38  ;;  %v6553_v34 = vpop.eup %4898  ;;  %2100 = vadd.xlane.f32.xlu0 %v2099_v26  ;;  %v1652_v47 = vpop.f32.mrf.mxu3  ;;  %v2103_v8 = vadd.f32 %v6226_v44, %v1955_v40  ;;  %v6567_v35 = vadd.f32 %v6334_v20, %v6324_v12  ;;  %v6570_v60 = vsel %vm2441_vm9, %v6440_v41, %v2438_v21  ;;  %vm2451_vm11 = vmor %vm2449_vm10, %vm2450_vm8 }
 0x2a0   : > { %v1716_v63 = vpop.xlane.xlu1 %1715  ;;  %v2454_v54 = vmul.f32 %v6540_v33, %v6503_v61  ;;  %v2227_v48 = vsub.f32 %v2163_v5, %v2195_v18  ;;  %1785 = vadd.xlane.f32.xlu2 %v1784_v56  ;;  %v6579_v52 = vsel %vm2451_vm11, %v6489_v4, %v2448_v55  ;;  %v2261_v20 = vsub.f32 %v5550_v14, %v6361_v6  ;;  %v8384_v14 = vld [vmem:[#allocation21_spill] sm:$0xff]  ;;  %v1387_v26 = vpop.f32.mrf.mxu0 }
 0x2a1   : > { %v6576_v44 = vadd.f32 %v1652_v47, %v1564_v57  ;;  %v2104_v0 = vadd.f32 %v2103_v8, %v1956_v2  ;;  %v6581_v31 = vmul.f32 0.001953125, %v1716_v63  ;;  %v2464_v41 = vmul.f32 %v6553_v34, %v6520_v29 }
 0x2a2   : > { %v2036_v12 = vpop.xlane.xlu0 %2035  ;;  %v6587_v21 = vadd.f32 1e-05, %v2227_v48  ;;  %v1788_v36 = vadd.f32 %v6221_v19, %v6543_v62  ;;  %v2265_v37 = vsub.f32 %v5560_v30, %v6421_v45  ;;  %v2741_v42 = vmul.f32 %v6570_v60, %v2261_v20 }
 0x2a3   : > { %8383 = vst [vmem:[#allocation85_spill] sm:$0xff] %v6576_v44  ;;  %v2164_v15 = vmul.f32 0.001953125, %v2036_v12  ;;  %2105 = vadd.xlane.f32.xlu1 %v2104_v0  ;;  %v2196_v4 = vmul.f32 %v6581_v31, %v6581_v31  ;;  %v2262_v5 = vsub.f32 %v8384_v14, %v6361_v6  ;;  %v2455_v22 = vmul.f32 %v6540_v33, %v2454_v54 }
 0x2a4   : > { %4900 = vrsqrt.f32 %v6587_v21  ;;  %v1789_v55 = vadd.f32 %v1788_v36, %v6576_v44  ;;  %v2263_v19 = vsub.f32 %v5882_v53, %v6361_v6  ;;  %v2745_v40 = vmul.f32 %v6579_v52, %v2265_v37 }
 0x2a5   : > { %v2228_v46 = vsub.f32 %v2164_v15, %v2196_v4  ;;  %v2879_v30 = vmul.f32 %v6369_v23, %v2741_v42  ;;  %v2266_v18 = vsub.f32 %v5572_v51, %v6421_v45  ;;  %v2465_v56 = vmul.f32 %v6553_v34, %v2464_v41  ;;  %v1476_v42 = vpop.f32.mrf.mxu1 }
 0x2a6   : > { %v2742_v57 = vmul.f32 %v6570_v60, %v2262_v5  ;;  %v2267_v2 = vsub.f32 %v5903_v17, %v6421_v45  ;;  %v2743_v47 = vmul.f32 %v6570_v60, %v2263_v19  ;;  %v2883_v53 = vmul.f32 %v6369_v23, %v2745_v40  ;;  %v1565_v12 = vpop.f32.mrf.mxu2 }
 0x2a7   : > { %v6612_v8 = vadd.f32 1e-05, %v2228_v46  ;;  %v3017_v63 = vadd.f32 %v6386_v11, %v2879_v30  ;;  %v2746_v54 = vmul.f32 %v6579_v52, %v2266_v18  ;;  %v2264_v17 = vsub.f32 %v5900_v43, %v6361_v6  ;;  %v1654_v30 = vpop.f32.mrf.mxu3 }
 0x2a8   : > { %1790 = vadd.xlane.f32.xlu2 %v1789_v55  ;;  %v2880_v51 = vmul.f32 %v6389_v3, %v2742_v57  ;;  %v2747_v48 = vmul.f32 %v6579_v52, %v2267_v2  ;;  %v2881_v0 = vmul.f32 %v6399_v25, %v2743_v47  ;;  %v2456_v20 = vmul.f32 0.5, %v2455_v22 }
 0x2a9   : > { %v1959_v41 = vmul.f32 %v6543_v62, %v6543_v62  ;;  %v1388_v15 = vadd.f32 %v1387_v26, %v5835_v16  ;;  %v3021_v36 = vadd.f32 %v6386_v11, %v2883_v53  ;;  %v6628_v37 = vmul.f32 0.5, %v2465_v56 }
 0x2aa   : > { %v6626_v4 = vpop.eup %4900  ;;  %v2884_v14 = vmul.f32 %v6389_v3, %v2746_v54  ;;  %v3018_v5 = vadd.f32 %v6392_v7, %v2880_v51  ;;  %v2885_v43 = vmul.f32 %v6399_v25, %v2747_v48  ;;  %4902 = vrsqrt.f32 %v6612_v8  ;;  %v1721_v51 = vpop.xlane.xlu1 %1720 }
 0x2ab   : > { %v3145_v6 = vmax.f32 %v3017_v63, 0.0  ;;  %v3149_v22 = vmax.f32 %v3021_v36, 0.0  ;;  %v3019_v55 = vadd.f32 %v6431_v58, %v2881_v0  ;;  %v2474_v19 = vmul.f32 %v6626_v4, %v6587_v21  ;;  %v1390_v0 = vpop.f32.mrf.mxu0 }
 0x2ac   : > { %v3022_v26 = vadd.f32 %v6392_v7, %v2884_v14  ;;  %v3023_v46 = vadd.f32 %v6431_v58, %v2885_v43  ;;  %v2268_v40 = vsub.f32 %v5918_v1, %v6421_v45  ;;  %v3146_v56 = vmax.f32 %v3018_v5, 0.0  ;;  %v8386_v14 = vld [vmem:[#allocation104_spill] sm:$0xff] }
 0x2ad   : > { %v3269_v18 = vpack.c.bf16 %v3149_v22, %v3145_v6  ;;  %v3147_v57 = vmax.f32 %v3019_v55, 0.0  ;;  %v2744_v2 = vmul.f32 %v6570_v60, %v2264_v17  ;;  %vm2459_vm12 = vweird.f32 %v6503_v61 }
 0x2ae   : > { %v3150_v47 = vmax.f32 %v3022_v26, 0.0  ;;  %v3151_v53 = vmax.f32 %v3023_v46, 0.0  ;;  %v2748_v63 = vmul.f32 %v6579_v52, %v2268_v40  ;;  %v1566_v54 = vadd.f32 %v1565_v12, %v5847_v38  ;;  %v2041_v52 = vpop.xlane.xlu0 %2040 }
 0x2af   : > { %v2457_v48 = vsub.f32 1.5, %v2456_v20  ;;  %vm2460_vm13 = vweird.f32 %v6540_v33  ;;  %3602 = vmatmul.bf16.gmra.mxu0 %v3269_v18  ;;  %v2882_v1 = vmul.f32 %v6448_v32, %v2744_v2  ;;  %v1960_v45 = vmul.f32 %v6576_v44, %v6576_v44 }
 0x2b0   : > { %v6649_v60 = vadd.f32 %v1476_v42, %v1388_v15  ;;  %v3270_v17 = vpack.c.bf16 %v3150_v47, %v3146_v56  ;;  %v3271_v36 = vpack.c.bf16 %v3151_v53, %v3147_v57  ;;  %v2108_v5 = vadd.f32 %v8386_v14, %v1959_v41  ;;  %v6652_v43 = vpop.eup %4902  ;;  %v1568_v41 = vpop.f32.mrf.mxu2  ;;  %v8388_v57 = vld [vmem:[#allocation106_spill] sm:$0xff]  ;;  %vm2461_vm15 = vmor %vm2459_vm12, %vm2460_vm13 }
 0x2b1   : > { %v2467_v12 = vsub.f32 1.5, %v6628_v37  ;;  %v2475_v20 = vmul.f32 %v6626_v4, %v2474_v19  ;;  %v2886_v6 = vmul.f32 %v6448_v32, %v2748_v63  ;;  %v3020_v22 = vadd.f32 %v6474_v59, %v2882_v1 }
 0x2b2   : > { %8385 = vst [vmem:[#allocation21_spill] sm:$0xff] %v6649_v60  ;;  %3691 = vmatmul.bf16.gmra.mxu1 %v3270_v17  ;;  %3780 = vmatmul.bf16.gmra.mxu2 %v3271_v36  ;;  %v6658_v55 = vadd.f32 %v1654_v30, %v1566_v54  ;;  %v2109_v15 = vadd.f32 %v2108_v5, %v1960_v45  ;;  %v6661_v26 = vmul.f32 0.001953125, %v1721_v51  ;;  %vm2470_vm14 = vweird.f32 %v6553_v34  ;;  %v1479_v30 = vpop.f32.mrf.mxu1  ;;  %v1726_v51 = vpop.xlane.xlu2 %1725 }
 0x2b3   : > { %v1391_v42 = vadd.f32 %v1390_v0, %v5835_v16  ;;  %v2458_v46 = vmul.f32 %v6540_v33, %v2457_v48  ;;  %v3024_v37 = vadd.f32 %v6474_v59, %v2886_v6  ;;  %v2165_v19 = vmul.f32 0.001953125, %v2041_v52  ;;  %v1657_v17 = vpop.f32.mrf.mxu3  ;;  %v2046_v36 = vpop.xlane.xlu1 %2045  ;;  %v8391_v6 = vld [vmem:[#allocation107_spill] sm:$0xff] }
 0x2b4   : > { %8387 = vst [vmem:[#allocation104_spill] sm:$0xff] %v6658_v55  ;;  %v2484_v40 = vmul.f32 %v6652_v43, %v6612_v8  ;;  %v3148_v18 = vmax.f32 %v3020_v22, 0.0  ;;  %2110 = vadd.xlane.f32.xlu1 %v2109_v15  ;;  %v2197_v56 = vmul.f32 %v6661_v26, %v6661_v26  ;;  %v1793_v2 = vadd.f32 %v8388_v57, %v6649_v60 }
 0x2b5   : > { %v3152_v47 = vmax.f32 %v3024_v37, 0.0  ;;  %v6672_v53 = vadd.f32 %v1479_v30, %v1391_v42  ;;  %v1569_v63 = vadd.f32 %v1568_v41, %v5847_v38  ;;  %v1963_v54 = vmul.f32 %v6649_v60, %v6649_v60  ;;  %v8392_v41 = vld [vmem:[#allocation103_spill] sm:$0xff]  ;;  %v8395_v30 = vld [vmem:[#allocation84_spill] sm:$0xff] }
 0x2b6   : > { %v2468_v48 = vmul.f32 %v6553_v34, %v2467_v12  ;;  %v6678_v1 = vmul.f32 0.5, %v2475_v20  ;;  %v2229_v45 = vsub.f32 %v2165_v19, %v2197_v56  ;;  %v1794_v0 = vadd.f32 %v1793_v2, %v6658_v55  ;;  %v8393_v19 = vld [vmem:[#allocation22_spill] sm:$0xff] }
 0x2b7   : > { %8389 = vst [vmem:[#allocation106_spill] sm:$0xff] %v6672_v53  ;;  %v3272_v14 = vpack.c.bf16 %v3152_v47, %v3148_v18  ;;  %v6685_v5 = vadd.f32 %v1657_v17, %v1569_v63  ;;  %v1964_v52 = vmul.f32 %v6658_v55, %v6658_v55  ;;  %v2113_v12 = vadd.f32 %v8391_v6, %v1963_v54  ;;  %v8396_v47 = vld [vmem:[#allocation24_spill] sm:$0xff]  ;;  %v8399_v17 = vld [vmem:[#allocation86_spill] sm:$0xff] }
 0x2b8   : > { %v2462_v20 = vsel %vm2461_vm15, %v6540_v33, %v2458_v46  ;;  %vm2469_vm0 = vweird.f32 %v6520_v29  ;;  %v2485_v22 = vmul.f32 %v6652_v43, %v2484_v40  ;;  %1795 = vadd.xlane.f32.xlu0 %v1794_v0  ;;  %v6693_v15 = vmul.f32 0.001953125, %v1726_v51  ;;  %v8394_v40 = vld [vmem:[#allocation83_spill] sm:$0xff]  ;;  %v1392_v51 = vpop.f32.mrf.mxu0  ;;  %v1570_v29 = vpop.f32.mrf.mxu2 }
 0x2b9   : > { %8390 = vst [vmem:[#allocation125_spill] sm:$0xff] %v6685_v5  ;;  %vm2471_vm1 = vmor %vm2469_vm0, %vm2470_vm14  ;;  %3869 = vmatmul.bf16.gmra.mxu3 %v3272_v14  ;;  %v2114_v61 = vadd.f32 %v2113_v12, %v1964_v52  ;;  %v2166_v42 = vmul.f32 0.001953125, %v2046_v36  ;;  %v1798_v37 = vadd.f32 %v8392_v41, %v6672_v53  ;;  %v2269_v18 = vsub.f32 %v8393_v19, %v6454_v13  ;;  %v8400_v14 = vld [vmem:[#allocation88_spill] sm:$0xff] }
 0x2ba   : > { %v2472_v33 = vsel %vm2471_vm1, %v6553_v34, %v2468_v48  ;;  %v6703_v46 = vadd.f32 1e-05, %v2229_v45  ;;  %v6707_v56 = vadd.f32 %v8395_v30, %v8394_v40  ;;  %v2198_v57 = vmul.f32 %v6693_v15, %v6693_v15  ;;  %v8397_v34 = vld [vmem:[#allocation23_spill] sm:$0xff]  ;;  %v8398_v45 = vld [vmem:[#allocation25_spill] sm:$0xff] }
 0x2bb   : > { %2115 = vadd.xlane.f32.xlu2 %v2114_v61  ;;  %v1799_v2 = vadd.f32 %v1798_v37, %v6685_v5  ;;  %v2273_v63 = vsub.f32 %v8396_v47, %v6495_v27  ;;  %v2749_v54 = vmul.f32 %v2462_v20, %v2269_v18  ;;  %v2270_v48 = vsub.f32 %v8397_v34, %v6454_v13  ;;  %v2051_v40 = vpop.xlane.xlu1 %2050 }
 0x2bc   : > { %v2274_v0 = vsub.f32 %v8398_v45, %v6495_v27  ;;  %v2271_v36 = vsub.f32 %v8399_v17, %v6454_v13  ;;  %v2275_v52 = vsub.f32 %v8400_v14, %v6495_v27  ;;  %v6722_v6 = vmul.f32 0.5, %v2485_v22 }
 0x2bd   : > { %v2230_v12 = vsub.f32 %v2166_v42, %v2198_v57  ;;  %v2753_v61 = vmul.f32 %v2472_v33, %v2273_v63  ;;  %v2887_v41 = vmul.f32 %v6369_v23, %v2749_v54  ;;  %v2750_v37 = vmul.f32 %v2462_v20, %v2270_v48 }
 0x2be   : > { %v2754_v19 = vmul.f32 %v2472_v33, %v2274_v0  ;;  %v2751_v18 = vmul.f32 %v2462_v20, %v2271_v36  ;;  %v2755_v47 = vmul.f32 %v2472_v33, %v2275_v52  ;;  %4904 = vrsqrt.f32 %v6703_v46  ;;  %v1481_v0 = vpop.f32.mrf.mxu1  ;;  %v8401_v36 = vld [vmem:[#allocation87_spill] sm:$0xff]  ;;  %v8402_v52 = vld [vmem:[#allocation89_spill] sm:$0xff] }
 0x2bf   : > { %v6726_v34 = vadd.f32 1e-05, %v2230_v12  ;;  %v2891_v45 = vmul.f32 %v6369_v23, %v2753_v61  ;;  %v3025_v17 = vadd.f32 %v6386_v11, %v2887_v41  ;;  %v2888_v22 = vmul.f32 %v6389_v3, %v2750_v37 }
 0x2c0   : > { %1800 = vadd.xlane.f32.xlu0 %v1799_v2  ;;  %v2892_v42 = vmul.f32 %v6389_v3, %v2754_v19  ;;  %v2889_v57 = vmul.f32 %v6399_v25, %v2751_v18  ;;  %v2893_v63 = vmul.f32 %v6399_v25, %v2755_v47  ;;  %v2487_v54 = vsub.f32 1.5, %v6722_v6  ;;  %v1659_v18 = vpop.f32.mrf.mxu3 }
 0x2c1   : > { %v1393_v48 = vadd.f32 %v1392_v51, %v5835_v16  ;;  %v2272_v14 = vsub.f32 %v8401_v36, %v6454_v13  ;;  %v2276_v12 = vsub.f32 %v8402_v52, %v6495_v27  ;;  %4906 = vrsqrt.f32 %v6726_v34  ;;  %v1731_v52 = vpop.xlane.xlu2 %1730 }
 0x2c2   : > { %v3029_v2 = vadd.f32 %v6386_v11, %v2891_v45  ;;  %v3026_v61 = vadd.f32 %v6392_v7, %v2888_v22  ;;  %v3030_v41 = vadd.f32 %v6392_v7, %v2892_v42  ;;  %v3153_v37 = vmax.f32 %v3025_v17, 0.0 }
 0x2c3   : > { %v3027_v6 = vadd.f32 %v6431_v58, %v2889_v57  ;;  %v3031_v51 = vadd.f32 %v6431_v58, %v2893_v63  ;;  %v2752_v19 = vmul.f32 %v2462_v20, %v2272_v14  ;;  %vm2479_vm2 = vweird.f32 %v6587_v21 }
 0x2c4   : > { %v3157_v13 = vmax.f32 %v3029_v2, 0.0  ;;  %v3154_v47 = vmax.f32 %v3026_v61, 0.0  ;;  %v3158_v27 = vmax.f32 %v3030_v41, 0.0  ;;  %v2756_v36 = vmul.f32 %v2472_v33, %v2276_v12  ;;  %v6747_v30 = vpop.eup %4904  ;;  %v1395_v2 = vpop.f32.mrf.mxu0 }
 0x2c5   : > { %v1967_v45 = vmul.f32 %v6672_v53, %v6672_v53  ;;  %v3155_v22 = vmax.f32 %v3027_v6, 0.0  ;;  %v3159_v17 = vmax.f32 %v3031_v51, 0.0  ;;  %v2890_v42 = vmul.f32 %v6448_v32, %v2752_v19  ;;  %v8406_v19 = vld [vmem:[#allocation109_spill] sm:$0xff] }
 0x2c6   : > { %v3273_v57 = vpack.c.bf16 %v3157_v13, %v3153_v37  ;;  %v3274_v63 = vpack.c.bf16 %v3158_v27, %v3154_v47  ;;  %v2894_v20 = vmul.f32 %v6448_v32, %v2756_v36  ;;  %v1571_v14 = vadd.f32 %v1570_v29, %v5847_v38  ;;  %v1573_v47 = vpop.f32.mrf.mxu2 }
 0x2c7   : > { %v6754_v61 = vadd.f32 %v1481_v0, %v1393_v48  ;;  %v3275_v33 = vpack.c.bf16 %v3159_v17, %v3155_v22  ;;  %v3028_v12 = vadd.f32 %v6474_v59, %v2890_v42  ;;  %v1968_v41 = vmul.f32 %v6685_v5, %v6685_v5  ;;  %v6759_v6 = vpop.eup %4906 }
 0x2c8   : > { %v8404_v51 = vsub.f32 1.5, %v6678_v1  ;;  %vm2480_vm3 = vweird.f32 %v6626_v4  ;;  %vm2490_vm4 = vweird.f32 %v6652_v43  ;;  %3607 = vmatmul.bf16.gmra.mxu0 %v3273_v57  ;;  %3696 = vmatmul.bf16.gmra.mxu1 %v3274_v63  ;;  %v3032_v29 = vadd.f32 %v6474_v59, %v2894_v20  ;;  %v1484_v20 = vpop.f32.mrf.mxu1 }
 0x2c9   : > { %8403 = vst [vmem:[#allocation107_spill] sm:$0xff] %v6754_v61  ;;  %v2494_v48 = vmul.f32 %v6747_v30, %v6703_v46  ;;  %3785 = vmatmul.bf16.gmra.mxu2 %v3275_v33  ;;  %v6769_v0 = vadd.f32 %v1659_v18, %v1571_v14  ;;  %v2118_v13 = vadd.f32 %v8406_v19, %v1967_v45  ;;  %v3156_v27 = vmax.f32 %v3028_v12, 0.0  ;;  %v8407_v18 = vld [vmem:[#allocation111_spill] sm:$0xff]  ;;  %v1736_v12 = vpop.xlane.xlu0 %1735  ;;  %vm2481_vm5 = vmor %vm2479_vm2, %vm2480_vm3 }
 0x2ca   : > { %v2478_v37 = vmul.f32 %v6626_v4, %v8404_v51  ;;  %v1396_v1 = vadd.f32 %v1395_v2, %v5835_v16  ;;  %v3160_v36 = vmax.f32 %v3032_v29, 0.0  ;;  %v6773_v22 = vmul.f32 0.001953125, %v1731_v52 }
 0x2cb   : > { %8405 = vst [vmem:[#allocation103_spill] sm:$0xff] %v6769_v0  ;;  %v2167_v17 = vmul.f32 0.001953125, %v2051_v40  ;;  %v2488_v42 = vmul.f32 %v6652_v43, %v2487_v54  ;;  %v2504_v57 = vmul.f32 %v6759_v6, %v6726_v34  ;;  %v2119_v63 = vadd.f32 %v2118_v13, %v1968_v41  ;;  %v2056_v40 = vpop.xlane.xlu2 %2055  ;;  %v1662_v41 = vpop.f32.mrf.mxu3 }
 0x2cc   : > { %v1803_v14 = vadd.f32 %v8407_v18, %v6754_v61  ;;  %v3276_v33 = vpack.c.bf16 %v3160_v36, %v3156_v27  ;;  %v6780_v45 = vadd.f32 %v1484_v20, %v1396_v1  ;;  %v2199_v2 = vmul.f32 %v6773_v22, %v6773_v22 }
 0x2cd   : > { %v1574_v52 = vadd.f32 %v1573_v47, %v5847_v38  ;;  %vm2489_vm6 = vweird.f32 %v6612_v8  ;;  %2120 = vadd.xlane.f32.xlu2 %v2119_v63  ;;  %v1971_v51 = vmul.f32 %v6754_v61, %v6754_v61  ;;  %v1972_v29 = vmul.f32 %v6769_v0, %v6769_v0  ;;  %v8410_v47 = vld [vmem:[#allocation112_spill] sm:$0xff] }
 0x2ce   : > { %8408 = vst [vmem:[#allocation22_spill] sm:$0xff] %v6780_v45  ;;  %v1804_v54 = vadd.f32 %v1803_v14, %v6769_v0  ;;  %v2482_v19 = vsel %vm2481_vm5, %v6626_v4, %v2478_v37  ;;  %vm2491_vm7 = vmor %vm2489_vm6, %vm2490_vm4  ;;  %v2495_v21 = vmul.f32 %v6747_v30, %v2494_v48  ;;  %3874 = vmatmul.bf16.gmra.mxu3 %v3276_v33  ;;  %v6803_v36 = vmul.f32 0.001953125, %v1736_v12  ;;  %v8411_v37 = vld [vmem:[#allocation108_spill] sm:$0xff]  ;;  %v8412_v48 = vld [vmem:[#allocation26_spill] sm:$0xff] }
 0x2cf   : > { %v2231_v13 = vsub.f32 %v2167_v17, %v2199_v2  ;;  %v6799_v8 = vadd.f32 %v1662_v41, %v1574_v52  ;;  %v2492_v1 = vsel %vm2491_vm7, %v6652_v43, %v2488_v42  ;;  %v2123_v27 = vadd.f32 %v8410_v47, %v1971_v51  ;;  %v8413_v42 = vld [vmem:[#allocation28_spill] sm:$0xff]  ;;  %v8414_v2 = vld [vmem:[#allocation117_spill] sm:$0xff]  ;;  %v8417_v47 = vld [vmem:[#allocation30_spill] sm:$0xff] }
 0x2d0   : > { %1805 = vadd.xlane.f32.xlu1 %v1804_v54  ;;  %v2168_v63 = vmul.f32 0.001953125, %v2056_v40  ;;  %v2505_v20 = vmul.f32 %v6759_v6, %v2504_v57  ;;  %v1808_v18 = vadd.f32 %v8411_v37, %v6780_v45  ;;  %v2277_v17 = vsub.f32 %v8412_v48, %v6536_v39  ;;  %v8415_v52 = vld [vmem:[#allocation120_spill] sm:$0xff]  ;;  %v1397_v48 = vpop.f32.mrf.mxu0 }
 0x2d1   : > { %8409 = vst [vmem:[#allocation24_spill] sm:$0xff] %v6799_v8  ;;  %v6806_v4 = vadd.f32 1e-05, %v2231_v13  ;;  %v2124_v14 = vadd.f32 %v2123_v27, %v1972_v29  ;;  %v2200_v43 = vmul.f32 %v6803_v36, %v6803_v36  ;;  %v2281_v33 = vsub.f32 %v8413_v42, %v6581_v31  ;;  %v8416_v29 = vld [vmem:[#allocation27_spill] sm:$0xff]  ;;  %v8418_v42 = vld [vmem:[#allocation90_spill] sm:$0xff] }
 0x2d2   : > { %v6818_v12 = vadd.f32 %v8415_v52, %v8414_v2  ;;  %v6820_v57 = vmul.f32 0.5, %v2495_v21  ;;  %v1809_v40 = vadd.f32 %v1808_v18, %v6799_v8  ;;  %v2757_v54 = vmul.f32 %v2482_v19, %v2277_v17  ;;  %v8419_v18 = vld [vmem:[#allocation92_spill] sm:$0xff] }
 0x2d3   : > { %4908 = vrsqrt.f32 %v6806_v4  ;;  %2125 = vadd.xlane.f32.xlu0 %v2124_v14  ;;  %v2232_v41 = vsub.f32 %v2168_v63, %v2200_v43  ;;  %v2761_v51 = vmul.f32 %v2492_v1, %v2281_v33  ;;  %v2278_v13 = vsub.f32 %v8416_v29, %v6536_v39  ;;  %v1664_v53 = vpop.f32.mrf.mxu3 }
 0x2d4   : > { %v2282_v27 = vsub.f32 %v8417_v47, %v6581_v31  ;;  %v6828_v37 = vmul.f32 0.5, %v2505_v20  ;;  %v2895_v21 = vmul.f32 %v6369_v23, %v2757_v54  ;;  %v2279_v2 = vsub.f32 %v8418_v42, %v6536_v39  ;;  %v1575_v54 = vpop.f32.mrf.mxu2 }
 0x2d5   : > { %v2283_v17 = vsub.f32 %v8419_v18, %v6581_v31  ;;  %v6835_v14 = vadd.f32 1e-05, %v2232_v41  ;;  %v2899_v63 = vmul.f32 %v6369_v23, %v2761_v51  ;;  %v2758_v43 = vmul.f32 %v2482_v19, %v2278_v13 }
 0x2d6   : > { %v2762_v33 = vmul.f32 %v2492_v1, %v2282_v27  ;;  %v1975_v52 = vmul.f32 %v6780_v45, %v6780_v45  ;;  %v3033_v20 = vadd.f32 %v6386_v11, %v2895_v21  ;;  %v2759_v29 = vmul.f32 %v2482_v19, %v2279_v2  ;;  %v8420_v2 = vld [vmem:[#allocation91_spill] sm:$0xff] }
 0x2d7   : > { %v2763_v47 = vmul.f32 %v2492_v1, %v2283_v17  ;;  %v1398_v0 = vadd.f32 %v1397_v48, %v5835_v16  ;;  %4910 = vrsqrt.f32 %v6835_v14  ;;  %v3037_v41 = vadd.f32 %v6386_v11, %v2899_v63 }
 0x2d8   : > { %1810 = vadd.xlane.f32.xlu1 %v1809_v40  ;;  %v2896_v42 = vmul.f32 %v6389_v3, %v2758_v43  ;;  %v2900_v13 = vmul.f32 %v6389_v3, %v2762_v33  ;;  %v2897_v27 = vmul.f32 %v6399_v25, %v2759_v29  ;;  %v2280_v18 = vsub.f32 %v8420_v2, %v6536_v39  ;;  %v8421_v40 = vld [vmem:[#allocation93_spill] sm:$0xff]  ;;  %v1486_v43 = vpop.f32.mrf.mxu1 }
 0x2d9   : > { %v6845_v51 = vpop.eup %4908  ;;  %v2901_v21 = vmul.f32 %v6399_v25, %v2763_v47  ;;  %v3161_v17 = vmax.f32 %v3033_v20, 0.0  ;;  %v3165_v48 = vmax.f32 %v3037_v41, 0.0  ;;  %v2284_v63 = vsub.f32 %v8421_v40, %v6581_v31 }
 0x2da   : > { %v3034_v45 = vadd.f32 %v6392_v7, %v2896_v42  ;;  %vm2500_vm8 = vweird.f32 %v6747_v30  ;;  %v3038_v5 = vadd.f32 %v6392_v7, %v2900_v13  ;;  %v3035_v33 = vadd.f32 %v6431_v58, %v2897_v27  ;;  %v1741_v13 = vpop.xlane.xlu0 %1740 }
 0x2db   : > { %v3039_v29 = vadd.f32 %v6431_v58, %v2901_v21  ;;  %v2760_v47 = vmul.f32 %v2482_v19, %v2280_v18  ;;  %v2514_v39 = vmul.f32 %v6845_v51, %v6806_v4  ;;  %v3277_v20 = vpack.c.bf16 %v3165_v48, %v3161_v17  ;;  %v1400_v48 = vpop.f32.mrf.mxu0 }
 0x2dc   : > { %v3162_v41 = vmax.f32 %v3034_v45, 0.0  ;;  %v2764_v2 = vmul.f32 %v2492_v1, %v2284_v63  ;;  %vm2499_vm9 = vweird.f32 %v6703_v46  ;;  %v3166_v42 = vmax.f32 %v3038_v5, 0.0  ;;  %v2061_v63 = vpop.xlane.xlu2 %2060  ;;  %v8426_v46 = vld [vmem:[#allocation119_spill] sm:$0xff] }
 0x2dd   : > { %v3163_v31 = vmax.f32 %v3035_v33, 0.0  ;;  %v3167_v40 = vmax.f32 %v3039_v29, 0.0  ;;  %v2898_v61 = vmul.f32 %v6448_v32, %v2760_v47  ;;  %v6863_v55 = vpop.eup %4910  ;;  %v2497_v27 = vsub.f32 1.5, %v6820_v57  ;;  %3612 = vmatmul.bf16.gmra.mxu0 %v3277_v20  ;;  %v8424_v20 = vld [vmem:[#allocation115_spill] sm:$0xff]  ;;  %vm2501_vm11 = vmor %vm2499_vm9, %vm2500_vm8 }
 0x2de   : > { %v2507_v19 = vsub.f32 1.5, %v6828_v37  ;;  %v2902_v21 = vmul.f32 %v6448_v32, %v2764_v2  ;;  %v1576_v45 = vadd.f32 %v1575_v54, %v5847_v38  ;;  %v2524_v5 = vmul.f32 %v6863_v55, %v6835_v14 }
 0x2df   : > { %v3278_v1 = vpack.c.bf16 %v3166_v42, %v3162_v41  ;;  %v3279_v18 = vpack.c.bf16 %v3167_v40, %v3163_v31  ;;  %v1976_v17 = vmul.f32 %v6799_v8, %v6799_v8  ;;  %v2515_v33 = vmul.f32 %v6845_v51, %v2514_v39  ;;  %v1578_v42 = vpop.f32.mrf.mxu2 }
 0x2e0   : > { %v6874_v57 = vadd.f32 %v1486_v43, %v1398_v0  ;;  %v3036_v37 = vadd.f32 %v6474_v59, %v2898_v61  ;;  %v3040_v29 = vadd.f32 %v6474_v59, %v2902_v21  ;;  %v2525_v54 = vmul.f32 %v6863_v55, %v2524_v5 }
 0x2e1   : > { %3701 = vmatmul.bf16.gmra.mxu1 %v3278_v1  ;;  %3790 = vmatmul.bf16.gmra.mxu2 %v3279_v18  ;;  %v6879_v47 = vadd.f32 %v1664_v53, %v1576_v45  ;;  %v2128_v41 = vadd.f32 %v8424_v20, %v1975_v52  ;;  %v6882_v2 = vmul.f32 0.001953125, %v1741_v13  ;;  %v1401_v0 = vadd.f32 %v1400_v48, %v5835_v16  ;;  %v8425_v52 = vld [vmem:[#allocation118_spill] sm:$0xff]  ;;  %v1746_v1 = vpop.xlane.xlu1 %1745 }
 0x2e2   : > { %8422 = vst [vmem:[#allocation23_spill] sm:$0xff] %v6874_v57  ;;  %v3164_v31 = vmax.f32 %v3036_v37, 0.0  ;;  %v3168_v40 = vmax.f32 %v3040_v29, 0.0  ;;  %v2169_v43 = vmul.f32 0.001953125, %v2061_v63  ;;  %v2498_v61 = vmul.f32 %v6747_v30, %v2497_v27  ;;  %v1489_v27 = vpop.f32.mrf.mxu1  ;;  %v2066_v37 = vpop.xlane.xlu0 %2065 }
 0x2e3   : > { %8423 = vst [vmem:[#allocation25_spill] sm:$0xff] %v6879_v47  ;;  %vm2510_vm10 = vweird.f32 %v6759_v6  ;;  %v2129_v39 = vadd.f32 %v2128_v41, %v1976_v17  ;;  %v2201_v21 = vmul.f32 %v6882_v2, %v6882_v2  ;;  %v2508_v53 = vmul.f32 %v6759_v6, %v2507_v19  ;;  %v1667_v41 = vpop.f32.mrf.mxu3 }
 0x2e4   : > { %v3280_v45 = vpack.c.bf16 %v3168_v40, %v3164_v31  ;;  %v1813_v13 = vadd.f32 %v8425_v52, %v6874_v57  ;;  %v1579_v5 = vadd.f32 %v1578_v42, %v5847_v38  ;;  %v6893_v18 = vmul.f32 0.5, %v2515_v33  ;;  %v8428_v52 = vld [vmem:[#allocation113_spill] sm:$0xff] }
 0x2e5   : > { %v6895_v48 = vmul.f32 0.5, %v2525_v54  ;;  %2130 = vadd.xlane.f32.xlu0 %v2129_v39  ;;  %v2233_v63 = vsub.f32 %v2169_v43, %v2201_v21  ;;  %v1979_v17 = vmul.f32 %v6874_v57, %v6874_v57  ;;  %vm2509_vm12 = vweird.f32 %v6726_v34  ;;  %v8427_v43 = vld [vmem:[#allocation31_spill] sm:$0xff] }
 0x2e6   : > { %3879 = vmatmul.bf16.gmra.mxu3 %v3280_v45  ;;  %v6904_v19 = vadd.f32 %v1489_v27, %v1401_v0  ;;  %v1814_v33 = vadd.f32 %v1813_v13, %v6879_v47  ;;  %v1980_v29 = vmul.f32 %v6879_v47, %v6879_v47  ;;  %v2502_v54 = vsel %vm2501_vm11, %v6747_v30, %v2498_v61  ;;  %vm2511_vm13 = vmor %vm2509_vm12, %vm2510_vm10  ;;  %v8430_v27 = vld [vmem:[#allocation32_spill] sm:$0xff] }
 0x2e7   : > { %v6912_v20 = vadd.f32 1e-05, %v2233_v63  ;;  %v2133_v42 = vadd.f32 %v8426_v46, %v1979_v17  ;;  %v6915_v31 = vmul.f32 0.001953125, %v1746_v1  ;;  %v2512_v34 = vsel %vm2511_vm13, %v6759_v6, %v2508_v53  ;;  %v8429_v53 = vld [vmem:[#allocation33_spill] sm:$0xff]  ;;  %v1402_v1 = vpop.f32.mrf.mxu0  ;;  %v8431_v17 = vld [vmem:[#allocation36_spill] sm:$0xff]  ;;  %v1580_v8 = vpop.f32.mrf.mxu2 }
 0x2e8   : > { %1815 = vadd.xlane.f32.xlu2 %v1814_v33  ;;  %v6918_v40 = vadd.f32 %v1667_v41, %v1579_v5  ;;  %v2170_v0 = vmul.f32 0.001953125, %v2066_v37  ;;  %v2285_v39 = vsub.f32 %v8427_v43, %v6661_v26  ;;  %v1818_v6 = vadd.f32 %v8428_v52, %v6904_v19  ;;  %v8432_v33 = vld [vmem:[#allocation94_spill] sm:$0xff]  ;;  %v8433_v41 = vld [vmem:[#allocation95_spill] sm:$0xff] }
 0x2e9   : > { %4912 = vrsqrt.f32 %v6912_v20  ;;  %v2134_v21 = vadd.f32 %v2133_v42, %v1980_v29  ;;  %v2202_v45 = vmul.f32 %v6915_v31, %v6915_v31  ;;  %v2289_v13 = vsub.f32 %v8429_v53, %v6693_v15 }
 0x2ea   : > { %v2765_v5 = vmul.f32 %v2502_v54, %v2285_v39  ;;  %v2286_v63 = vsub.f32 %v8430_v27, %v6661_v26  ;;  %v2290_v37 = vsub.f32 %v8431_v17, %v6693_v15  ;;  %v2287_v29 = vsub.f32 %v8432_v33, %v6661_v26 }
 0x2eb   : > { %2135 = vadd.xlane.f32.xlu1 %v2134_v21  ;;  %v2291_v46 = vsub.f32 %v8433_v41, %v6693_v15  ;;  %v2234_v42 = vsub.f32 %v2170_v0, %v2202_v45  ;;  %v1819_v43 = vadd.f32 %v1818_v6, %v6918_v40  ;;  %v2769_v52 = vmul.f32 %v2512_v34, %v2289_v13  ;;  %v1669_v57 = vpop.f32.mrf.mxu3 }
 0x2ec   : > { %v2903_v39 = vmul.f32 %v6369_v23, %v2765_v5  ;;  %v2766_v21 = vmul.f32 %v2502_v54, %v2286_v63  ;;  %v2770_v53 = vmul.f32 %v2512_v34, %v2290_v37  ;;  %v2767_v61 = vmul.f32 %v2502_v54, %v2287_v29  ;;  %v8434_v63 = vld [vmem:[#allocation29_spill] sm:$0xff]  ;;  %v8435_v29 = vld [vmem:[#allocation96_spill] sm:$0xff] }
 0x2ed   : > { %v2771_v30 = vmul.f32 %v2512_v34, %v2291_v46  ;;  %v1403_v27 = vadd.f32 %v1402_v1, %v5835_v16  ;;  %v6942_v47 = vadd.f32 1e-05, %v2234_v42  ;;  %v2907_v17 = vmul.f32 %v6369_v23, %v2769_v52  ;;  %v1491_v1 = vpop.f32.mrf.mxu1 }
 0x2ee   : > { %v3041_v33 = vadd.f32 %v6386_v11, %v2903_v39  ;;  %v2904_v0 = vmul.f32 %v6389_v3, %v2766_v21  ;;  %v2908_v45 = vmul.f32 %v6389_v3, %v2770_v53  ;;  %v2905_v6 = vmul.f32 %v6399_v25, %v2767_v61 }
 0x2ef   : > { %v6946_v41 = vpop.eup %4912  ;;  %v2909_v13 = vmul.f32 %v6399_v25, %v2771_v30  ;;  %4914 = vrsqrt.f32 %v6942_v47  ;;  %v2288_v37 = vsub.f32 %v8434_v63, %v6661_v26  ;;  %v2292_v46 = vsub.f32 %v8435_v29, %v6693_v15  ;;  %v1751_v15 = vpop.xlane.xlu1 %1750 }
 0x2f0   : > { %v2534_v5 = vmul.f32 %v6946_v41, %v6912_v20  ;;  %1820 = vadd.xlane.f32.xlu2 %v1819_v43  ;;  %v3045_v42 = vadd.f32 %v6386_v11, %v2907_v17  ;;  %v3169_v52 = vmax.f32 %v3041_v33, 0.0  ;;  %v3042_v61 = vadd.f32 %v6392_v7, %v2904_v0 }
 0x2f1   : > { %v3046_v30 = vadd.f32 %v6392_v7, %v2908_v45  ;;  %v3043_v21 = vadd.f32 %v6431_v58, %v2905_v6  ;;  %v3047_v53 = vadd.f32 %v6431_v58, %v2909_v13  ;;  %v2768_v43 = vmul.f32 %v2502_v54, %v2288_v37  ;;  %v1405_v37 = vpop.f32.mrf.mxu0 }
 0x2f2   : > { %v2535_v39 = vmul.f32 %v6946_v41, %v2534_v5  ;;  %v3173_v44 = vmax.f32 %v3045_v42, 0.0  ;;  %v3170_v26 = vmax.f32 %v3042_v61, 0.0  ;;  %v2772_v60 = vmul.f32 %v2512_v34, %v2292_v46 }
 0x2f3   : > { %v3174_v63 = vmax.f32 %v3046_v30, 0.0  ;;  %vm2519_vm14 = vweird.f32 %v6806_v4  ;;  %v1983_v17 = vmul.f32 %v6904_v19, %v6904_v19  ;;  %v3171_v33 = vmax.f32 %v3043_v21, 0.0  ;;  %v2071_v30 = vpop.xlane.xlu0 %2070 }
 0x2f4   : > { %v3175_v0 = vmax.f32 %v3047_v53, 0.0  ;;  %v2906_v45 = vmul.f32 %v6448_v32, %v2768_v43  ;;  %v3281_v5 = vpack.c.bf16 %v3173_v44, %v3169_v52  ;;  %v2910_v13 = vmul.f32 %v6448_v32, %v2772_v60  ;;  %v1583_v53 = vpop.f32.mrf.mxu2 }
 0x2f5   : > { %v3282_v6 = vpack.c.bf16 %v3174_v63, %v3170_v26  ;;  %v1581_v54 = vadd.f32 %v1580_v8, %v5847_v38  ;;  %v6971_v29 = vpop.eup %4914  ;;  %v6973_v34 = vadd.f32 %v1491_v1, %v1403_v27  ;;  %v1984_v61 = vmul.f32 %v6918_v40, %v6918_v40  ;;  %v8437_v1 = vld [vmem:[#allocation122_spill] sm:$0xff] }
 0x2f6   : > { %v3283_v46 = vpack.c.bf16 %v3175_v0, %v3171_v33  ;;  %v3044_v42 = vadd.f32 %v6474_v59, %v2906_v45  ;;  %vm2520_vm15 = vweird.f32 %v6845_v51  ;;  %vm2530_vm0 = vweird.f32 %v6863_v55  ;;  %3617 = vmatmul.bf16.gmra.mxu0 %v3281_v5 }
 0x2f7   : > { %v2536_v44 = vmul.f32 0.5, %v2535_v39  ;;  %3706 = vmatmul.bf16.gmra.mxu1 %v3282_v6  ;;  %v3048_v60 = vadd.f32 %v6474_v59, %v2910_v13  ;;  %v2544_v8 = vmul.f32 %v6971_v29, %v6942_v47  ;;  %v6983_v27 = vadd.f32 %v1669_v57, %v1581_v54  ;;  %v1494_v6 = vpop.f32.mrf.mxu1  ;;  %vm2521_vm1 = vmor %vm2519_vm14, %vm2520_vm15 }
 0x2f8   : > { %3795 = vmatmul.bf16.gmra.mxu2 %v3283_v46  ;;  %v2138_v52 = vadd.f32 %v8437_v1, %v1983_v17  ;;  %v1406_v21 = vadd.f32 %v1405_v37, %v5835_v16  ;;  %v3172_v43 = vmax.f32 %v3044_v42, 0.0  ;;  %v6987_v63 = vmul.f32 0.001953125, %v1751_v15  ;;  %v8440_v17 = vld [vmem:[#allocation123_spill] sm:$0xff]  ;;  %v2076_v42 = vpop.xlane.xlu1 %2075 }
 0x2f9   : > { %8436 = vst [vmem:[#allocation86_spill] sm:$0xff] %v6983_v27  ;;  %v3176_v26 = vmax.f32 %v3048_v60, 0.0  ;;  %v2171_v39 = vmul.f32 0.001953125, %v2071_v30  ;;  %v8438_v33 = vsub.f32 1.5, %v6893_v18  ;;  %v8439_v45 = vsub.f32 1.5, %v6895_v48  ;;  %v1756_v18 = vpop.xlane.xlu2 %1755  ;;  %v1672_v60 = vpop.f32.mrf.mxu3 }
 0x2fa   : > { %v2139_v57 = vadd.f32 %v2138_v52, %v1984_v61  ;;  %v1823_v13 = vadd.f32 %v8440_v17, %v6973_v34  ;;  %v6997_v37 = vadd.f32 %v1494_v6, %v1406_v21  ;;  %v2203_v15 = vmul.f32 %v6987_v63, %v6987_v63  ;;  %v8444_v6 = vld [vmem:[#allocation39_spill] sm:$0xff] }
 0x2fb   : > { %v2518_v0 = vmul.f32 %v6845_v51, %v8438_v33  ;;  %v2528_v5 = vmul.f32 %v6863_v55, %v8439_v45  ;;  %v3284_v54 = vpack.c.bf16 %v3176_v26, %v3172_v43  ;;  %v1584_v46 = vadd.f32 %v1583_v53, %v5847_v38  ;;  %v8443_v45 = vld [vmem:[#allocation37_spill] sm:$0xff] }
 0x2fc   : > { %8441 = vst [vmem:[#allocation88_spill] sm:$0xff] %v6997_v37  ;;  %v2537_v30 = vsub.f32 1.5, %v2536_v44  ;;  %2140 = vadd.xlane.f32.xlu1 %v2139_v57  ;;  %v1824_v48 = vadd.f32 %v1823_v13, %v6983_v27  ;;  %v1987_v61 = vmul.f32 %v6973_v34, %v6973_v34  ;;  %v1988_v1 = vmul.f32 %v6983_v27, %v6983_v27 }
 0x2fd   : > { %vm2529_vm2 = vweird.f32 %v6835_v14  ;;  %v2545_v52 = vmul.f32 %v6971_v29, %v2544_v8  ;;  %3884 = vmatmul.bf16.gmra.mxu3 %v3284_v54  ;;  %v2235_v44 = vsub.f32 %v2171_v39, %v2203_v15  ;;  %v7013_v21 = vadd.f32 %v1672_v60, %v1584_v46  ;;  %v8442_v8 = vld [vmem:[#allocation116_spill] sm:$0xff]  ;;  %v1407_v54 = vpop.f32.mrf.mxu0 }
 0x2fe   : > { %v2522_v53 = vsel %vm2521_vm1, %v6845_v51, %v2518_v0  ;;  %vm2531_vm3 = vmor %vm2529_vm2, %vm2530_vm0  ;;  %1825 = vadd.xlane.f32.xlu0 %v1824_v48  ;;  %v2143_v43 = vadd.f32 %v6563_v9, %v1987_v61  ;;  %v7019_v26 = vmul.f32 0.001953125, %v1756_v18  ;;  %v2172_v4 = vmul.f32 0.001953125, %v2076_v42  ;;  %v8445_v18 = vld [vmem:[#allocation38_spill] sm:$0xff] }
 0x2ff   : > { %v2532_v33 = vsel %vm2531_vm3, %v6863_v55, %v2528_v5  ;;  %v7022_v14 = vadd.f32 1e-05, %v2235_v44  ;;  %v1828_v39 = vadd.f32 %v8442_v8, %v6997_v37  ;;  %v2293_v57 = vsub.f32 %v8443_v45, %v6773_v22  ;;  %v8448_v44 = vld [vmem:[#allocation97_spill] sm:$0xff] }
 0x300   : > { %v7029_v51 = vmul.f32 %v6946_v41, %v2537_v30  ;;  %v2144_v0 = vadd.f32 %v2143_v43, %v1988_v1  ;;  %v2204_v9 = vmul.f32 %v7019_v26, %v7019_v26  ;;  %v2297_v17 = vsub.f32 %v8444_v6, %v6803_v36  ;;  %v8446_v30 = vld [vmem:[#allocation42_spill] sm:$0xff] }
 0x301   : > { %v7035_v13 = vmul.f32 0.5, %v2545_v52  ;;  %4916 = vrsqrt.f32 %v7022_v14  ;;  %v1829_v55 = vadd.f32 %v1828_v39, %v7013_v21  ;;  %v2773_v5 = vmul.f32 %v2522_v53, %v2293_v57  ;;  %v8447_v1 = vld [vmem:[#allocation34_spill] sm:$0xff] }
 0x302   : > { %2145 = vadd.xlane.f32.xlu2 %v2144_v0  ;;  %v2236_v15 = vsub.f32 %v2172_v4, %v2204_v9  ;;  %v2777_v46 = vmul.f32 %v2532_v33, %v2297_v17  ;;  %v2294_v42 = vsub.f32 %v8445_v18, %v6773_v22  ;;  %v2298_v48 = vsub.f32 %v8446_v30, %v6803_v36  ;;  %v8450_v30 = vld [vmem:[#allocation98_spill] sm:$0xff] }
 0x303   : > { %v7045_v60 = vmul.f32 %v6997_v37, %v6997_v37  ;;  %v2911_v61 = vmul.f32 %v6369_v23, %v2773_v5  ;;  %v2295_v52 = vsub.f32 %v8447_v1, %v6773_v22  ;;  %v2299_v43 = vsub.f32 %v8448_v44, %v6803_v36 }
 0x304   : > { %vm2540_vm4 = vweird.f32 %v6946_v41  ;;  %v7053_v4 = vadd.f32 1e-05, %v2236_v15  ;;  %v2915_v8 = vmul.f32 %v6369_v23, %v2777_v46  ;;  %v2774_v39 = vmul.f32 %v2522_v53, %v2294_v42  ;;  %v8449_v15 = vld [vmem:[#allocation35_spill] sm:$0xff] }
 0x305   : > { %v2778_v45 = vmul.f32 %v2532_v33, %v2298_v48  ;;  %v1408_v57 = vadd.f32 %v1407_v54, %v5835_v16  ;;  %v3049_v0 = vadd.f32 %v6386_v11, %v2911_v61  ;;  %v2775_v9 = vmul.f32 %v2522_v53, %v2295_v52 }
 0x306   : > { %v2779_v6 = vmul.f32 %v2532_v33, %v2299_v43  ;;  %vm2539_vm5 = vweird.f32 %v6912_v20  ;;  %vm2550_vm6 = vweird.f32 %v6971_v29  ;;  %4918 = vrsqrt.f32 %v7053_v4  ;;  %1830 = vadd.xlane.f32.xlu0 %v1829_v55 }
 0x307   : > { %v3053_v17 = vadd.f32 %v6386_v11, %v2915_v8  ;;  %v2912_v5 = vmul.f32 %v6389_v3, %v2774_v39  ;;  %v2296_v46 = vsub.f32 %v8449_v15, %v6773_v22  ;;  %v7065_v18 = vpop.eup %4916  ;;  %v2916_v16 = vmul.f32 %v6389_v3, %v2778_v45  ;;  %v1585_v39 = vpop.f32.mrf.mxu2  ;;  %vm2541_vm8 = vmor %vm2539_vm5, %vm2540_vm4 }
 0x308   : > { %v2913_v54 = vmul.f32 %v6399_v25, %v2775_v9  ;;  %v2917_v42 = vmul.f32 %v6399_v25, %v2779_v6  ;;  %v2300_v48 = vsub.f32 %v8450_v30, %v6803_v36  ;;  %vm2549_vm7 = vweird.f32 %v6942_v47  ;;  %v1761_v45 = vpop.xlane.xlu2 %1760  ;;  %v1496_v30 = vpop.f32.mrf.mxu1 }
 0x309   : > { %v2554_v55 = vmul.f32 %v7065_v18, %v7022_v14  ;;  %v3177_v61 = vmax.f32 %v3049_v0, 0.0  ;;  %v3181_v1 = vmax.f32 %v3053_v17, 0.0  ;;  %v3050_v22 = vadd.f32 %v6392_v7, %v2912_v5  ;;  %vm2551_vm9 = vmor %vm2549_vm7, %vm2550_vm6 }
 0x30a   : > { %v3054_v52 = vadd.f32 %v6392_v7, %v2916_v16  ;;  %v3051_v44 = vadd.f32 %v6431_v58, %v2913_v54  ;;  %v3055_v43 = vadd.f32 %v6431_v58, %v2917_v42  ;;  %v2776_v8 = vmul.f32 %v2522_v53, %v2296_v46  ;;  %v2081_v46 = vpop.xlane.xlu1 %2080 }
 0x30b   : > { %v2547_v36 = vsub.f32 1.5, %v7035_v13  ;;  %v3285_v9 = vpack.c.bf16 %v3181_v1, %v3177_v61  ;;  %v3178_v6 = vmax.f32 %v3050_v22, 0.0  ;;  %v2780_v15 = vmul.f32 %v2532_v33, %v2300_v48  ;;  %v1674_v61 = vpop.f32.mrf.mxu3 }
 0x30c   : > { %v3182_v37 = vmax.f32 %v3054_v52, 0.0  ;;  %v3179_v0 = vmax.f32 %v3051_v44, 0.0  ;;  %v3183_v17 = vmax.f32 %v3055_v43, 0.0  ;;  %v2914_v5 = vmul.f32 %v6448_v32, %v2776_v8  ;;  %v7081_v27 = vpop.eup %4918  ;;  %v1766_v8 = vpop.xlane.xlu0 %1765 }
 0x30d   : > { %v2555_v16 = vmul.f32 %v7065_v18, %v2554_v55  ;;  %v7084_v54 = vadd.f32 %v1496_v30, %v1408_v57  ;;  %3622 = vmatmul.bf16.gmra.mxu0 %v3285_v9  ;;  %v2918_v53 = vmul.f32 %v6448_v32, %v2780_v15  ;;  %v1586_v13 = vadd.f32 %v1585_v39, %v5847_v38 }
 0x30e   : > { %v2564_v33 = vmul.f32 %v7081_v27, %v7053_v4  ;;  %v3286_v42 = vpack.c.bf16 %v3182_v37, %v3178_v6  ;;  %v3287_v48 = vpack.c.bf16 %v3183_v17, %v3179_v0  ;;  %v1992_v1 = vmul.f32 %v7013_v21, %v7013_v21 }
 0x30f   : > { %v2548_v22 = vmul.f32 %v6971_v29, %v2547_v36  ;;  %v3052_v57 = vadd.f32 %v6474_v59, %v2914_v5  ;;  %v3056_v55 = vadd.f32 %v6474_v59, %v2918_v53  ;;  %v7095_v52 = vadd.f32 %v1674_v61, %v1586_v13  ;;  %v8451_v53 = vld [vmem:[#allocation43_spill] sm:$0xff]  ;;  %v8452_v13 = vld [vmem:[#allocation45_spill] sm:$0xff] }
 0x310   : > { %v2565_v38 = vmul.f32 %v7081_v27, %v2564_v33  ;;  %3711 = vmatmul.bf16.gmra.mxu1 %v3286_v42  ;;  %3800 = vmatmul.bf16.gmra.mxu2 %v3287_v48  ;;  %v2148_v37 = vadd.f32 %v6567_v35, %v7045_v60  ;;  %v7104_v44 = vmul.f32 0.001953125, %v1761_v45  ;;  %v2173_v43 = vmul.f32 0.001953125, %v2081_v46  ;;  %v8453_v33 = vld [vmem:[#allocation44_spill] sm:$0xff] }
 0x311   : > { %v7108_v39 = vsel %vm2541_vm8, %v6946_v41, %v7029_v51  ;;  %v3180_v36 = vmax.f32 %v3052_v57, 0.0  ;;  %v3184_v9 = vmax.f32 %v3056_v55, 0.0  ;;  %v1833_v20 = vadd.f32 %v6707_v56, %v7084_v54  ;;  %v2086_v41 = vpop.xlane.xlu2 %2085  ;;  %v8454_v55 = vld [vmem:[#allocation48_spill] sm:$0xff] }
 0x312   : > { %v2556_v6 = vmul.f32 0.5, %v2555_v16  ;;  %v2149_v35 = vadd.f32 %v2148_v37, %v1992_v1  ;;  %v2205_v60 = vmul.f32 %v7104_v44, %v7104_v44  ;;  %v1995_v45 = vmul.f32 %v7084_v54, %v7084_v54 }
 0x313   : > { %v7121_v51 = vsel %vm2551_vm9, %v6971_v29, %v2548_v22  ;;  %v3288_v15 = vpack.c.bf16 %v3184_v9, %v3180_v36  ;;  %v1834_v56 = vadd.f32 %v1833_v20, %v7095_v52  ;;  %v1996_v30 = vmul.f32 %v7095_v52, %v7095_v52 }
 0x314   : > { %v2566_v47 = vmul.f32 0.5, %v2565_v38  ;;  %2150 = vadd.xlane.f32.xlu2 %v2149_v35  ;;  %v2237_v0 = vsub.f32 %v2173_v43, %v2205_v60  ;;  %v2153_v17 = vadd.f32 %v6818_v12, %v1995_v45  ;;  %v7127_v5 = vmul.f32 0.001953125, %v1766_v8  ;;  %v8455_v45 = vld [vmem:[#allocation40_spill] sm:$0xff] }
 0x315   : > { %3889 = vmatmul.bf16.gmra.mxu3 %v3288_v15  ;;  %1835 = vadd.xlane.f32.xlu1 %v1834_v56  ;;  %v2174_v16 = vmul.f32 0.001953125, %v2086_v41  ;;  %v2301_v29 = vsub.f32 %v8451_v53, %v6882_v2  ;;  %v2305_v46 = vsub.f32 %v8452_v13, %v6915_v31  ;;  %v2302_v42 = vsub.f32 %v8453_v33, %v6882_v2  ;;  %v8456_v15 = vld [vmem:[#allocation99_spill] sm:$0xff]  ;;  %v8457_v13 = vld [vmem:[#allocation41_spill] sm:$0xff] }
 0x316   : > { %v2557_v48 = vsub.f32 1.5, %v2556_v6  ;;  %vm2560_vm10 = vweird.f32 %v7065_v18  ;;  %v7136_v61 = vadd.f32 1e-05, %v2237_v0  ;;  %v2154_v12 = vadd.f32 %v2153_v17, %v1996_v30  ;;  %v1771_v30 = vpop.xlane.xlu0 %1770 }
 0x317   : > { %v2206_v1 = vmul.f32 %v7127_v5, %v7127_v5  ;;  %v2781_v22 = vmul.f32 %v7108_v39, %v2301_v29  ;;  %v2785_v57 = vmul.f32 %v7121_v51, %v2305_v46  ;;  %v2306_v38 = vsub.f32 %v8454_v55, %v6915_v31  ;;  %v8458_v55 = vld [vmem:[#allocation100_spill] sm:$0xff] }
 0x318   : > { %v2782_v37 = vmul.f32 %v7108_v39, %v2302_v42  ;;  %vm2559_vm11 = vweird.f32 %v7022_v14  ;;  %v2567_v43 = vsub.f32 1.5, %v2566_v47  ;;  %vm2570_vm12 = vweird.f32 %v7081_v27  ;;  %2155 = vadd.xlane.f32.xlu0 %v2154_v12 }
 0x319   : > { %4920 = vrsqrt.f32 %v7136_v61  ;;  %v2238_v8 = vsub.f32 %v2174_v16, %v2206_v1  ;;  %vm2569_vm13 = vweird.f32 %v7053_v4  ;;  %v2919_v36 = vmul.f32 %v6369_v23, %v2781_v22  ;;  %vm2561_vm14 = vmor %vm2559_vm11, %vm2560_vm10 }
 0x31a   : > { %v2923_v9 = vmul.f32 %v6369_v23, %v2785_v57  ;;  %v2786_v20 = vmul.f32 %v7121_v51, %v2306_v38  ;;  %v2920_v6 = vmul.f32 %v6389_v3, %v2782_v37  ;;  %v2558_v35 = vmul.f32 %v7065_v18, %v2557_v48  ;;  %vm2571_vm15 = vmor %vm2569_vm13, %vm2570_vm12 }
 0x31b   : > { %v7154_v60 = vadd.f32 1e-05, %v2238_v8  ;;  %v2303_v41 = vsub.f32 %v8455_v45, %v6882_v2  ;;  %v2307_v56 = vsub.f32 %v8456_v15, %v6915_v31  ;;  %v3057_v47 = vadd.f32 %v6386_v11, %v2919_v36  ;;  %v2091_v8 = vpop.xlane.xlu2 %2090 }
 0x31c   : > { %v3061_v0 = vadd.f32 %v6386_v11, %v2923_v9  ;;  %v2924_v17 = vmul.f32 %v6389_v3, %v2786_v20  ;;  %v3058_v16 = vadd.f32 %v6392_v7, %v2920_v6  ;;  %v2304_v46 = vsub.f32 %v8457_v13, %v6882_v2 }
 0x31d   : > { %4922 = vrsqrt.f32 %v7154_v60  ;;  %v2783_v53 = vmul.f32 %v7108_v39, %v2303_v41  ;;  %v2787_v29 = vmul.f32 %v7121_v51, %v2307_v56  ;;  %v2568_v33 = vmul.f32 %v7081_v27, %v2567_v43 }
 0x31e   : > { %v3185_v42 = vmax.f32 %v3057_v47, 0.0  ;;  %v3189_v48 = vmax.f32 %v3061_v0, 0.0  ;;  %v3062_v12 = vadd.f32 %v6392_v7, %v2924_v17  ;;  %v2308_v38 = vsub.f32 %v8458_v55, %v6915_v31  ;;  %v1776_v47 = vpop.xlane.xlu1 %1775  ;;  %v8459_v55 = vld [vmem:[#allocation49_spill] sm:$0xff] }
 0x31f   : > { %v7171_v1 = vpop.eup %4920  ;;  %v2921_v22 = vmul.f32 %v6399_v25, %v2783_v53  ;;  %v2925_v57 = vmul.f32 %v6399_v25, %v2787_v29  ;;  %v2784_v37 = vmul.f32 %v7108_v39, %v2304_v46  ;;  %v3186_v36 = vmax.f32 %v3058_v16, 0.0  ;;  %v2096_v53 = vpop.xlane.xlu0 %2095 }
 0x320   : > { %v2574_v2 = vmul.f32 %v7171_v1, %v7136_v61  ;;  %v3289_v43 = vpack.c.bf16 %v3189_v48, %v3185_v42  ;;  %v3190_v9 = vmax.f32 %v3062_v12, 0.0  ;;  %v2788_v45 = vmul.f32 %v7121_v51, %v2308_v38 }
 0x321   : > { %v3059_v20 = vadd.f32 %v6431_v58, %v2921_v22  ;;  %v3063_v6 = vadd.f32 %v6431_v58, %v2925_v57  ;;  %v2922_v41 = vmul.f32 %v6448_v32, %v2784_v37  ;;  %v7189_v15 = vmul.f32 0.001953125, %v1771_v30  ;;  %v8460_v37 = vld [vmem:[#allocation51_spill] sm:$0xff] }
 0x322   : > { %v2575_v31 = vmul.f32 %v7171_v1, %v2574_v2  ;;  %3627 = vmatmul.bf16.gmra.mxu0 %v3289_v43  ;;  %v3290_v39 = vpack.c.bf16 %v3190_v9, %v3186_v36  ;;  %v2175_v56 = vmul.f32 0.001953125, %v2091_v8  ;;  %v2926_v14 = vmul.f32 %v6448_v32, %v2788_v45  ;;  %v8461_v45 = vld [vmem:[#allocation50_spill] sm:$0xff] }
 0x323   : > { %v7191_v0 = vpop.eup %4922  ;;  %v3187_v51 = vmax.f32 %v3059_v20, 0.0  ;;  %v3191_v17 = vmax.f32 %v3063_v6, 0.0  ;;  %v3060_v16 = vadd.f32 %v6474_v59, %v2922_v41  ;;  %v7200_v29 = vsel %vm2561_vm14, %v7065_v18, %v2558_v35 }
 0x324   : > { %v7203_v30 = vsel %vm2571_vm15, %v7081_v27, %v2568_v33  ;;  %v2584_v13 = vmul.f32 %v7191_v0, %v7154_v60  ;;  %3716 = vmatmul.bf16.gmra.mxu1 %v3290_v39  ;;  %v2207_v4 = vmul.f32 %v7189_v15, %v7189_v15  ;;  %v2576_v46 = vmul.f32 0.5, %v2575_v31 }
 0x325   : > { %v3291_v42 = vpack.c.bf16 %v3191_v17, %v3187_v51  ;;  %v3064_v48 = vadd.f32 %v6474_v59, %v2926_v14  ;;  %v7210_v12 = vmul.f32 0.001953125, %v1776_v47  ;;  %v3188_v18 = vmax.f32 %v3060_v16, 0.0  ;;  %v8462_v51 = vld [vmem:[#allocation52_spill] sm:$0xff]  ;;  %v8463_v16 = vld [vmem:[#allocation46_spill] sm:$0xff] }
 0x326   : > { %v2585_v22 = vmul.f32 %v7191_v0, %v2584_v13  ;;  %v2239_v35 = vsub.f32 %v2175_v56, %v2207_v4  ;;  %v2176_v57 = vmul.f32 0.001953125, %v2096_v53  ;;  %v2309_v38 = vsub.f32 %v8459_v55, %v6987_v63 }
 0x327   : > { %3805 = vmatmul.bf16.gmra.mxu2 %v3291_v42  ;;  %v3192_v27 = vmax.f32 %v3064_v48, 0.0  ;;  %v2208_v33 = vmul.f32 %v7210_v12, %v7210_v12  ;;  %v2313_v8 = vsub.f32 %v8460_v37, %v7019_v26  ;;  %v2310_v41 = vsub.f32 %v8461_v45, %v6987_v63  ;;  %v1781_v48 = vpop.xlane.xlu1 %1780 }
 0x328   : > { %v7219_v2 = vadd.f32 1e-05, %v2239_v35  ;;  %v2789_v9 = vmul.f32 %v7200_v29, %v2309_v38  ;;  %v2586_v6 = vmul.f32 0.5, %v2585_v22  ;;  %v2577_v31 = vsub.f32 1.5, %v2576_v46  ;;  %v8464_v46 = vld [vmem:[#allocation101_spill] sm:$0xff] }
 0x329   : > { %v3292_v43 = vpack.c.bf16 %v3192_v27, %v3188_v18  ;;  %v2240_v36 = vsub.f32 %v2176_v57, %v2208_v33  ;;  %v2793_v20 = vmul.f32 %v7203_v30, %v2313_v8  ;;  %vm2580_vm0 = vweird.f32 %v7171_v1 }
 0x32a   : > { %4924 = vrsqrt.f32 %v7219_v2  ;;  %v2927_v56 = vmul.f32 %v6369_v23, %v2789_v9  ;;  %v2314_v17 = vsub.f32 %v8462_v51, %v7019_v26  ;;  %v2790_v14 = vmul.f32 %v7200_v29, %v2310_v41  ;;  %v8465_v9 = vld [vmem:[#allocation47_spill] sm:$0xff] }
 0x32b   : > { %3894 = vmatmul.bf16.gmra.mxu3 %v3292_v43  ;;  %v7226_v39 = vadd.f32 1e-05, %v2240_v36  ;;  %v2931_v47 = vmul.f32 %v6369_v23, %v2793_v20  ;;  %v2311_v53 = vsub.f32 %v8463_v16, %v6987_v63  ;;  %vm2590_vm1 = vweird.f32 %v7191_v0 }
 0x32c   : > { %v3065_v13 = vadd.f32 %v6386_v11, %v2927_v56  ;;  %v2315_v42 = vsub.f32 %v8464_v46, %v7019_v26  ;;  %vm2579_vm2 = vweird.f32 %v7136_v61  ;;  %v2587_v22 = vsub.f32 1.5, %v2586_v6  ;;  %v7294_v61 = vld [vmem:[%s8074_s6] ss:$0 sm:$0xff] }
 0x32d   : > { %4926 = vrsqrt.f32 %v7226_v39  ;;  %v3069_v4 = vadd.f32 %v6386_v11, %v2931_v47  ;;  %v2794_v18 = vmul.f32 %v7203_v30, %v2314_v17  ;;  %v2928_v35 = vmul.f32 %v6389_v3, %v2790_v14  ;;  %vm2581_vm4 = vmor %vm2579_vm2, %vm2580_vm0 }
 0x32e   : > { %v2791_v57 = vmul.f32 %v7200_v29, %v2311_v53  ;;  %v2578_v27 = vmul.f32 %v7171_v1, %v2577_v31  ;;  %vm2589_vm3 = vweird.f32 %v7154_v60  ;;  %v3193_v33 = vmax.f32 %v3065_v13, 0.0  ;;  %v8466_v31 = vld [vmem:[#allocation102_spill] sm:$0xff] }
 0x32f   : > { %v3197_v55 = vmax.f32 %v3069_v4, 0.0  ;;  %v2795_v38 = vmul.f32 %v7203_v30, %v2315_v42  ;;  %v2932_v8 = vmul.f32 %v6389_v3, %v2794_v18  ;;  %v3066_v43 = vadd.f32 %v6392_v7, %v2928_v35  ;;  %vm2591_vm5 = vmor %vm2589_vm3, %vm2590_vm1 }
 0x330   : > { %v7249_v37 = vpop.eup %4924  ;;  %v2929_v36 = vmul.f32 %v6399_v25, %v2791_v57  ;;  %v2312_v20 = vsub.f32 %v8465_v9, %v6987_v63  ;;  %v2316_v56 = vsub.f32 %v8466_v31, %v7019_v26  ;;  %v2588_v47 = vmul.f32 %v7191_v0, %v2587_v22  ;;  %v2101_v26 = vpop.xlane.xlu0 %2100 }
 0x331   : > { %v2594_v6 = vmul.f32 %v7249_v37, %v7219_v2  ;;  %v3293_v45 = vpack.c.bf16 %v3197_v55, %v3193_v33  ;;  %v2933_v41 = vmul.f32 %v6399_v25, %v2795_v38  ;;  %v3070_v51 = vadd.f32 %v6392_v7, %v2932_v8  ;;  %v1786_v55 = vpop.xlane.xlu2 %1785  ;;  %v2106_v38 = vpop.xlane.xlu1 %2105 }
 0x332   : > { %v3067_v17 = vadd.f32 %v6431_v58, %v2929_v36  ;;  %v2792_v14 = vmul.f32 %v7200_v29, %v2312_v20  ;;  %v2796_v13 = vmul.f32 %v7203_v30, %v2316_v56  ;;  %v7270_v4 = vmul.f32 0.001953125, %v1781_v48 }
 0x333   : > { %v7265_v16 = vpop.eup %4926  ;;  %v2595_v63 = vmul.f32 %v7249_v37, %v2594_v6  ;;  %3632 = vmatmul.bf16.gmra.mxu0 %v3293_v45  ;;  %v3071_v53 = vadd.f32 %v6431_v58, %v2933_v41  ;;  %v3194_v42 = vmax.f32 %v3066_v43, 0.0  ;;  %v3198_v22 = vmax.f32 %v3070_v51, 0.0  ;;  %v3598_v51 = vpop.f32.mrf.mxu0 }
 0x334   : > { %v2604_v46 = vmul.f32 %v7265_v16, %v7226_v39  ;;  %v3195_v18 = vmax.f32 %v3067_v17, 0.0  ;;  %v2930_v57 = vmul.f32 %v6448_v32, %v2792_v14  ;;  %v2934_v33 = vmul.f32 %v6448_v32, %v2796_v13  ;;  %v3687_v17 = vpop.f32.mrf.mxu1  ;;  %v7302_v13 = vpop.f32.mrf.mxu2 }
 0x335   : > { %v2596_v35 = vmul.f32 0.5, %v2595_v63  ;;  %v3199_v29 = vmax.f32 %v3071_v53, 0.0  ;;  %v3294_v30 = vpack.c.bf16 %v3198_v22, %v3194_v42  ;;  %v2209_v48 = vmul.f32 %v7270_v4, %v7270_v4  ;;  %v7310_v22 = vpop.f32.mrf.mxu3 }
 0x336   : > { %v2605_v8 = vmul.f32 %v7265_v16, %v2604_v46  ;;  %v2177_v36 = vmul.f32 0.001953125, %v2101_v26  ;;  %v3068_v20 = vadd.f32 %v6474_v59, %v2930_v57  ;;  %v3072_v6 = vadd.f32 %v6474_v59, %v2934_v33 }
 0x337   : > { %v2597_v43 = vsub.f32 1.5, %v2596_v35  ;;  %v3295_v9 = vpack.c.bf16 %v3199_v29, %v3195_v18  ;;  %3721 = vmatmul.bf16.gmra.mxu1 %v3294_v30  ;;  %v7289_v31 = vmul.f32 0.001953125, %v1786_v55  ;;  %v2178_v56 = vmul.f32 0.001953125, %v2106_v38 }
 0x338   : > { %v2606_v45 = vmul.f32 0.5, %v2605_v8  ;;  %v2241_v41 = vsub.f32 %v2177_v36, %v2209_v48  ;;  %v7297_v14 = vsel %vm2581_vm4, %v7171_v1, %v2578_v27  ;;  %v7300_v63 = vsel %vm2591_vm5, %v7191_v0, %v2588_v47  ;;  %v8467_v0 = vld [vmem:[#allocation53_spill] sm:$0xff]  ;;  %v8468_v47 = vld [vmem:[#allocation55_spill] sm:$0xff]  ;;  %v8470_v8 = vld [vmem:[#allocation56_spill] sm:$0xff] }
 0x339   : > { %3810 = vmatmul.bf16.gmra.mxu2 %v3295_v9  ;;  %v3196_v60 = vmax.f32 %v3068_v20, 0.0  ;;  %v3200_v53 = vmax.f32 %v3072_v6, 0.0  ;;  %v2598_v26 = vmul.f32 %v7249_v37, %v2597_v43  ;;  %vm2600_vm6 = vweird.f32 %v7249_v37  ;;  %v8471_v43 = vld [vmem:[#allocation105_spill] sm:$0xff]  ;;  %v8472_v20 = vld [vmem:[#allocation114_spill] sm:$0xff] }
 0x33a   : > { %v7306_v46 = vadd.f32 1e-05, %v2241_v41  ;;  %v2210_v42 = vmul.f32 %v7289_v31, %v7289_v31  ;;  %vm2599_vm7 = vweird.f32 %v7219_v2  ;;  %v2317_v27 = vsub.f32 %v8467_v0, %v7104_v44  ;;  %v8469_v2 = vld [vmem:[#allocation54_spill] sm:$0xff] }
 0x33b   : > { %v3296_v1 = vpack.c.bf16 %v3200_v53, %v3196_v60  ;;  %v2321_v18 = vsub.f32 %v8468_v47, %v7127_v5  ;;  %v2607_v35 = vsub.f32 1.5, %v2606_v45  ;;  %v3599_v57 = vadd.f32 %v7294_v61, %v3598_v51  ;;  %vm2601_vm8 = vmor %vm2599_vm7, %vm2600_vm6 }
 0x33c   : > { %4928 = vrsqrt.f32 %v7306_v46  ;;  %v2242_v29 = vsub.f32 %v2178_v56, %v2210_v42  ;;  %v2797_v33 = vmul.f32 %v7297_v14, %v2317_v27  ;;  %v2318_v38 = vsub.f32 %v8469_v2, %v7104_v44  ;;  %v1791_v27 = vpop.xlane.xlu2 %1790  ;;  %v3689_v2 = vpop.f32.mrf.mxu1 }
 0x33d   : > { %3899 = vmatmul.bf16.gmra.mxu3 %v3296_v1  ;;  %v2801_v55 = vmul.f32 %v7300_v63, %v2321_v18  ;;  %v2322_v30 = vsub.f32 %v8470_v8, %v7127_v5  ;;  %v7326_v48 = vsel %vm2601_vm8, %v7249_v37, %v2598_v26  ;;  %v2319_v9 = vsub.f32 %v8471_v43, %v7104_v44  ;;  %v8474_v43 = vld [vmem:[#allocation121_spill] sm:$0xff] }
 0x33e   : > { %v7328_v36 = vadd.f32 1e-05, %v2242_v29  ;;  %v2323_v6 = vsub.f32 %v8472_v20, %v7127_v5  ;;  %v2935_v45 = vmul.f32 %v6369_v23, %v2797_v33  ;;  %v2798_v56 = vmul.f32 %v7297_v14, %v2318_v38 }
 0x33f   : > { %v2939_v41 = vmul.f32 %v6369_v23, %v2801_v55  ;;  %v2802_v51 = vmul.f32 %v7300_v63, %v2322_v30  ;;  %v3688_v37 = vadd.f32 %v3687_v17, %v3599_v57  ;;  %v2799_v60 = vmul.f32 %v7297_v14, %v2319_v9  ;;  %v8473_v57 = vld [vmem:[#allocation110_spill] sm:$0xff]  ;;  %v3600_v55 = vpop.f32.mrf.mxu0 }
 0x340   : > { %4930 = vrsqrt.f32 %v7328_v36  ;;  %v2803_v53 = vmul.f32 %v7300_v63, %v2323_v6  ;;  %vm2610_vm9 = vweird.f32 %v7265_v16  ;;  %v3073_v26 = vadd.f32 %v6386_v11, %v2935_v45 }
 0x341   : > { %v3077_v42 = vadd.f32 %v6386_v11, %v2939_v41  ;;  %v2936_v1 = vmul.f32 %v6389_v3, %v2798_v56  ;;  %v2940_v0 = vmul.f32 %v6389_v3, %v2802_v51  ;;  %v2608_v18 = vmul.f32 %v7265_v16, %v2607_v35  ;;  %v3778_v35 = vpop.f32.mrf.mxu2  ;;  %v3867_v41 = vpop.f32.mrf.mxu3 }
 0x342   : > { %v7346_v47 = vpop.eup %4928  ;;  %v2937_v17 = vmul.f32 %v6399_v25, %v2799_v60  ;;  %v2941_v29 = vmul.f32 %v6399_v25, %v2803_v53  ;;  %v2320_v33 = vsub.f32 %v8473_v57, %v7104_v44  ;;  %vm2609_vm10 = vweird.f32 %v7226_v39 }
 0x343   : > { %v2614_v38 = vmul.f32 %v7346_v47, %v7306_v46  ;;  %v3201_v8 = vmax.f32 %v3073_v26, 0.0  ;;  %v3205_v30 = vmax.f32 %v3077_v42, 0.0  ;;  %v2324_v9 = vsub.f32 %v8474_v43, %v7127_v5  ;;  %vm2611_vm12 = vmor %vm2609_vm10, %vm2610_vm9 }
 0x344   : > { %v3074_v20 = vadd.f32 %v6392_v7, %v2936_v1  ;;  %v3078_v6 = vadd.f32 %v6392_v7, %v2940_v0  ;;  %v3075_v45 = vadd.f32 %v6431_v58, %v2937_v17  ;;  %v3079_v44 = vadd.f32 %v6431_v58, %v2941_v29  ;;  %v2111_v29 = vpop.xlane.xlu1 %2110 }
 0x345   : > { %v2615_v56 = vmul.f32 %v7346_v47, %v2614_v38  ;;  %v3297_v51 = vpack.c.bf16 %v3205_v30, %v3201_v8  ;;  %v2800_v60 = vmul.f32 %v7297_v14, %v2320_v33  ;;  %v2804_v53 = vmul.f32 %v7300_v63, %v2324_v9 }
 0x346   : > { %v7365_v26 = vpop.eup %4930  ;;  %v3202_v5 = vmax.f32 %v3074_v20, 0.0  ;;  %v3206_v42 = vmax.f32 %v3078_v6, 0.0  ;;  %v3203_v57 = vmax.f32 %v3075_v45, 0.0  ;;  %v3207_v1 = vmax.f32 %v3079_v44, 0.0  ;;  %v1796_v6 = vpop.xlane.xlu0 %1795 }
 0x347   : > { %v2616_v43 = vmul.f32 0.5, %v2615_v56  ;;  %vm2620_vm11 = vweird.f32 %v7346_v47  ;;  %v2624_v0 = vmul.f32 %v7365_v26, %v7328_v36  ;;  %3637 = vmatmul.bf16.gmra.mxu0 %v3297_v51  ;;  %v2938_v17 = vmul.f32 %v6448_v32, %v2800_v60 }
 0x348   : > { %v3298_v38 = vpack.c.bf16 %v3206_v42, %v3202_v5  ;;  %v3299_v14 = vpack.c.bf16 %v3207_v1, %v3203_v57  ;;  %v2942_v63 = vmul.f32 %v6448_v32, %v2804_v53  ;;  %v7372_v33 = vmul.f32 0.001953125, %v1791_v27  ;;  %v2116_v27 = vpop.xlane.xlu2 %2115 }
 0x349   : > { %v2617_v8 = vsub.f32 1.5, %v2616_v43  ;;  %v2625_v30 = vmul.f32 %v7365_v26, %v2624_v0  ;;  %v3076_v9 = vadd.f32 %v6474_v59, %v2938_v17  ;;  %v3777_v20 = vadd.f32 %v7302_v13, %v3688_v37  ;;  %v3603_v43 = vpop.f32.mrf.mxu0 }
 0x34a   : > { %3726 = vmatmul.bf16.gmra.mxu1 %v3298_v38  ;;  %3815 = vmatmul.bf16.gmra.mxu2 %v3299_v14  ;;  %v3080_v45 = vadd.f32 %v6474_v59, %v2942_v63  ;;  %v2211_v44 = vmul.f32 %v7372_v33, %v7372_v33  ;;  %v2179_v56 = vmul.f32 0.001953125, %v2111_v29  ;;  %v3601_v51 = vadd.f32 %v7294_v61, %v3600_v55  ;;  %v3692_v55 = vpop.f32.mrf.mxu1  ;;  %v8476_v63 = vld [vmem:[#allocation59_spill] sm:$0xff] }
 0x34b   : > { %v2618_v60 = vmul.f32 %v7346_v47, %v2617_v8  ;;  %v2626_v53 = vmul.f32 0.5, %v2625_v30  ;;  %v3204_v5 = vmax.f32 %v3076_v9, 0.0  ;;  %v3866_v42 = vadd.f32 %v7310_v22, %v3777_v20  ;;  %v7398_v22 = vpop.f32.mrf.mxu2 }
 0x34c   : > { %v3208_v13 = vmax.f32 %v3080_v45, 0.0  ;;  %v2243_v37 = vsub.f32 %v2179_v56, %v2211_v44  ;;  %v3690_v57 = vadd.f32 %v3689_v2, %v3601_v51  ;;  %v7387_v1 = vmul.f32 0.001953125, %v1796_v6  ;;  %v8477_v44 = vld [vmem:[#allocation58_spill] sm:$0xff] }
 0x34d   : > { %v7390_v0 = vsel %vm2611_vm12, %v7265_v16, %v2608_v18  ;;  %vm2619_vm13 = vweird.f32 %v7306_v46  ;;  %v2627_v17 = vsub.f32 1.5, %v2626_v53  ;;  %3945 = vst [vmem:[%s7395_s19] sm:$0xff] %v3866_v42  ;;  %v2180_v39 = vmul.f32 0.001953125, %v2116_v27  ;;  %v7404_v18 = vpop.f32.mrf.mxu3  ;;  %v8475_v46 = vld [vmem:[#allocation57_spill] sm:$0xff]  ;;  %v8478_v27 = vld [vmem:[#allocation60_spill] sm:$0xff] }
 0x34e   : > { %v3300_v29 = vpack.c.bf16 %v3208_v13, %v3204_v5  ;;  %v7400_v2 = vadd.f32 1e-05, %v2243_v37  ;;  %v3779_v38 = vadd.f32 %v3778_v35, %v3690_v57  ;;  %v2212_v16 = vmul.f32 %v7387_v1, %v7387_v1  ;;  %vm2621_vm14 = vmor %vm2619_vm13, %vm2620_vm11  ;;  %v8480_v37 = vld [vmem:[#allocation20_spill] sm:$0xff] }
 0x34f   : > { %v2325_v14 = vsub.f32 %v8475_v46, %v7189_v15  ;;  %v2329_v8 = vsub.f32 %v8476_v63, %v7210_v12  ;;  %v7413_v30 = vsel %vm2621_vm14, %v7346_v47, %v2618_v60  ;;  %v3604_v20 = vadd.f32 %v7294_v61, %v3603_v43  ;;  %v1801_v63 = vpop.xlane.xlu0 %1800 }
 0x350   : > { %3904 = vmatmul.bf16.gmra.mxu3 %v3300_v29  ;;  %4932 = vrsqrt.f32 %v7400_v2  ;;  %v3868_v35 = vadd.f32 %v3867_v41, %v3779_v38  ;;  %v2244_v9 = vsub.f32 %v2180_v39, %v2212_v16  ;;  %v2326_v56 = vsub.f32 %v8477_v44, %v7189_v15  ;;  %v8479_v41 = vld [vmem:[#allocation124_spill] sm:$0xff]  ;;  %v8481_v39 = vld [vmem:[#allocation19_spill] sm:$0xff] }
 0x351   : > { %v2805_v6 = vmul.f32 %v7326_v48, %v2325_v14  ;;  %v2809_v45 = vmul.f32 %v7390_v0, %v2329_v8  ;;  %v7422_v51 = vmul.f32 %v7365_v26, %v2627_v17  ;;  %v2330_v60 = vsub.f32 %v8478_v27, %v7210_v12 }
 0x352   : > { %3946 = vst [vmem:[%s7395_s19 + $0x8] sm:$0xff] %v3868_v35  ;;  %v7425_v47 = vadd.f32 1e-05, %v2244_v9  ;;  %v2327_v53 = vsub.f32 %v8479_v41, %v7189_v15  ;;  %v2806_v13 = vmul.f32 %v7326_v48, %v2326_v56  ;;  %v2331_v57 = vsub.f32 %v8480_v37, %v7210_v12  ;;  %v3694_v44 = vpop.f32.mrf.mxu1 }
 0x353   : > { %v2943_v5 = vmul.f32 %v6369_v23, %v2805_v6  ;;  %v2947_v42 = vmul.f32 %v6369_v23, %v2809_v45  ;;  %vm2630_vm15 = vweird.f32 %v7365_v26  ;;  %v2810_v43 = vmul.f32 %v7390_v0, %v2330_v60  ;;  %v3605_v45 = vpop.f32.mrf.mxu0 }
 0x354   : > { %4934 = vrsqrt.f32 %v7425_v47  ;;  %v2807_v17 = vmul.f32 %v7326_v48, %v2327_v53  ;;  %v2328_v29 = vsub.f32 %v8481_v39, %v7189_v15  ;;  %v2944_v46 = vmul.f32 %v6389_v3, %v2806_v13  ;;  %v7456_v53 = vpop.f32.mrf.mxu2 }
 0x355   : > { %v3081_v38 = vadd.f32 %v6386_v11, %v2943_v5  ;;  %v3085_v16 = vadd.f32 %v6386_v11, %v2947_v42  ;;  %v2811_v14 = vmul.f32 %v7390_v0, %v2331_v57  ;;  %vm2629_vm0 = vweird.f32 %v7328_v36  ;;  %v7462_v42 = vpop.f32.mrf.mxu3 }
 0x356   : > { %v7446_v8 = vpop.eup %4932  ;;  %v3693_v35 = vadd.f32 %v3692_v55, %v3604_v20  ;;  %v2948_v9 = vmul.f32 %v6389_v3, %v2810_v43  ;;  %v2945_v6 = vmul.f32 %v6399_v25, %v2807_v17  ;;  %v2808_v15 = vmul.f32 %v7326_v48, %v2328_v29  ;;  %vm2631_vm3 = vmor %vm2629_vm0, %vm2630_vm15 }
 0x357   : > { %v2634_v56 = vmul.f32 %v7446_v8, %v7400_v2  ;;  %v3209_v27 = vmax.f32 %v3081_v38, 0.0  ;;  %v3213_v60 = vmax.f32 %v3085_v16, 0.0  ;;  %v2332_v41 = vsub.f32 %v6452_v28, %v7210_v12 }
 0x358   : > { %v3082_v55 = vadd.f32 %v6392_v7, %v2944_v46  ;;  %v3086_v20 = vadd.f32 %v6392_v7, %v2948_v9  ;;  %v2949_v5 = vmul.f32 %v6399_v25, %v2811_v14  ;;  %v3083_v48 = vadd.f32 %v6431_v58, %v2945_v6  ;;  %v2121_v14 = vpop.xlane.xlu2 %2120 }
 0x359   : > { %v2635_v13 = vmul.f32 %v7446_v8, %v2634_v56  ;;  %vm2639_vm1 = vweird.f32 %v7400_v2  ;;  %v3301_v37 = vpack.c.bf16 %v3213_v60, %v3209_v27  ;;  %v2812_v57 = vmul.f32 %v7390_v0, %v2332_v41 }
 0x35a   : > { %v2946_v28 = vmul.f32 %v6448_v32, %v2808_v15  ;;  %v7468_v12 = vpop.eup %4934  ;;  %vm2640_vm2 = vweird.f32 %v7446_v8  ;;  %v3210_v43 = vmax.f32 %v3082_v55, 0.0  ;;  %v3214_v17 = vmax.f32 %v3086_v20, 0.0  ;;  %v1806_v55 = vpop.xlane.xlu1 %1805 }
 0x35b   : > { %v3087_v39 = vadd.f32 %v6431_v58, %v2949_v5  ;;  %v2636_v29 = vmul.f32 0.5, %v2635_v13  ;;  %v2644_v38 = vmul.f32 %v7468_v12, %v7425_v47  ;;  %3642 = vmatmul.bf16.gmra.mxu0 %v3301_v37  ;;  %v3211_v16 = vmax.f32 %v3083_v48, 0.0  ;;  %v2126_v20 = vpop.xlane.xlu0 %2125  ;;  %v3697_v36 = vpop.f32.mrf.mxu1  ;;  %vm2641_vm5 = vmor %vm2639_vm1, %vm2640_vm2 }
 0x35c   : > { %v2950_v46 = vmul.f32 %v6448_v32, %v2812_v57  ;;  %v3302_v0 = vpack.c.bf16 %v3214_v17, %v3210_v43  ;;  %v3084_v6 = vadd.f32 %v6474_v59, %v2946_v28  ;;  %v3782_v15 = vadd.f32 %v7398_v22, %v3693_v35  ;;  %v3608_v17 = vpop.f32.mrf.mxu0 }
 0x35d   : > { %v3215_v9 = vmax.f32 %v3087_v39, 0.0  ;;  %v2637_v56 = vsub.f32 1.5, %v2636_v29  ;;  %v2645_v27 = vmul.f32 %v7468_v12, %v2644_v38  ;;  %v7479_v41 = vmul.f32 0.001953125, %v1801_v63 }
 0x35e   : > { %v3088_v60 = vadd.f32 %v6474_v59, %v2950_v46  ;;  %3731 = vmatmul.bf16.gmra.mxu1 %v3302_v0  ;;  %v3212_v48 = vmax.f32 %v3084_v6, 0.0  ;;  %v3871_v13 = vadd.f32 %v7404_v18, %v3782_v15  ;;  %v2181_v37 = vmul.f32 0.001953125, %v2121_v14  ;;  %v7498_v46 = vpop.f32.mrf.mxu2  ;;  %v7509_v0 = vpop.f32.mrf.mxu3  ;;  %v8483_v15 = vld [vmem:[#allocation63_spill] sm:$0xff] }
 0x35f   : > { %v3303_v5 = vpack.c.bf16 %v3215_v9, %v3211_v16  ;;  %v2638_v22 = vmul.f32 %v7446_v8, %v2637_v56  ;;  %v2646_v35 = vmul.f32 0.5, %v2645_v27  ;;  %v2213_v63 = vmul.f32 %v7479_v41, %v7479_v41 }
 0x360   : > { %v3216_v57 = vmax.f32 %v3088_v60, 0.0  ;;  %v7491_v28 = vsel %vm2631_vm3, %v7365_v26, %v7422_v51  ;;  %3947 = vst [vmem:[%s7395_s19 + $0x10] sm:$0xff] %v3871_v13  ;;  %v3606_v18 = vadd.f32 %v7294_v61, %v3605_v45  ;;  %v7495_v43 = vmul.f32 0.001953125, %v1806_v55  ;;  %v8482_v45 = vld [vmem:[#allocation61_spill] sm:$0xff]  ;;  %v8484_v55 = vld [vmem:[#allocation62_spill] sm:$0xff] }
 0x361   : > { %3820 = vmatmul.bf16.gmra.mxu2 %v3303_v5  ;;  %v2182_v39 = vmul.f32 0.001953125, %v2126_v20  ;;  %v2647_v29 = vsub.f32 1.5, %v2646_v35  ;;  %vm2649_vm4 = vweird.f32 %v7425_v47  ;;  %v2245_v16 = vsub.f32 %v2181_v37, %v2213_v63 }
 0x362   : > { %v3304_v38 = vpack.c.bf16 %v3216_v57, %v3212_v48  ;;  %vm2650_vm6 = vweird.f32 %v7468_v12  ;;  %v3695_v26 = vadd.f32 %v3694_v44, %v3606_v18  ;;  %v2214_v51 = vmul.f32 %v7495_v43, %v7495_v43  ;;  %v8485_v48 = vld [vmem:[#allocation64_spill] sm:$0xff] }
 0x363   : > { %v2333_v14 = vsub.f32 %v8482_v45, %v7270_v4  ;;  %v7512_v9 = vsel %vm2641_vm5, %v7446_v8, %v2638_v22  ;;  %v7514_v6 = vadd.f32 1e-05, %v2245_v16  ;;  %v3609_v2 = vadd.f32 %v7294_v61, %v3608_v17  ;;  %vm2651_vm7 = vmor %vm2649_vm4, %vm2650_vm6 }
 0x364   : > { %3909 = vmatmul.bf16.gmra.mxu3 %v3304_v38  ;;  %v2337_v56 = vsub.f32 %v8483_v15, %v7289_v31  ;;  %v3784_v44 = vadd.f32 %v7456_v53, %v3695_v26  ;;  %v2246_v27 = vsub.f32 %v2182_v39, %v2214_v51  ;;  %v2334_v20 = vsub.f32 %v8484_v55, %v7270_v4  ;;  %v3610_v47 = vpop.f32.mrf.mxu0 }
 0x365   : > { %v2813_v60 = vmul.f32 %v7413_v30, %v2333_v14  ;;  %v2648_v8 = vmul.f32 %v7468_v12, %v2647_v29  ;;  %4936 = vrsqrt.f32 %v7514_v6  ;;  %v2338_v13 = vsub.f32 %v8485_v48, %v7289_v31 }
 0x366   : > { %v2817_v5 = vmul.f32 %v7491_v28, %v2337_v56  ;;  %v3873_v37 = vadd.f32 %v7462_v42, %v3784_v44  ;;  %v7529_v22 = vadd.f32 1e-05, %v2246_v27  ;;  %v2814_v35 = vmul.f32 %v7413_v30, %v2334_v20  ;;  %v3788_v55 = vpop.f32.mrf.mxu2 }
 0x367   : > { %v2951_v53 = vmul.f32 %v6369_v23, %v2813_v60  ;;  %v2818_v63 = vmul.f32 %v7491_v28, %v2338_v13  ;;  %v2335_v18 = vsub.f32 %v6476_v10, %v7270_v4  ;;  %v2339_v17 = vsub.f32 %v6524_v49, %v7289_v31 }
 0x368   : > { %v2955_v57 = vmul.f32 %v6369_v23, %v2817_v5  ;;  %3948 = vst [vmem:[%s7395_s19 + $0x18] sm:$0xff] %v3873_v37  ;;  %v3698_v39 = vadd.f32 %v3697_v36, %v3609_v2  ;;  %4938 = vrsqrt.f32 %v7529_v22  ;;  %v2952_v29 = vmul.f32 %v6389_v3, %v2814_v35  ;;  %v1811_v36 = vpop.xlane.xlu1 %1810  ;;  %v3699_v2 = vpop.f32.mrf.mxu1 }
 0x369   : > { %v3089_v42 = vadd.f32 %v6386_v11, %v2951_v53  ;;  %v2956_v10 = vmul.f32 %v6389_v3, %v2818_v63  ;;  %v2815_v16 = vmul.f32 %v7413_v30, %v2335_v18  ;;  %v2819_v49 = vmul.f32 %v7491_v28, %v2339_v17 }
 0x36a   : > { %v3093_v38 = vadd.f32 %v6386_v11, %v2955_v57  ;;  %v7552_v26 = vsel %vm2651_vm7, %v7468_v12, %v2648_v8  ;;  %v3090_v45 = vadd.f32 %v6392_v7, %v2952_v29  ;;  %v2336_v14 = vsub.f32 %v6493_v24, %v7270_v4  ;;  %v3877_v4 = vpop.f32.mrf.mxu3 }
 0x36b   : > { %v3217_v51 = vmax.f32 %v3089_v42, 0.0  ;;  %v7557_v15 = vpop.eup %4936  ;;  %v3094_v44 = vadd.f32 %v6392_v7, %v2956_v10  ;;  %v2953_v27 = vmul.f32 %v6399_v25, %v2815_v16  ;;  %v2957_v60 = vmul.f32 %v6399_v25, %v2819_v49  ;;  %v2131_v10 = vpop.xlane.xlu0 %2130 }
 0x36c   : > { %v3221_v56 = vmax.f32 %v3093_v38, 0.0  ;;  %v2654_v12 = vmul.f32 %v7557_v15, %v7514_v6  ;;  %v3218_v20 = vmax.f32 %v3090_v45, 0.0  ;;  %v2340_v8 = vsub.f32 %v6530_v50, %v7289_v31 }
 0x36d   : > { %v2816_v24 = vmul.f32 %v7413_v30, %v2336_v14  ;;  %v3222_v48 = vmax.f32 %v3094_v44, 0.0  ;;  %v3091_v13 = vadd.f32 %v6431_v58, %v2953_v27  ;;  %v3095_v37 = vadd.f32 %v6431_v58, %v2957_v60 }
 0x36e   : > { %v3305_v5 = vpack.c.bf16 %v3221_v56, %v3217_v51  ;;  %v7569_v53 = vpop.eup %4938  ;;  %v2655_v35 = vmul.f32 %v7557_v15, %v2654_v12  ;;  %v2820_v57 = vmul.f32 %v7491_v28, %v2340_v8  ;;  %v7574_v18 = vmul.f32 0.001953125, %v1811_v36  ;;  %v1816_v51 = vpop.xlane.xlu2 %1815 }
 0x36f   : > { %v2954_v63 = vmul.f32 %v6448_v32, %v2816_v24  ;;  %vm2659_vm8 = vweird.f32 %v7514_v6  ;;  %v2664_v50 = vmul.f32 %v7569_v53, %v7529_v22  ;;  %v3306_v31 = vpack.c.bf16 %v3222_v48, %v3218_v20  ;;  %v3613_v24 = vpop.f32.mrf.mxu0  ;;  %v8489_v6 = vld [vmem:[#allocation68_spill] sm:$0xff] }
 0x370   : > { %3647 = vmatmul.bf16.gmra.mxu0 %v3305_v5  ;;  %v3219_v30 = vmax.f32 %v3091_v13, 0.0  ;;  %v2656_v17 = vmul.f32 0.5, %v2655_v35  ;;  %v3223_v42 = vmax.f32 %v3095_v37, 0.0  ;;  %v2958_v29 = vmul.f32 %v6448_v32, %v2820_v57  ;;  %v2136_v45 = vpop.xlane.xlu1 %2135  ;;  %v3702_v5 = vpop.f32.mrf.mxu1 }
 0x371   : > { %v3092_v38 = vadd.f32 %v6474_v59, %v2954_v63  ;;  %v2665_v28 = vmul.f32 %v7569_v53, %v2664_v50  ;;  %3736 = vmatmul.bf16.gmra.mxu1 %v3306_v31  ;;  %v3787_v16 = vadd.f32 %v7498_v46, %v3698_v39  ;;  %v3611_v49 = vadd.f32 %v7294_v61, %v3610_v47  ;;  %v7593_v57 = vpop.f32.mrf.mxu2  ;;  %v8486_v63 = vld [vmem:[#allocation65_spill] sm:$0xff] }
 0x372   : > { %v2215_v36 = vmul.f32 %v7574_v18, %v7574_v18  ;;  %v2657_v14 = vsub.f32 1.5, %v2656_v17  ;;  %vm2660_vm9 = vweird.f32 %v7557_v15  ;;  %v3307_v56 = vpack.c.bf16 %v3223_v42, %v3219_v30  ;;  %v7600_v31 = vpop.f32.mrf.mxu3 }
 0x373   : > { %v3096_v44 = vadd.f32 %v6474_v59, %v2958_v29  ;;  %v2666_v27 = vmul.f32 0.5, %v2665_v28  ;;  %v3876_v60 = vadd.f32 %v7509_v0, %v3787_v16  ;;  %v3700_v12 = vadd.f32 %v3699_v2, %v3611_v49  ;;  %vm2661_vm12 = vmor %vm2659_vm8, %vm2660_vm9  ;;  %v8487_v29 = vld [vmem:[#allocation67_spill] sm:$0xff]  ;;  %v8488_v28 = vld [vmem:[#allocation66_spill] sm:$0xff] }
 0x374   : > { %v2183_v20 = vmul.f32 0.001953125, %v2131_v10  ;;  %3825 = vmatmul.bf16.gmra.mxu2 %v3307_v56  ;;  %v3220_v46 = vmax.f32 %v3092_v38, 0.0  ;;  %v7589_v47 = vmul.f32 0.001953125, %v1816_v51  ;;  %v2184_v8 = vmul.f32 0.001953125, %v2136_v45 }
 0x375   : > { %v3224_v39 = vmax.f32 %v3096_v44, 0.0  ;;  %v2658_v48 = vmul.f32 %v7557_v15, %v2657_v14  ;;  %v2667_v13 = vsub.f32 1.5, %v2666_v27  ;;  %3949 = vst [vmem:[%s7395_s19 + $0x20] sm:$0xff] %v3876_v60  ;;  %v3789_v35 = vadd.f32 %v3788_v55, %v3700_v12  ;;  %v8490_v60 = vld [vmem:[#allocation21_spill] sm:$0xff] }
 0x376   : > { %v2247_v37 = vsub.f32 %v2183_v20, %v2215_v36  ;;  %vm2669_vm10 = vweird.f32 %v7529_v22  ;;  %v2216_v2 = vmul.f32 %v7589_v47, %v7589_v47  ;;  %v2341_v50 = vsub.f32 %v8486_v63, %v7372_v33 }
 0x377   : > { %v3308_v0 = vpack.c.bf16 %v3224_v39, %v3220_v46  ;;  %vm2670_vm11 = vweird.f32 %v7569_v53  ;;  %v3878_v17 = vadd.f32 %v3877_v4, %v3789_v35  ;;  %v3614_v55 = vadd.f32 %v7294_v61, %v3613_v24  ;;  %v8491_v39 = vld [vmem:[#allocation85_spill] sm:$0xff] }
 0x378   : > { %v7603_v30 = vadd.f32 1e-05, %v2247_v37  ;;  %v2248_v42 = vsub.f32 %v2184_v8, %v2216_v2  ;;  %v2345_v38 = vsub.f32 %v8487_v29, %v7387_v1  ;;  %v2821_v10 = vmul.f32 %v7512_v9, %v2341_v50  ;;  %vm2671_vm13 = vmor %vm2669_vm10, %vm2670_vm11  ;;  %v3615_v2 = vpop.f32.mrf.mxu0  ;;  %v3704_v63 = vpop.f32.mrf.mxu1 }
 0x379   : > { %3914 = vmatmul.bf16.gmra.mxu3 %v3308_v0  ;;  %v2342_v16 = vsub.f32 %v8488_v28, %v7372_v33  ;;  %v7616_v49 = vsel %vm2661_vm12, %v7557_v15, %v2658_v48  ;;  %v2668_v4 = vmul.f32 %v7569_v53, %v2667_v13  ;;  %3950 = vst [vmem:[%s7395_s19 + $0x28] sm:$0xff] %v3878_v17  ;;  %v1821_v13 = vpop.xlane.xlu2 %1820  ;;  %v7659_v29 = vpop.f32.mrf.mxu2 }
 0x37a   : > { %4940 = vrsqrt.f32 %v7603_v30  ;;  %v2346_v36 = vsub.f32 %v8489_v6, %v7387_v1  ;;  %v7623_v51 = vadd.f32 1e-05, %v2248_v42  ;;  %v2825_v45 = vmul.f32 %v7552_v26, %v2345_v38  ;;  %v7664_v28 = vpop.f32.mrf.mxu3 }
 0x37b   : > { %v2959_v14 = vmul.f32 %v6369_v23, %v2821_v10  ;;  %v2822_v56 = vmul.f32 %v7512_v9, %v2342_v16  ;;  %v3703_v44 = vadd.f32 %v3702_v5, %v3614_v55  ;;  %v2343_v27 = vsub.f32 %v6543_v62, %v7372_v33 }
 0x37c   : > { %v2826_v15 = vmul.f32 %v7552_v26, %v2346_v36  ;;  %v2347_v12 = vsub.f32 %v8490_v60, %v7387_v1  ;;  %4942 = vrsqrt.f32 %v7623_v51  ;;  %v2963_v20 = vmul.f32 %v6369_v23, %v2825_v45  ;;  %v2141_v60 = vpop.xlane.xlu1 %2140 }
 0x37d   : > { %v3097_v46 = vadd.f32 %v6386_v11, %v2959_v14  ;;  %v2344_v8 = vsub.f32 %v8491_v39, %v7372_v33  ;;  %v2960_v24 = vmul.f32 %v6389_v3, %v2822_v56  ;;  %v2823_v5 = vmul.f32 %v7512_v9, %v2343_v27  ;;  %v8492_v33 = vld [vmem:[#allocation104_spill] sm:$0xff] }
 0x37e   : > { %v2964_v62 = vmul.f32 %v6389_v3, %v2826_v15  ;;  %v2827_v48 = vmul.f32 %v7552_v26, %v2347_v12  ;;  %v7647_v37 = vsel %vm2671_vm13, %v7569_v53, %v2668_v4  ;;  %v3101_v35 = vadd.f32 %v6386_v11, %v2963_v20 }
 0x37f   : > { %v2348_v0 = vsub.f32 %v8492_v33, %v7387_v1  ;;  %v2824_v22 = vmul.f32 %v7512_v9, %v2344_v8  ;;  %v3098_v17 = vadd.f32 %v6392_v7, %v2960_v24  ;;  %v2961_v42 = vmul.f32 %v6399_v25, %v2823_v5  ;;  %v1826_v33 = vpop.xlane.xlu0 %1825 }
 0x380   : > { %v7653_v50 = vpop.eup %4940  ;;  %v3102_v55 = vadd.f32 %v6392_v7, %v2964_v62  ;;  %v2965_v53 = vmul.f32 %v6399_v25, %v2827_v48  ;;  %v3225_v1 = vmax.f32 %v3097_v46, 0.0  ;;  %v3229_v10 = vmax.f32 %v3101_v35, 0.0 }
 0x381   : > { %v2674_v38 = vmul.f32 %v7653_v50, %v7603_v30  ;;  %v2828_v9 = vmul.f32 %v7552_v26, %v2348_v0  ;;  %v3226_v16 = vmax.f32 %v3098_v17, 0.0  ;;  %v3099_v6 = vadd.f32 %v6431_v58, %v2961_v42  ;;  %v2146_v0 = vpop.xlane.xlu2 %2145 }
 0x382   : > { %v3230_v4 = vmax.f32 %v3102_v55, 0.0  ;;  %v3103_v36 = vadd.f32 %v6431_v58, %v2965_v53  ;;  %v7668_v45 = vpop.eup %4942  ;;  %v3309_v56 = vpack.c.bf16 %v3229_v10, %v3225_v1  ;;  %v2962_v15 = vmul.f32 %v6448_v32, %v2824_v22 }
 0x383   : > { %v2675_v14 = vmul.f32 %v7653_v50, %v2674_v38  ;;  %v2966_v27 = vmul.f32 %v6448_v32, %v2828_v9  ;;  %vm2680_vm14 = vweird.f32 %v7653_v50  ;;  %v2684_v26 = vmul.f32 %v7668_v45, %v7623_v51 }
 0x384   : > { %v3310_v12 = vpack.c.bf16 %v3230_v4, %v3226_v16  ;;  %v3227_v20 = vmax.f32 %v3099_v6, 0.0  ;;  %3652 = vmatmul.bf16.gmra.mxu0 %v3309_v56  ;;  %v3231_v39 = vmax.f32 %v3103_v36, 0.0  ;;  %v3100_v8 = vadd.f32 %v6474_v59, %v2962_v15  ;;  %v3707_v4 = vpop.f32.mrf.mxu1  ;;  %v8493_v15 = vld [vmem:[#allocation69_spill] sm:$0xff] }
 0x385   : > { %v2676_v46 = vmul.f32 0.5, %v2675_v14  ;;  %v3104_v24 = vadd.f32 %v6474_v59, %v2966_v27  ;;  %v2685_v62 = vmul.f32 %v7668_v45, %v2684_v26  ;;  %v7679_v5 = vmul.f32 0.001953125, %v1821_v13  ;;  %v3618_v13 = vpop.f32.mrf.mxu0  ;;  %v7691_v14 = vpop.f32.mrf.mxu2 }
 0x386   : > { %3741 = vmatmul.bf16.gmra.mxu1 %v3310_v12  ;;  %v3792_v48 = vadd.f32 %v7593_v57, %v3703_v44  ;;  %v2185_v35 = vmul.f32 0.001953125, %v2141_v60  ;;  %v3311_v17 = vpack.c.bf16 %v3231_v39, %v3227_v20  ;;  %v3228_v55 = vmax.f32 %v3100_v8, 0.0  ;;  %v8494_v60 = vld [vmem:[#allocation71_spill] sm:$0xff]  ;;  %v7700_v12 = vpop.f32.mrf.mxu3 }
 0x387   : > { %v2677_v22 = vsub.f32 1.5, %v2676_v46  ;;  %v3232_v42 = vmax.f32 %v3104_v24, 0.0  ;;  %v2686_v53 = vmul.f32 0.5, %v2685_v62  ;;  %v2217_v1 = vmul.f32 %v7679_v5, %v7679_v5 }
 0x388   : > { %v3881_v38 = vadd.f32 %v7600_v31, %v3792_v48  ;;  %v3616_v10 = vadd.f32 %v7294_v61, %v3615_v2  ;;  %3830 = vmatmul.bf16.gmra.mxu2 %v3311_v17  ;;  %v7687_v44 = vmul.f32 0.001953125, %v1826_v33  ;;  %v2186_v16 = vmul.f32 0.001953125, %v2146_v0  ;;  %v8495_v48 = vld [vmem:[#allocation70_spill] sm:$0xff] }
 0x389   : > { %v2678_v9 = vmul.f32 %v7653_v50, %v2677_v22  ;;  %v3312_v57 = vpack.c.bf16 %v3232_v42, %v3228_v55  ;;  %vm2679_vm15 = vweird.f32 %v7603_v30  ;;  %v2687_v6 = vsub.f32 1.5, %v2686_v53  ;;  %v8496_v22 = vld [vmem:[#allocation72_spill] sm:$0xff]  ;;  %v8497_v42 = vld [vmem:[#allocation106_spill] sm:$0xff] }
 0x38a   : > { %3951 = vst [vmem:[%s7395_s19 + $0x30] sm:$0xff] %v3881_v38  ;;  %v2249_v36 = vsub.f32 %v2185_v35, %v2217_v1  ;;  %v3705_v31 = vadd.f32 %v3704_v63, %v3616_v10  ;;  %v2218_v2 = vmul.f32 %v7687_v44, %v7687_v44  ;;  %v3619_v56 = vadd.f32 %v7294_v61, %v3618_v13  ;;  %vm2681_vm0 = vmor %vm2679_vm15, %vm2680_vm14  ;;  %v8499_v13 = vld [vmem:[#allocation125_spill] sm:$0xff] }
 0x38b   : > { %3919 = vmatmul.bf16.gmra.mxu3 %v3312_v57  ;;  %v2349_v27 = vsub.f32 %v8493_v15, %v7479_v41  ;;  %v2353_v26 = vsub.f32 %v8494_v60, %v7495_v43  ;;  %vm2689_vm1 = vweird.f32 %v7623_v51  ;;  %vm2690_vm2 = vweird.f32 %v7668_v45 }
 0x38c   : > { %v7706_v30 = vadd.f32 1e-05, %v2249_v36  ;;  %v3794_v63 = vadd.f32 %v7659_v29, %v3705_v31  ;;  %v7710_v20 = vsel %vm2681_vm0, %v7653_v50, %v2678_v9  ;;  %v2250_v46 = vsub.f32 %v2186_v16, %v2218_v2  ;;  %v8500_v2 = vld [vmem:[#allocation103_spill] sm:$0xff]  ;;  %v3709_v60 = vpop.f32.mrf.mxu1  ;;  %vm2691_vm3 = vmor %vm2689_vm1, %vm2690_vm2 }
 0x38d   : > { %v2829_v39 = vmul.f32 %v7616_v49, %v2349_v27  ;;  %v2833_v8 = vmul.f32 %v7647_v37, %v2353_v26  ;;  %v2688_v24 = vmul.f32 %v7668_v45, %v2687_v6  ;;  %v2350_v35 = vsub.f32 %v8495_v48, %v7479_v41  ;;  %v3620_v27 = vpop.f32.mrf.mxu0 }
 0x38e   : > { %4944 = vrsqrt.f32 %v7706_v30  ;;  %v3883_v62 = vadd.f32 %v7664_v28, %v3794_v63  ;;  %v7719_v33 = vadd.f32 1e-05, %v2250_v46  ;;  %v3708_v29 = vadd.f32 %v3707_v4, %v3619_v56  ;;  %v8498_v28 = vld [vmem:[#allocation107_spill] sm:$0xff] }
 0x38f   : > { %v2967_v50 = vmul.f32 %v6369_v23, %v2829_v39  ;;  %v2971_v0 = vmul.f32 %v6369_v23, %v2833_v8  ;;  %v2354_v17 = vsub.f32 %v8496_v22, %v7495_v43  ;;  %v2830_v55 = vmul.f32 %v7616_v49, %v2350_v35  ;;  %v7753_v8 = vpop.f32.mrf.mxu2  ;;  %v7761_v35 = vpop.f32.mrf.mxu3 }
 0x390   : > { %3952 = vst [vmem:[%s7395_s19 + $0x38] sm:$0xff] %v3883_v62  ;;  %v2351_v53 = vsub.f32 %v8497_v42, %v7479_v41  ;;  %v2355_v38 = vsub.f32 %v8498_v28, %v7495_v43  ;;  %4946 = vrsqrt.f32 %v7719_v33  ;;  %v2352_v9 = vsub.f32 %v8499_v13, %v7479_v41 }
 0x391   : > { %v3105_v1 = vadd.f32 %v6386_v11, %v2967_v50  ;;  %v3109_v10 = vadd.f32 %v6386_v11, %v2971_v0  ;;  %v2834_v57 = vmul.f32 %v7647_v37, %v2354_v17  ;;  %v2968_v16 = vmul.f32 %v6389_v3, %v2830_v55 }
 0x392   : > { %v2831_v4 = vmul.f32 %v7616_v49, %v2351_v53  ;;  %v2835_v6 = vmul.f32 %v7647_v37, %v2355_v38  ;;  %v2356_v56 = vsub.f32 %v8500_v2, %v7495_v43  ;;  %v2832_v15 = vmul.f32 %v7616_v49, %v2352_v9  ;;  %v1831_v43 = vpop.xlane.xlu0 %1830 }
 0x393   : > { %v3233_v36 = vmax.f32 %v3105_v1, 0.0  ;;  %v3237_v31 = vmax.f32 %v3109_v10, 0.0  ;;  %v2972_v41 = vmul.f32 %v6389_v3, %v2834_v57  ;;  %v3106_v63 = vadd.f32 %v6392_v7, %v2968_v16  ;;  %v2151_v57 = vpop.xlane.xlu2 %2150 }
 0x394   : > { %v7743_v26 = vpop.eup %4944  ;;  %v2969_v46 = vmul.f32 %v6399_v25, %v2831_v4  ;;  %v2973_v39 = vmul.f32 %v6399_v25, %v2835_v6  ;;  %v7756_v49 = vsel %vm2691_vm3, %v7668_v45, %v2688_v24  ;;  %v2836_v51 = vmul.f32 %v7647_v37, %v2356_v56 }
 0x395   : > { %v2694_v62 = vmul.f32 %v7743_v26, %v7706_v30  ;;  %v3313_v48 = vpack.c.bf16 %v3237_v31, %v3233_v36  ;;  %vm2700_vm4 = vweird.f32 %v7743_v26  ;;  %v3110_v50 = vadd.f32 %v6392_v7, %v2972_v41  ;;  %v3712_v41 = vpop.f32.mrf.mxu1 }
 0x396   : > { %v3107_v0 = vadd.f32 %v6431_v58, %v2969_v46  ;;  %v3111_v22 = vadd.f32 %v6431_v58, %v2973_v39  ;;  %v7767_v17 = vpop.eup %4946  ;;  %v2970_v24 = vmul.f32 %v6448_v32, %v2832_v15  ;;  %v2974_v55 = vmul.f32 %v6448_v32, %v2836_v51  ;;  %v3623_v15 = vpop.f32.mrf.mxu0 }
 0x397   : > { %v2695_v45 = vmul.f32 %v7743_v26, %v2694_v62  ;;  %3657 = vmatmul.bf16.gmra.mxu0 %v3313_v48  ;;  %v3797_v37 = vadd.f32 %v7691_v14, %v3708_v29  ;;  %v2704_v42 = vmul.f32 %v7767_v17, %v7719_v33  ;;  %v3234_v53 = vmax.f32 %v3106_v63, 0.0  ;;  %v1836_v29 = vpop.xlane.xlu1 %1835 }
 0x398   : > { %v3238_v28 = vmax.f32 %v3110_v50, 0.0  ;;  %v3235_v38 = vmax.f32 %v3107_v0, 0.0  ;;  %v3239_v10 = vmax.f32 %v3111_v22, 0.0  ;;  %v3108_v13 = vadd.f32 %v6474_v59, %v2970_v24  ;;  %v7791_v0 = vpop.f32.mrf.mxu3 }
 0x399   : > { %v2696_v1 = vmul.f32 0.5, %v2695_v45  ;;  %v3112_v9 = vadd.f32 %v6474_v59, %v2974_v55  ;;  %v2705_v16 = vmul.f32 %v7767_v17, %v2704_v42  ;;  %v3886_v6 = vadd.f32 %v7700_v12, %v3797_v37  ;;  %v7785_v12 = vpop.f32.mrf.mxu2  ;;  %v8501_v42 = vld [vmem:[#allocation83_spill] sm:$0xff] }
 0x39a   : > { %v3314_v4 = vpack.c.bf16 %v3238_v28, %v3234_v53  ;;  %v7779_v14 = vmul.f32 0.001953125, %v1831_v43  ;;  %v3315_v31 = vpack.c.bf16 %v3239_v10, %v3235_v38  ;;  %v3236_v2 = vmax.f32 %v3108_v13, 0.0  ;;  %v2156_v48 = vpop.xlane.xlu0 %2155  ;;  %v8503_v10 = vld [vmem:[#allocation73_spill] sm:$0xff] }
 0x39b   : > { %v2697_v36 = vsub.f32 1.5, %v2696_v1  ;;  %v3240_v56 = vmax.f32 %v3112_v9, 0.0  ;;  %v2706_v63 = vmul.f32 0.5, %v2705_v16  ;;  %3953 = vst [vmem:[%s7395_s19 + $0x40] sm:$0xff] %v3886_v6  ;;  %v2187_v46 = vmul.f32 0.001953125, %v2151_v57  ;;  %v8504_v9 = vld [vmem:[#allocation75_spill] sm:$0xff] }
 0x39c   : > { %3746 = vmatmul.bf16.gmra.mxu1 %v3314_v4  ;;  %v2219_v39 = vmul.f32 %v7779_v14, %v7779_v14  ;;  %v3621_v62 = vadd.f32 %v7294_v61, %v3620_v27  ;;  %vm2699_vm5 = vweird.f32 %v7706_v30  ;;  %3835 = vmatmul.bf16.gmra.mxu2 %v3315_v31  ;;  %v7789_v50 = vmul.f32 0.001953125, %v1836_v29  ;;  %v7803_v30 = vld [vmem:[%s8074_s6] ss:$0 sm:$0xff]  ;;  %v8505_v31 = vld [vmem:[#allocation74_spill] sm:$0xff] }
 0x39d   : > { %v2698_v43 = vmul.f32 %v7743_v26, %v2697_v36  ;;  %v3316_v51 = vpack.c.bf16 %v3240_v56, %v3236_v2  ;;  %vm2701_vm6 = vmor %vm2699_vm5, %vm2700_vm4  ;;  %v2707_v22 = vsub.f32 1.5, %v2706_v63  ;;  %vm2709_vm7 = vweird.f32 %v7719_v33 }
 0x39e   : > { %v2251_v61 = vsub.f32 %v2187_v46, %v2219_v39  ;;  %v3710_v27 = vadd.f32 %v3709_v60, %v3621_v62  ;;  %vm2710_vm8 = vweird.f32 %v7767_v17  ;;  %v3624_v24 = vadd.f32 %v7803_v30, %v3623_v15  ;;  %v8502_v60 = vld [vmem:[#allocation84_spill] sm:$0xff]  ;;  %v7830_v56 = vpop.f32.mrf.mxu0  ;;  %v7832_v15 = vpop.f32.mrf.mxu1  ;;  %v8507_v62 = vld [vmem:[#allocation22_spill] sm:$0xff] }
 0x39f   : > { %v7797_v45 = vsel %vm2701_vm6, %v7743_v26, %v2698_v43  ;;  %3924 = vmatmul.bf16.gmra.mxu3 %v3316_v51  ;;  %v2188_v55 = vmul.f32 0.001953125, %v2156_v48  ;;  %v2377_v53 = vsub.f32 %v8501_v42, %v7789_v50  ;;  %v2378_v26 = vsub.f32 %v8502_v60, %v7789_v50  ;;  %v8506_v46 = vld [vmem:[#allocation76_spill] sm:$0xff]  ;;  %v8508_v48 = vld [vmem:[#allocation23_spill] sm:$0xff]  ;;  %vm2711_vm9 = vmor %vm2709_vm7, %vm2710_vm8 }
 0x3a0   : > { %v7806_v37 = vadd.f32 1e-05, %v2251_v61  ;;  %v3799_v28 = vadd.f32 %v7753_v8, %v3710_v27  ;;  %v2379_v38 = vsub.f32 %v7084_v54, %v7789_v50  ;;  %v2220_v1 = vmul.f32 %v7789_v50, %v7789_v50 }
 0x3a1   : > { %v2357_v13 = vsub.f32 %v8503_v10, %v7574_v18  ;;  %v2361_v57 = vsub.f32 %v8504_v9, %v7589_v47  ;;  %v2708_v16 = vmul.f32 %v7767_v17, %v2707_v22  ;;  %v2380_v4 = vsub.f32 %v7095_v52, %v7789_v50  ;;  %v7841_v51 = vpop.f32.mrf.mxu2  ;;  %v8509_v9 = vld [vmem:[#allocation24_spill] sm:$0xff] }
 0x3a2   : > { %4948 = vrsqrt.f32 %v7806_v37  ;;  %v3888_v8 = vadd.f32 %v7761_v35, %v3799_v28  ;;  %v2252_v6 = vsub.f32 %v2188_v55, %v2220_v1  ;;  %v2358_v2 = vsub.f32 %v8505_v31, %v7574_v18 }
 0x3a3   : > { %v2837_v29 = vmul.f32 %v7710_v20, %v2357_v13  ;;  %v2841_v36 = vmul.f32 %v7756_v49, %v2361_v57  ;;  %v3713_v63 = vadd.f32 %v3712_v41, %v3624_v24  ;;  %v2362_v39 = vsub.f32 %v8506_v46, %v7589_v47  ;;  %v7852_v24 = vpop.f32.mrf.mxu3  ;;  %v8510_v46 = vld [vmem:[#allocation25_spill] sm:$0xff] }
 0x3a4   : > { %3954 = vst [vmem:[%s7395_s19 + $0x48] sm:$0xff] %v3888_v8  ;;  %v2359_v35 = vsub.f32 %v8507_v62, %v7574_v18  ;;  %v2363_v43 = vsub.f32 %v8508_v48, %v7589_v47  ;;  %v7847_v22 = vadd.f32 1e-05, %v2252_v6  ;;  %v2838_v27 = vmul.f32 %v7710_v20, %v2358_v2 }
 0x3a5   : > { %v2975_v41 = vmul.f32 %v6369_v23, %v2837_v29  ;;  %v2979_v61 = vmul.f32 %v6369_v23, %v2841_v36  ;;  %v7855_v55 = vsel %vm2711_vm9, %v7767_v17, %v2708_v16  ;;  %v2842_v28 = vmul.f32 %v7756_v49, %v2362_v39 }
 0x3a6   : > { %v2839_v1 = vmul.f32 %v7710_v20, %v2359_v35  ;;  %v2843_v33 = vmul.f32 %v7756_v49, %v2363_v43  ;;  %4950 = vrsqrt.f32 %v7847_v22  ;;  %v2360_v57 = vsub.f32 %v8509_v9, %v7574_v18 }
 0x3a7   : > { %v3113_v10 = vadd.f32 %v6386_v11, %v2975_v41  ;;  %v3117_v13 = vadd.f32 %v6386_v11, %v2979_v61  ;;  %v2976_v6 = vmul.f32 %v6389_v3, %v2838_v27  ;;  %v2980_v17 = vmul.f32 %v6389_v3, %v2842_v28  ;;  %v3628_v28 = vpop.f32.mrf.mxu0 }
 0x3a8   : > { %v4949_v8 = vpop.eup %4948  ;;  %v2977_v16 = vmul.f32 %v6399_v25, %v2839_v1  ;;  %v2981_v29 = vmul.f32 %v6399_v25, %v2843_v33  ;;  %vm2719_vm10 = vweird.f32 %v7806_v37  ;;  %v2364_v39 = vsub.f32 %v8510_v46, %v7589_v47  ;;  %v3717_v1 = vpop.f32.mrf.mxu1 }
 0x3a9   : > { %v2714_v36 = vmul.f32 %v4949_v8, %v7806_v37  ;;  %v3241_v31 = vmax.f32 %v3113_v10, 0.0  ;;  %v3245_v2 = vmax.f32 %v3117_v13, 0.0  ;;  %v3114_v18 = vadd.f32 %v6392_v7, %v2976_v6 }
 0x3aa   : > { %v3118_v62 = vadd.f32 %v6392_v7, %v2980_v17  ;;  %v3115_v35 = vadd.f32 %v6431_v58, %v2977_v16  ;;  %v3119_v48 = vadd.f32 %v6431_v58, %v2981_v29  ;;  %v2840_v61 = vmul.f32 %v7710_v20, %v2360_v57  ;;  %v7879_v9 = vpop.f32.mrf.mxu2 }
 0x3ab   : > { %v2715_v43 = vmul.f32 %v4949_v8, %v2714_v36  ;;  %v3317_v41 = vpack.c.bf16 %v3245_v2, %v3241_v31  ;;  %v2844_v27 = vmul.f32 %v7756_v49, %v2364_v39  ;;  %v3242_v33 = vmax.f32 %v3114_v18, 0.0 }
 0x3ac   : > { %v3246_v10 = vmax.f32 %v3118_v62, 0.0  ;;  %v3243_v13 = vmax.f32 %v3115_v35, 0.0  ;;  %v3247_v47 = vmax.f32 %v3119_v48, 0.0  ;;  %v4951_v6 = vpop.eup %4950  ;;  %v2978_v16 = vmul.f32 %v6448_v32, %v2840_v61 }
 0x3ad   : > { %v2716_v17 = vmul.f32 0.5, %v2715_v43  ;;  %3662 = vmatmul.bf16.gmra.mxu0 %v3317_v41  ;;  %v2982_v29 = vmul.f32 %v6448_v32, %v2844_v27  ;;  %v3802_v36 = vadd.f32 %v7785_v12, %v3713_v63  ;;  %vm2720_vm11 = vweird.f32 %v4949_v8  ;;  %v8511_v41 = vld [vmem:[#allocation77_spill] sm:$0xff] }
 0x3ae   : > { %v2724_v20 = vmul.f32 %v4951_v6, %v7847_v22  ;;  %vm2729_vm12 = vweird.f32 %v7847_v22  ;;  %v3318_v49 = vpack.c.bf16 %v3246_v10, %v3242_v33  ;;  %v3319_v57 = vpack.c.bf16 %v3247_v47, %v3243_v13  ;;  %v7889_v18 = vpop.f32.mrf.mxu3  ;;  %vm2721_vm14 = vmor %vm2719_vm10, %vm2720_vm11  ;;  %v8512_v10 = vld [vmem:[#allocation79_spill] sm:$0xff] }
 0x3af   : > { %v2717_v31 = vsub.f32 1.5, %v2716_v17  ;;  %v3116_v2 = vadd.f32 %v6474_v59, %v2978_v16  ;;  %v3120_v46 = vadd.f32 %v6474_v59, %v2982_v29  ;;  %v3891_v39 = vadd.f32 %v7791_v0, %v3802_v36  ;;  %v8513_v17 = vld [vmem:[#allocation78_spill] sm:$0xff]  ;;  %v3630_v29 = vpop.f32.mrf.mxu0 }
 0x3b0   : > { %v2725_v62 = vmul.f32 %v4951_v6, %v2724_v20  ;;  %vm2730_vm13 = vweird.f32 %v4951_v6  ;;  %3751 = vmatmul.bf16.gmra.mxu1 %v3318_v49  ;;  %3840 = vmatmul.bf16.gmra.mxu2 %v3319_v57  ;;  %v3626_v12 = vadd.f32 %v7803_v30, %v7830_v56  ;;  %v3629_v63 = vadd.f32 %v7803_v30, %v3628_v28  ;;  %v3719_v36 = vpop.f32.mrf.mxu1 }
 0x3b1   : > { %v2718_v35 = vmul.f32 %v4949_v8, %v2717_v31  ;;  %v3244_v48 = vmax.f32 %v3116_v2, 0.0  ;;  %v3248_v43 = vmax.f32 %v3120_v46, 0.0  ;;  %3955 = vst [vmem:[%s7395_s19 + $0x50] sm:$0xff] %v3891_v39  ;;  %v2365_v61 = vsub.f32 %v8511_v41, %v7679_v5  ;;  %vm2731_vm15 = vmor %vm2729_vm12, %vm2730_vm13 }
 0x3b2   : > { %v2726_v0 = vmul.f32 0.5, %v2725_v62  ;;  %v3715_v27 = vadd.f32 %v7832_v15, %v3626_v12  ;;  %v3718_v33 = vadd.f32 %v3717_v1, %v3629_v63  ;;  %v2369_v56 = vsub.f32 %v8512_v10, %v7687_v44  ;;  %v8514_v15 = vld [vmem:[#allocation80_spill] sm:$0xff]  ;;  %v3808_v57 = vpop.f32.mrf.mxu2 }
 0x3b3   : > { %v7903_v13 = vsel %vm2721_vm14, %v4949_v8, %v2718_v35  ;;  %v3320_v28 = vpack.c.bf16 %v3248_v43, %v3244_v48  ;;  %v2845_v47 = vmul.f32 %v7797_v45, %v2365_v61  ;;  %v2366_v16 = vsub.f32 %v8513_v17, %v7679_v5 }
 0x3b4   : > { %v2727_v20 = vsub.f32 1.5, %v2726_v0  ;;  %v3804_v37 = vadd.f32 %v7841_v51, %v3715_v27  ;;  %v2849_v49 = vmul.f32 %v7855_v55, %v2369_v56  ;;  %v2370_v1 = vsub.f32 %v8514_v15, %v7687_v44 }
 0x3b5   : > { %3929 = vmatmul.bf16.gmra.mxu3 %v3320_v28  ;;  %v2983_v8 = vmul.f32 %v6369_v23, %v2845_v47  ;;  %v2846_v31 = vmul.f32 %v7797_v45, %v2366_v16  ;;  %v2367_v2 = vsub.f32 %v6904_v19, %v7679_v5  ;;  %v2371_v46 = vsub.f32 %v6973_v34, %v7687_v44 }
 0x3b6   : > { %v2728_v39 = vmul.f32 %v4951_v6, %v2727_v20  ;;  %v3893_v51 = vadd.f32 %v7852_v24, %v3804_v37  ;;  %v2987_v62 = vmul.f32 %v6369_v23, %v2849_v49  ;;  %v2850_v12 = vmul.f32 %v7855_v55, %v2370_v1  ;;  %v3897_v34 = vpop.f32.mrf.mxu3 }
 0x3b7   : > { %v3121_v63 = vadd.f32 %v6386_v11, %v2983_v8  ;;  %v2984_v35 = vmul.f32 %v6389_v3, %v2846_v31  ;;  %v2847_v19 = vmul.f32 %v7797_v45, %v2367_v2  ;;  %v2851_v48 = vmul.f32 %v7855_v55, %v2371_v46  ;;  %v3633_v37 = vpop.f32.mrf.mxu0 }
 0x3b8   : > { %v7928_v43 = vsel %vm2731_vm15, %v4951_v6, %v2728_v39  ;;  %3956 = vst [vmem:[%s7395_s19 + $0x58] sm:$0xff] %v3893_v51  ;;  %v3125_v24 = vadd.f32 %v6386_v11, %v2987_v62  ;;  %v2988_v41 = vmul.f32 %v6389_v3, %v2850_v12  ;;  %v2368_v22 = vsub.f32 %v6918_v40, %v7679_v5  ;;  %v8515_v6 = vld [vmem:[#allocation86_spill] sm:$0xff]  ;;  %v3722_v49 = vpop.f32.mrf.mxu1 }
 0x3b9   : > { %v3249_v61 = vmax.f32 %v3121_v63, 0.0  ;;  %v3122_v0 = vadd.f32 %v6392_v7, %v2984_v35  ;;  %v2985_v27 = vmul.f32 %v6399_v25, %v2847_v19  ;;  %v2989_v10 = vmul.f32 %v6399_v25, %v2851_v48  ;;  %v8516_v63 = vld [vmem:[#allocation81_spill] sm:$0xff] }
 0x3ba   : > { %v3253_v56 = vmax.f32 %v3125_v24, 0.0  ;;  %v3126_v28 = vadd.f32 %v6392_v7, %v2988_v41  ;;  %v2372_v47 = vsub.f32 %v8515_v6, %v7687_v44  ;;  %v2848_v17 = vmul.f32 %v7797_v45, %v2368_v22  ;;  %v8517_v24 = vld [vmem:[#allocation82_spill] sm:$0xff] }
 0x3bb   : > { %v3250_v16 = vmax.f32 %v3122_v0, 0.0  ;;  %v3123_v20 = vadd.f32 %v6431_v58, %v2985_v27  ;;  %v3127_v40 = vadd.f32 %v6431_v58, %v2989_v10  ;;  %v3807_v5 = vadd.f32 %v7879_v9, %v3718_v33  ;;  %v8518_v10 = vld [vmem:[#allocation88_spill] sm:$0xff] }
 0x3bc   : > { %v3321_v15 = vpack.c.bf16 %v3253_v56, %v3249_v61  ;;  %v3254_v1 = vmax.f32 %v3126_v28, 0.0  ;;  %v2852_v8 = vmul.f32 %v7855_v55, %v2372_v47  ;;  %v2986_v31 = vmul.f32 %v6448_v32, %v2848_v17  ;;  %v3811_v39 = vpop.f32.mrf.mxu2 }
 0x3bd   : > { %v3251_v2 = vmax.f32 %v3123_v20, 0.0  ;;  %v3255_v44 = vmax.f32 %v3127_v40, 0.0  ;;  %v3896_v45 = vadd.f32 %v7889_v18, %v3807_v5  ;;  %v3631_v46 = vadd.f32 %v7803_v30, %v3630_v29 }
 0x3be   : > { %3667 = vmatmul.bf16.gmra.mxu0 %v3321_v15  ;;  %v3322_v51 = vpack.c.bf16 %v3254_v1, %v3250_v16  ;;  %v2990_v9 = vmul.f32 %v6448_v32, %v2852_v8  ;;  %v3124_v33 = vadd.f32 %v6474_v59, %v2986_v31  ;;  %v3634_v62 = vadd.f32 %v7803_v30, %v3633_v37 }
 0x3bf   : > { %v3323_v12 = vpack.c.bf16 %v3255_v44, %v3251_v2  ;;  %3957 = vst [vmem:[%s7395_s19 + $0x60] sm:$0xff] %v3896_v45  ;;  %v3720_v55 = vadd.f32 %v3719_v36, %v3631_v46  ;;  %v2373_v35 = vsub.f32 %v8516_v63, %v7779_v14  ;;  %v2857_v18 = vmul.f32 %v7928_v43, %v2377_v53  ;;  %v3635_v47 = vpop.f32.mrf.mxu0 }
 0x3c0   : > { %3756 = vmatmul.bf16.gmra.mxu1 %v3322_v51  ;;  %v3128_v29 = vadd.f32 %v6474_v59, %v2990_v9  ;;  %v3252_v19 = vmax.f32 %v3124_v33, 0.0  ;;  %v3723_v48 = vadd.f32 %v3722_v49, %v3634_v62  ;;  %v2374_v41 = vsub.f32 %v8517_v24, %v7779_v14  ;;  %v3900_v53 = vpop.f32.mrf.mxu3  ;;  %v3724_v17 = vpop.f32.mrf.mxu1 }
 0x3c1   : > { %3845 = vmatmul.bf16.gmra.mxu2 %v3323_v12  ;;  %v3809_v22 = vadd.f32 %v3808_v57, %v3720_v55  ;;  %v2853_v36 = vmul.f32 %v7903_v13, %v2373_v35  ;;  %v2995_v61 = vmul.f32 %v6369_v23, %v2857_v18  ;;  %v2858_v42 = vmul.f32 %v7928_v43, %v2378_v26 }
 0x3c2   : > { %v3256_v0 = vmax.f32 %v3128_v29, 0.0  ;;  %v2854_v27 = vmul.f32 %v7903_v13, %v2374_v41  ;;  %v2375_v56 = vsub.f32 %v8518_v10, %v7779_v14  ;;  %v2859_v57 = vmul.f32 %v7928_v43, %v2379_v38 }
 0x3c3   : > { %v3898_v28 = vadd.f32 %v3897_v34, %v3809_v22  ;;  %v2991_v6 = vmul.f32 %v6369_v23, %v2853_v36  ;;  %v3133_v60 = vadd.f32 %v6386_v11, %v2995_v61  ;;  %v2996_v26 = vmul.f32 %v6389_v3, %v2858_v42 }
 0x3c4   : > { %v3324_v16 = vpack.c.bf16 %v3256_v0, %v3252_v19  ;;  %v2992_v20 = vmul.f32 %v6389_v3, %v2854_v27  ;;  %v2855_v40 = vmul.f32 %v7903_v13, %v2375_v56  ;;  %v2997_v5 = vmul.f32 %v6399_v25, %v2859_v57  ;;  %v3813_v37 = vpop.f32.mrf.mxu2 }
 0x3c5   : > { %3958 = vst [vmem:[%s7395_s19 + $0x68] sm:$0xff] %v3898_v28  ;;  %v3129_v54 = vadd.f32 %v6386_v11, %v2991_v6  ;;  %v3261_v38 = vmax.f32 %v3133_v60, 0.0  ;;  %v3134_v34 = vadd.f32 %v6392_v7, %v2996_v26  ;;  %v2376_v23 = vsub.f32 %v7013_v21, %v7779_v14 }
 0x3c6   : > { %3934 = vmatmul.bf16.gmra.mxu3 %v3324_v16  ;;  %v3130_v49 = vadd.f32 %v6392_v7, %v2992_v20  ;;  %v2993_v15 = vmul.f32 %v6399_v25, %v2855_v40  ;;  %v3135_v3 = vadd.f32 %v6431_v58, %v2997_v5  ;;  %v2860_v1 = vmul.f32 %v7928_v43, %v2380_v4 }
 0x3c7   : > { %v2856_v11 = vmul.f32 %v7903_v13, %v2376_v23  ;;  %v3812_v8 = vadd.f32 %v3811_v39, %v3723_v48  ;;  %v3257_v31 = vmax.f32 %v3129_v54, 0.0  ;;  %v3262_v2 = vmax.f32 %v3134_v34, 0.0  ;;  %v3638_v39 = vpop.f32.mrf.mxu0 }
 0x3c8   : > { %v3131_v21 = vadd.f32 %v6431_v58, %v2993_v15  ;;  %v2998_v14 = vmul.f32 %v6448_v32, %v2860_v1  ;;  %v3263_v7 = vmax.f32 %v3135_v3, 0.0  ;;  %v3636_v45 = vadd.f32 %v7803_v30, %v3635_v47  ;;  %v3902_v4 = vpop.f32.mrf.mxu3  ;;  %v3727_v51 = vpop.f32.mrf.mxu1 }
 0x3c9   : > { %v2994_v25 = vmul.f32 %v6448_v32, %v2856_v11  ;;  %v3901_v44 = vadd.f32 %v3900_v53, %v3812_v8  ;;  %v3325_v46 = vpack.c.bf16 %v3261_v38, %v3257_v31  ;;  %v3258_v52 = vmax.f32 %v3130_v49, 0.0 }
 0x3ca   : > { %v3136_v50 = vadd.f32 %v6474_v59, %v2998_v14  ;;  %v3259_v43 = vmax.f32 %v3131_v21, 0.0  ;;  %v3725_v13 = vadd.f32 %v3724_v17, %v3636_v45  ;;  %v3639_v33 = vadd.f32 %v7803_v30, %v3638_v39 }
 0x3cb   : > { %3959 = vst [vmem:[%s7395_s19 + $0x70] sm:$0xff] %v3901_v44  ;;  %v3326_v58 = vpack.c.bf16 %v3262_v2, %v3258_v52  ;;  %v3132_v9 = vadd.f32 %v6474_v59, %v2994_v25 }
 0x3cc   : > { %v3327_v32 = vpack.c.bf16 %v3263_v7, %v3259_v43  ;;  %v3814_v62 = vadd.f32 %v3813_v37, %v3725_v13  ;;  %v3264_v12 = vmax.f32 %v3136_v50, 0.0  ;;  %v3728_v35 = vadd.f32 %v3727_v51, %v3639_v33 }
 0x3cd   : > { %v3816_v55 = vpop.f32.mrf.mxu2  ;;  %v3260_v18 = vmax.f32 %v3132_v9, 0.0 }
 0x3ce   : > { %3672 = vmatmul.bf16.gmra.mxu0 %v3325_v46  ;;  %v3903_v63 = vadd.f32 %v3902_v4, %v3814_v62  ;;  %v3817_v29 = vadd.f32 %v3816_v55, %v3728_v35 }
 0x3cf   : > { %v3328_v19 = vpack.c.bf16 %v3264_v12, %v3260_v18  ;;  %v3640_v48 = vpop.f32.mrf.mxu0 }
 0x3d0   : > { %3761 = vmatmul.bf16.gmra.mxu1 %v3326_v58  ;;  %3960 = vst [vmem:[%s7395_s19 + $0x78] sm:$0xff] %v3903_v63  ;;  %v3729_v24 = vpop.f32.mrf.mxu1  ;;  %v3641_v41 = vadd.f32 %v7803_v30, %v3640_v48 }
 0x3d1   : > { %3850 = vmatmul.bf16.gmra.mxu2 %v3327_v32 }
 0x3d2   : > { %v3730_v61 = vadd.f32 %v3729_v24, %v3641_v41 }
 0x3d3   : > { %v3905_v59 = vpop.f32.mrf.mxu3 }
 0x3d4   : > { %v3906_v22 = vadd.f32 %v3905_v59, %v3817_v29 }
 0x3d5   : > { %v3818_v36 = vpop.f32.mrf.mxu2 }
 0x3d6   : > { %3939 = vmatmul.bf16.gmra.mxu3 %v3328_v19  ;;  %3961 = vst [vmem:[%s7395_s19 + $0x80] sm:$0xff] %v3906_v22  ;;  %v3819_v42 = vadd.f32 %v3818_v36, %v3730_v61 }
 0x3d8   : > { %v3643_v53 = vpop.f32.mrf.mxu0 }
 0x3d9   : > { %v3644_v56 = vadd.f32 %v7803_v30, %v3643_v53 }
 0x3db   : > { %v3907_v0 = vpop.f32.mrf.mxu3  ;;  %v3732_v10 = vpop.f32.mrf.mxu1 }
 0x3dc   : > { %v3908_v27 = vadd.f32 %v3907_v0, %v3819_v42  ;;  %v3733_v57 = vadd.f32 %v3732_v10, %v3644_v56 }
 0x3de   : > { %3962 = vst [vmem:[%s7395_s19 + $0x88] sm:$0xff] %v3908_v27 }
 0x3e0   : > { %v3645_v6 = vpop.f32.mrf.mxu0 }
 0x3e1   : > { %v3646_v47 = vadd.f32 %v7803_v30, %v3645_v6 }
 0x3e3   : > { %v3734_v17 = vpop.f32.mrf.mxu1 }
 0x3e4   : > { %v3821_v28 = vpop.f32.mrf.mxu2  ;;  %v3735_v20 = vadd.f32 %v3734_v17, %v3646_v47 }
 0x3e5   : > { %v3822_v60 = vadd.f32 %v3821_v28, %v3733_v57 }
 0x3e7   : > { %v3910_v26 = vpop.f32.mrf.mxu3 }
 0x3e8   : > { %v3911_v16 = vadd.f32 %v3910_v26, %v3822_v60 }
 0x3ea   : > { %3963 = vst [vmem:[%s7395_s19 + $0x90] sm:$0xff] %v3911_v16 }
 0x3ec   : > { %v3823_v40 = vpop.f32.mrf.mxu2 }
 0x3ed   : > { %v3824_v5 = vadd.f32 %v3823_v40, %v3735_v20  ;;  %v3648_v54 = vpop.f32.mrf.mxu0 }
 0x3ee   : > { %v3737_v23 = vpop.f32.mrf.mxu1  ;;  %v3649_v37 = vadd.f32 %v7803_v30, %v3648_v54 }
 0x3ef   : > { %v3912_v38 = vpop.f32.mrf.mxu3 }
 0x3f0   : > { %v3913_v34 = vadd.f32 %v3912_v38, %v3824_v5  ;;  %v3738_v49 = vadd.f32 %v3737_v23, %v3649_v37 }
 0x3f2   : > { %3964 = vst [vmem:[%s7395_s19 + $0x98] sm:$0xff] %v3913_v34 }
 0x3f5   : > { %v3650_v3 = vpop.f32.mrf.mxu0 }
 0x3f6   : > { %v3651_v11 = vadd.f32 %v7803_v30, %v3650_v3  ;;  %v3739_v8 = vpop.f32.mrf.mxu1 }
 0x3f7   : > { %v3826_v15 = vpop.f32.mrf.mxu2 }
 0x3f8   : > { %v3827_v1 = vadd.f32 %v3826_v15, %v3738_v49  ;;  %v3740_v21 = vadd.f32 %v3739_v8, %v3651_v11 }
 0x3fc   : > { %v3915_v31 = vpop.f32.mrf.mxu3 }
 0x3fd   : > { %v3916_v2 = vadd.f32 %v3915_v31, %v3827_v1 }
 0x3ff   : > { %3965 = vst [vmem:[%s7395_s19 + $0xa0] sm:$0xff] %v3916_v2  ;;  %v3828_v14 = vpop.f32.mrf.mxu2 }
 0x400   : > { %v3829_v7 = vadd.f32 %v3828_v14, %v3740_v21 }
 0x401   : > { %v3653_v25 = vpop.f32.mrf.mxu0 }
 0x402   : > { %v3654_v52 = vadd.f32 %v7803_v30, %v3653_v25 }
 0x403   : > { %v3742_v46 = vpop.f32.mrf.mxu1 }
 0x404   : > { %v3917_v44 = vpop.f32.mrf.mxu3  ;;  %v3743_v50 = vadd.f32 %v3742_v46, %v3654_v52 }
 0x405   : > { %v3918_v45 = vadd.f32 %v3917_v44, %v3829_v7 }
 0x407   : > { %3966 = vst [vmem:[%s7395_s19 + $0xa8] sm:$0xff] %v3918_v45 }
 0x409   : > { %v3655_v43 = vpop.f32.mrf.mxu0 }
 0x40a   : > { %v3656_v58 = vadd.f32 %v7803_v30, %v3655_v43 }
 0x40b   : > { %v3831_v4 = vpop.f32.mrf.mxu2  ;;  %v3744_v9 = vpop.f32.mrf.mxu1 }
 0x40c   : > { %v3832_v13 = vadd.f32 %v3831_v4, %v3743_v50  ;;  %v3745_v33 = vadd.f32 %v3744_v9, %v3656_v58 }
 0x40e   : > { %v3920_v39 = vpop.f32.mrf.mxu3 }
 0x40f   : > { %v3921_v51 = vadd.f32 %v3920_v39, %v3832_v13 }
 0x411   : > { %3967 = vst [vmem:[%s7395_s19 + $0xb0] sm:$0xff] %v3921_v51 }
 0x413   : > { %v3833_v32 = vpop.f32.mrf.mxu2 }
 0x414   : > { %v3834_v62 = vadd.f32 %v3833_v32, %v3745_v33  ;;  %v3658_v55 = vpop.f32.mrf.mxu0 }
 0x415   : > { %v3659_v18 = vadd.f32 %v7803_v30, %v3658_v55 }
 0x416   : > { %v3922_v12 = vpop.f32.mrf.mxu3 }
 0x417   : > { %v3923_v63 = vadd.f32 %v3922_v12, %v3834_v62 }
 0x419   : > { %3968 = vst [vmem:[%s7395_s19 + $0xb8] sm:$0xff] %v3923_v63  ;;  %v3747_v35 = vpop.f32.mrf.mxu1 }
 0x41a   : > { %v3748_v29 = vadd.f32 %v3747_v35, %v3659_v18 }
 0x41c   : > { %v3660_v48 = vpop.f32.mrf.mxu0 }
 0x41d   : > { %v3661_v22 = vadd.f32 %v7803_v30, %v3660_v48 }
 0x41f   : > { %v3836_v19 = vpop.f32.mrf.mxu2 }
 0x420   : > { %v3837_v24 = vadd.f32 %v3836_v19, %v3748_v29 }
 0x421   : > { %v3749_v36 = vpop.f32.mrf.mxu1 }
 0x422   : > { %v3925_v59 = vpop.f32.mrf.mxu3  ;;  %v3750_v61 = vadd.f32 %v3749_v36, %v3661_v22 }
 0x423   : > { %v3926_v41 = vadd.f32 %v3925_v59, %v3837_v24 }
 0x425   : > { %3969 = vst [vmem:[%s7395_s19 + $0xc0] sm:$0xff] %v3926_v41 }
 0x427   : > { %v3838_v42 = vpop.f32.mrf.mxu2 }
 0x428   : > { %v3839_v53 = vadd.f32 %v3838_v42, %v3750_v61 }
 0x42a   : > { %v3927_v0 = vpop.f32.mrf.mxu3  ;;  %v3663_v27 = vpop.f32.mrf.mxu0 }
 0x42b   : > { %v3928_v10 = vadd.f32 %v3927_v0, %v3839_v53  ;;  %v3664_v57 = vadd.f32 %v7803_v30, %v3663_v27 }
 0x42d   : > { %3970 = vst [vmem:[%s7395_s19 + $0xc8] sm:$0xff] %v3928_v10  ;;  %v3752_v56 = vpop.f32.mrf.mxu1 }
 0x42e   : > { %v3753_v6 = vadd.f32 %v3752_v56, %v3664_v57 }
 0x432   : > { %v3665_v28 = vpop.f32.mrf.mxu0 }
 0x433   : > { %v3841_v60 = vpop.f32.mrf.mxu2  ;;  %v3666_v17 = vadd.f32 %v7803_v30, %v3665_v28 }
 0x434   : > { %v3842_v26 = vadd.f32 %v3841_v60, %v3753_v6 }
 0x435   : > { %v3754_v47 = vpop.f32.mrf.mxu1 }
 0x436   : > { %v3755_v40 = vadd.f32 %v3754_v47, %v3666_v17 }
 0x438   : > { %v3930_v16 = vpop.f32.mrf.mxu3 }
 0x439   : > { %v3931_v20 = vadd.f32 %v3930_v16, %v3842_v26 }
 0x43b   : > { %3971 = vst [vmem:[%s7395_s19 + $0xd0] sm:$0xff] %v3931_v20  ;;  %v3843_v5 = vpop.f32.mrf.mxu2  ;;  %v3668_v54 = vpop.f32.mrf.mxu0 }
 0x43c   : > { %v3844_v38 = vadd.f32 %v3843_v5, %v3755_v40  ;;  %v3669_v37 = vadd.f32 %v7803_v30, %v3668_v54 }
 0x43d   : > { %v3757_v34 = vpop.f32.mrf.mxu1 }
 0x43e   : > { %v3758_v3 = vadd.f32 %v3757_v34, %v3669_v37 }
 0x440   : > { %v3932_v23 = vpop.f32.mrf.mxu3 }
 0x441   : > { %v3933_v49 = vadd.f32 %v3932_v23, %v3844_v38 }
 0x443   : > { %3972 = vst [vmem:[%s7395_s19 + $0xd8] sm:$0xff] %v3933_v49  ;;  %v3670_v15 = vpop.f32.mrf.mxu0 }
 0x444   : > { %v3846_v1 = vpop.f32.mrf.mxu2  ;;  %v3671_v31 = vadd.f32 %v7803_v30, %v3670_v15 }
 0x445   : > { %v3847_v11 = vadd.f32 %v3846_v1, %v3758_v3  ;;  %v3759_v8 = vpop.f32.mrf.mxu1 }
 0x446   : > { %v3760_v7 = vadd.f32 %v3759_v8, %v3671_v31 }
 0x449   : > { %v3935_v2 = vpop.f32.mrf.mxu3 }
 0x44a   : > { %v3936_v21 = vadd.f32 %v3935_v2, %v3847_v11 }
 0x44b   : > { %v3673_v14 = vpop.f32.mrf.mxu0 }
 0x44c   : > { %3973 = vst [vmem:[%s7395_s19 + $0xe0] sm:$0xff] %v3936_v21  ;;  %v3848_v25 = vpop.f32.mrf.mxu2  ;;  %v3674_v45 = vadd.f32 %v7803_v30, %v3673_v14 }
 0x44d   : > { %v3849_v44 = vadd.f32 %v3848_v25, %v3760_v7  ;;  %v3762_v52 = vpop.f32.mrf.mxu1 }
 0x44e   : > { %v3763_v4 = vadd.f32 %v3762_v52, %v3674_v45 }
 0x451   : > { %v3937_v46 = vpop.f32.mrf.mxu3 }
 0x452   : > { %v3938_v50 = vadd.f32 %v3937_v46, %v3849_v44 }
 0x453   : > { %v3675_v13 = vpop.f32.mrf.mxu0 }
 0x454   : > { %3974 = vst [vmem:[%s7395_s19 + $0xe8] sm:$0xff] %v3938_v50  ;;  %v3851_v43 = vpop.f32.mrf.mxu2  ;;  %v3676_v51 = vadd.f32 %v7803_v30, %v3675_v13 }
 0x455   : > { %v3852_v39 = vadd.f32 %v3851_v43, %v3763_v4  ;;  %v3764_v33 = vpop.f32.mrf.mxu1 }
 0x456   : > { %v3765_v32 = vadd.f32 %v3764_v33, %v3676_v51 }
 0x459   : > { %v3940_v58 = vpop.f32.mrf.mxu3 }
 0x45a   : > { %v3941_v9 = vadd.f32 %v3940_v58, %v3852_v39 }
 0x45c   : > { %3975 = vst [vmem:[%s7395_s19 + $0xf0] sm:$0xff] %v3941_v9  ;;  %v3853_v62 = vpop.f32.mrf.mxu2 }
 0x45d   : > { %v3854_v12 = vadd.f32 %v3853_v62, %v3765_v32 }
 0x461   : > { %v3942_v55 = vpop.f32.mrf.mxu3 }
 0x462   : > { %v3943_v30 = vadd.f32 %v3942_v55, %v3854_v12 }
 0x464   : > { %3976 = vst [vmem:[%s7395_s19 + $0xf8] sm:$0xff] %v3943_v30 }
 0x465   : > { %5160 = shalt.err (!%p5157_p9)
}
 0x466   : > { %s5224_s20 = smov 128   ;;  %s5225_s19 = smov 8  }
 0x467   : > { %4804 = dma.vmem_to_hbm [thread:$0]  (%p5356_p0), %s3991_s10, 4096, %s3993_s30, %s3978_s8, %s5224_s20, %s5224_s20, %s5225_s19  }
 0x468 PF: > { %s4007_s21 = sand.u32 1, %s5199_s24   ;;  %p8519_p10 = scmp.ge.s32.totalorder %s5211_s27, 2 }
 0x469   : > { %s4008_s28 = scalar_lea.sflag [#allocation4], %s4007_s21 }
 0x46a   : > { %p4827_p11 = pnand %p8519_p10, %p5362_p6 }
 0x46c   : > { %p4828_p12 = pneg %p4827_p11 }
 0x46e   : > { %5194 = dma.done.wait (%p4828_p12), %s4008_s28, 4096  }
 0x46f   : > { %5196 = vsyncadd (%p4828_p12), %s4008_s28, 4294963200  ;;  %p23_p2 = scmp.ge.s32.totalorder %s5332_s22, 4   ;;  %s8520_s24 = smov %s5203_s25 }
 0x470   : > { %s8521_s25 = smov %s5207_s26  ;;  %s8522_s26 = smov %s5344_s29 }
 0x471   : > { %s8523_s27 = smov %s5332_s22  ;;  %25 = sbr.rel (!%p23_p2) target bundleno = 11 (0xb), region = 113 }
 0x476   :  { %4014 = vsyncpa [#allocation3], 1 }
 0x477   :  { %4016 = vsyncpa [#allocation3 + $0x1], 1 }
 0x478   :  { %4017 = vsyncpa [#allocation6], 1 }
 0x479   :  { %4018 = vsyncpa [#allocation9], 1 }
 0x47a   :  { %4019 = vsyncpa [#allocation12], 1 }
 0x47b   :  { %4020 = vsyncpa [#allocation4], 1 }
 0x47c   :  { %4022 = vsyncpa [#allocation4 + $0x1], 1 }

</bundles_post_ra>
